<compile_context>
chip_gen: v7x
topology: tpu7x:2x2x1
jax: 0.10.0
libtpu: 0.0.40
codegen_flags: <defaults>
</compile_context>

<pallas_src>
import jax
import jax.numpy as jnp
from jax.experimental import pallas as pl
from jax.experimental.pallas import tpu as pltpu


def _mlp_kernel(x_ref,
                w0, b0, w1, b1, w2, b2, w3, b3, w4, b4, w5, b5,
                o_ref):
    def layer(h, w_ref, b_ref, relu):
        # bf16 x bf16 matmul on the MXU, f32 accumulation, f32 bias/ReLU.
        y = jnp.dot(h.astype(jnp.bfloat16), w_ref[...],
                    preferred_element_type=jnp.float32) + b_ref[...]
        return jnp.maximum(y, 0.0) if relu else y

    h = x_ref[...]
    h = layer(h, w0, b0, True)
    h = layer(h, w1, b1, True)
    h = layer(h, w2, b2, True)
    h = layer(h, w3, b3, True)
    h = layer(h, w4, b4, True)
    o_ref[...] = layer(h, w5, b5, False)


def dnn_max_forward(x, params):
    """x: (B, ...) flattened to (B, 10). params: list of (W(in,out), b(1,out))."""
    B = x.shape[0]
    x2 = x.reshape(B, -1).astype(jnp.float32)            # nn.Flatten()
    in_feat = x2.shape[1]
    assert in_feat == 10, f"expected 10 flattened features, got {in_feat}"

    out_classes = params[-1][0].shape[1]
    LANES = 128
    out_pad = ((out_classes + LANES - 1) // LANES) * LANES

    # Batch tile: >=512 rows for large batches (amortizes per-step overhead,
    # full MXU passes); for tiny batches just round up to the sublane multiple.
    TB = 512
    if B < TB:
        TB = max(8, ((B + 7) // 8) * 8)
    B_pad = ((B + TB - 1) // TB) * TB
    if B_pad != B:
        x2 = jnp.pad(x2, ((0, B_pad - B), (0, 0)))

    flat_args = [x2]
    in_specs = [pl.BlockSpec((TB, in_feat), lambda i: (i, 0))]
    n_layers = len(params)
    for li, (w, b) in enumerate(params):
        w = w.astype(jnp.bfloat16)                        # bf16 weight stream
        b = b.astype(jnp.float32)                         # f32 bias
        if li == n_layers - 1 and out_pad != out_classes:
            w = jnp.pad(w, ((0, 0), (0, out_pad - out_classes)))
            b = jnp.pad(b, ((0, 0), (0, out_pad - out_classes)))
        flat_args.append(w)
        # Constant block index: weights/biases stay VMEM-resident across grid.
        in_specs.append(pl.BlockSpec(w.shape, lambda i: (0, 0)))
        flat_args.append(b)
        in_specs.append(pl.BlockSpec(b.shape, lambda i: (0, 0)))

    out = pl.pallas_call(
        _mlp_kernel,
        out_shape=jax.ShapeDtypeStruct((B_pad, out_pad), jnp.float32),
        grid=(B_pad // TB,),
        in_specs=in_specs,
        out_specs=pl.BlockSpec((TB, out_pad), lambda i: (i, 0)),
        compiler_params=pltpu.CompilerParams(
            dimension_semantics=("parallel",),
            vmem_limit_bytes=32 * 1024 * 1024),
    )(*flat_args)

    return out[:B, :out_classes]


def init_params(key, output_classes):
    """Deterministic init matching the layer shapes of DNN_max.__init__."""
    dims = [10, 1024, 896, 512, 256, 128, output_classes]
    params = []
    for i in range(len(dims) - 1):
        fan_in, fan_out = dims[i], dims[i + 1]
        key, kw, kb = jax.random.split(key, 3)
        bound = 1.0 / jnp.sqrt(fan_in)
        # stored as (in, out); PyTorch stores (out, in) -- kernel does x @ W
        w = jax.random.uniform(kw, (fan_in, fan_out), jnp.float32, -bound, bound)
        b = jax.random.uniform(kb, (1, fan_out), jnp.float32, -bound, bound)
        params.append((w, b))
    return params


if __name__ == "__main__":
    output_classes = 16
    key = jax.random.PRNGKey(0)
    k_params, k_x = jax.random.split(key)

    params = init_params(k_params, output_classes)

    # small input; Flatten() maps (2, 10) -> (2, 10)
    x = jax.random.normal(k_x, (2, 10), jnp.float32)

    out = dnn_max_forward(x, params)
    out = jax.block_until_ready(out)
    assert out.shape == (2, output_classes)

    # Reference in plain JAX with the same bf16-matmul / f32-accumulate
    # semantics (eval-mode dropout == identity).
    h = x.reshape(x.shape[0], -1).astype(jnp.float32)
    for i, (w, b) in enumerate(params):
        h = jnp.dot(h.astype(jnp.bfloat16), w.astype(jnp.bfloat16),
                    preferred_element_type=jnp.float32) + b.astype(jnp.float32)
        if i < len(params) - 1:
            h = jnp.maximum(h, 0.0)
    assert jnp.allclose(out, h, atol=1e-3, rtol=1e-3), (
        f"max abs err {jnp.max(jnp.abs(out - h))}")

    # Loose sanity check against the pure-f32 reference.
    h32 = x.reshape(x.shape[0], -1)
    for i, (w, b) in enumerate(params):
        h32 = h32 @ w + b
        if i < len(params) - 1:
            h32 = jnp.maximum(h32, 0.0)
    assert jnp.allclose(out, h32, atol=5e-2, rtol=5e-2)

    print("KERNEL_OK")
</pallas_src>

<mosaic_0001>
module attributes {stable_mosaic.version = 11 : i64} {
  func.func @_mlp_kernel(%arg0: i32, %arg1: memref<8x10xf32, #tpu.memory_space<vmem>>, %arg2: memref<10x1024xbf16, #tpu.memory_space<vmem>>, %arg3: memref<1x1024xf32, #tpu.memory_space<vmem>>, %arg4: memref<1024x896xbf16, #tpu.memory_space<vmem>>, %arg5: memref<1x896xf32, #tpu.memory_space<vmem>>, %arg6: memref<896x512xbf16, #tpu.memory_space<vmem>>, %arg7: memref<1x512xf32, #tpu.memory_space<vmem>>, %arg8: memref<512x256xbf16, #tpu.memory_space<vmem>>, %arg9: memref<1x256xf32, #tpu.memory_space<vmem>>, %arg10: memref<256x128xbf16, #tpu.memory_space<vmem>>, %arg11: memref<1x128xf32, #tpu.memory_space<vmem>>, %arg12: memref<128x128xbf16, #tpu.memory_space<vmem>>, %arg13: memref<1x128xf32, #tpu.memory_space<vmem>>, %arg14: memref<8x128xf32, #tpu.memory_space<vmem>>) attributes {dimension_semantics = [#tpu.dimension_semantics<parallel>], iteration_bounds = array<i64: 1>, scalar_prefetch = 0 : i64, scratch_operands = 0 : i64, tpu.core_type = #tpu.core_type<tc>, window_params = [{transform_indices = @transform_0, window_bounds = array<i64: 8, 10>}, {pipeline_mode = #tpu.pipeline_mode<synchronous>, transform_indices = @transform_1, window_bounds = array<i64: 10, 1024>}, {pipeline_mode = #tpu.pipeline_mode<synchronous>, transform_indices = @transform_2, window_bounds = array<i64: 1, 1024>}, {pipeline_mode = #tpu.pipeline_mode<synchronous>, transform_indices = @transform_3, window_bounds = array<i64: 1024, 896>}, {pipeline_mode = #tpu.pipeline_mode<synchronous>, transform_indices = @transform_4, window_bounds = array<i64: 1, 896>}, {pipeline_mode = #tpu.pipeline_mode<synchronous>, transform_indices = @transform_5, window_bounds = array<i64: 896, 512>}, {pipeline_mode = #tpu.pipeline_mode<synchronous>, transform_indices = @transform_6, window_bounds = array<i64: 1, 512>}, {pipeline_mode = #tpu.pipeline_mode<synchronous>, transform_indices = @transform_7, window_bounds = array<i64: 512, 256>}, {pipeline_mode = #tpu.pipeline_mode<synchronous>, transform_indices = @transform_8, window_bounds = array<i64: 1, 256>}, {pipeline_mode = #tpu.pipeline_mode<synchronous>, transform_indices = @transform_9, window_bounds = array<i64: 256, 128>}, {pipeline_mode = #tpu.pipeline_mode<synchronous>, transform_indices = @transform_10, window_bounds = array<i64: 1, 128>}, {pipeline_mode = #tpu.pipeline_mode<synchronous>, transform_indices = @transform_11, window_bounds = array<i64: 128, 128>}, {pipeline_mode = #tpu.pipeline_mode<synchronous>, transform_indices = @transform_12, window_bounds = array<i64: 1, 128>}, {transform_indices = @transform_13, window_bounds = array<i64: 8, 128>}]} {
    %c0 = arith.constant 0 : index
    %c0_0 = arith.constant 0 : index
    %0 = vector.load %arg1[%c0, %c0_0] : memref<8x10xf32, #tpu.memory_space<vmem>>, vector<8x10xf32>
    %1 = arith.truncf %0 : vector<8x10xf32> to vector<8x10xbf16>
    %c0_1 = arith.constant 0 : index
    %c0_2 = arith.constant 0 : index
    %2 = vector.load %arg2[%c0_1, %c0_2] : memref<10x1024xbf16, #tpu.memory_space<vmem>>, vector<10x1024xbf16>
    %cst = arith.constant dense<0.000000e+00> : vector<8x1024xf32>
    %3 = tpu.matmul %1, %2, %cst {dimension_numbers = #tpu.dot_dimension_numbers<[1], [0], [0], [1], [0, 0, 1, 1], [], []>} : vector<8x10xbf16>, vector<10x1024xbf16>, vector<8x1024xf32> -> vector<8x1024xf32>
    %c0_3 = arith.constant 0 : index
    %c0_4 = arith.constant 0 : index
    %4 = vector.load %arg3[%c0_3, %c0_4] : memref<1x1024xf32, #tpu.memory_space<vmem>>, vector<1x1024xf32>
    %5 = vector.broadcast %4 : vector<1x1024xf32> to vector<8x1024xf32>
    %6 = arith.addf %3, %5 : vector<8x1024xf32>
    %cst_5 = arith.constant 0.000000e+00 : f32
    %7 = vector.broadcast %cst_5 : f32 to vector<8x1024xf32>
    %8 = arith.maximumf %6, %7 : vector<8x1024xf32>
    %9 = arith.truncf %8 : vector<8x1024xf32> to vector<8x1024xbf16>
    %c0_6 = arith.constant 0 : index
    %c0_7 = arith.constant 0 : index
    %10 = vector.load %arg4[%c0_6, %c0_7] : memref<1024x896xbf16, #tpu.memory_space<vmem>>, vector<1024x896xbf16>
    %cst_8 = arith.constant dense<0.000000e+00> : vector<8x896xf32>
    %11 = tpu.matmul %9, %10, %cst_8 {dimension_numbers = #tpu.dot_dimension_numbers<[1], [0], [0], [1], [0, 0, 1, 1], [], []>} : vector<8x1024xbf16>, vector<1024x896xbf16>, vector<8x896xf32> -> vector<8x896xf32>
    %c0_9 = arith.constant 0 : index
    %c0_10 = arith.constant 0 : index
    %12 = vector.load %arg5[%c0_9, %c0_10] : memref<1x896xf32, #tpu.memory_space<vmem>>, vector<1x896xf32>
    %13 = vector.broadcast %12 : vector<1x896xf32> to vector<8x896xf32>
    %14 = arith.addf %11, %13 : vector<8x896xf32>
    %cst_11 = arith.constant 0.000000e+00 : f32
    %15 = vector.broadcast %cst_11 : f32 to vector<8x896xf32>
    %16 = arith.maximumf %14, %15 : vector<8x896xf32>
    %17 = arith.truncf %16 : vector<8x896xf32> to vector<8x896xbf16>
    %c0_12 = arith.constant 0 : index
    %c0_13 = arith.constant 0 : index
    %18 = vector.load %arg6[%c0_12, %c0_13] : memref<896x512xbf16, #tpu.memory_space<vmem>>, vector<896x512xbf16>
    %cst_14 = arith.constant dense<0.000000e+00> : vector<8x512xf32>
    %19 = tpu.matmul %17, %18, %cst_14 {dimension_numbers = #tpu.dot_dimension_numbers<[1], [0], [0], [1], [0, 0, 1, 1], [], []>} : vector<8x896xbf16>, vector<896x512xbf16>, vector<8x512xf32> -> vector<8x512xf32>
    %c0_15 = arith.constant 0 : index
    %c0_16 = arith.constant 0 : index
    %20 = vector.load %arg7[%c0_15, %c0_16] : memref<1x512xf32, #tpu.memory_space<vmem>>, vector<1x512xf32>
    %21 = vector.broadcast %20 : vector<1x512xf32> to vector<8x512xf32>
    %22 = arith.addf %19, %21 : vector<8x512xf32>
    %cst_17 = arith.constant 0.000000e+00 : f32
    %23 = vector.broadcast %cst_17 : f32 to vector<8x512xf32>
    %24 = arith.maximumf %22, %23 : vector<8x512xf32>
    %25 = arith.truncf %24 : vector<8x512xf32> to vector<8x512xbf16>
    %c0_18 = arith.constant 0 : index
    %c0_19 = arith.constant 0 : index
    %26 = vector.load %arg8[%c0_18, %c0_19] : memref<512x256xbf16, #tpu.memory_space<vmem>>, vector<512x256xbf16>
    %cst_20 = arith.constant dense<0.000000e+00> : vector<8x256xf32>
    %27 = tpu.matmul %25, %26, %cst_20 {dimension_numbers = #tpu.dot_dimension_numbers<[1], [0], [0], [1], [0, 0, 1, 1], [], []>} : vector<8x512xbf16>, vector<512x256xbf16>, vector<8x256xf32> -> vector<8x256xf32>
    %c0_21 = arith.constant 0 : index
    %c0_22 = arith.constant 0 : index
    %28 = vector.load %arg9[%c0_21, %c0_22] : memref<1x256xf32, #tpu.memory_space<vmem>>, vector<1x256xf32>
    %29 = vector.broadcast %28 : vector<1x256xf32> to vector<8x256xf32>
    %30 = arith.addf %27, %29 : vector<8x256xf32>
    %cst_23 = arith.constant 0.000000e+00 : f32
    %31 = vector.broadcast %cst_23 : f32 to vector<8x256xf32>
    %32 = arith.maximumf %30, %31 : vector<8x256xf32>
    %33 = arith.truncf %32 : vector<8x256xf32> to vector<8x256xbf16>
    %c0_24 = arith.constant 0 : index
    %c0_25 = arith.constant 0 : index
    %34 = vector.load %arg10[%c0_24, %c0_25] : memref<256x128xbf16, #tpu.memory_space<vmem>>, vector<256x128xbf16>
    %cst_26 = arith.constant dense<0.000000e+00> : vector<8x128xf32>
    %35 = tpu.matmul %33, %34, %cst_26 {dimension_numbers = #tpu.dot_dimension_numbers<[1], [0], [0], [1], [0, 0, 1, 1], [], []>} : vector<8x256xbf16>, vector<256x128xbf16>, vector<8x128xf32> -> vector<8x128xf32>
    %c0_27 = arith.constant 0 : index
    %c0_28 = arith.constant 0 : index
    %36 = vector.load %arg11[%c0_27, %c0_28] : memref<1x128xf32, #tpu.memory_space<vmem>>, vector<1x128xf32>
    %37 = vector.broadcast %36 : vector<1x128xf32> to vector<8x128xf32>
    %38 = arith.addf %35, %37 : vector<8x128xf32>
    %cst_29 = arith.constant 0.000000e+00 : f32
    %39 = vector.broadcast %cst_29 : f32 to vector<8x128xf32>
    %40 = arith.maximumf %38, %39 : vector<8x128xf32>
    %41 = arith.truncf %40 : vector<8x128xf32> to vector<8x128xbf16>
    %c0_30 = arith.constant 0 : index
    %c0_31 = arith.constant 0 : index
    %42 = vector.load %arg12[%c0_30, %c0_31] : memref<128x128xbf16, #tpu.memory_space<vmem>>, vector<128x128xbf16>
    %cst_32 = arith.constant dense<0.000000e+00> : vector<8x128xf32>
    %43 = tpu.matmul %41, %42, %cst_32 {dimension_numbers = #tpu.dot_dimension_numbers<[1], [0], [0], [1], [0, 0, 1, 1], [], []>} : vector<8x128xbf16>, vector<128x128xbf16>, vector<8x128xf32> -> vector<8x128xf32>
    %c0_33 = arith.constant 0 : index
    %c0_34 = arith.constant 0 : index
    %44 = vector.load %arg13[%c0_33, %c0_34] : memref<1x128xf32, #tpu.memory_space<vmem>>, vector<1x128xf32>
    %45 = vector.broadcast %44 : vector<1x128xf32> to vector<8x128xf32>
    %46 = arith.addf %43, %45 : vector<8x128xf32>
    %c0_35 = arith.constant 0 : index
    %c0_36 = arith.constant 0 : index
    %47 = vector.load %arg14[%c0_35, %c0_36] : memref<8x128xf32, #tpu.memory_space<vmem>>, vector<8x128xf32>
    tpu.vector_store %arg14[%c0_35, %c0_36], %46 {strides = array<i32>} : memref<8x128xf32, #tpu.memory_space<vmem>>, vector<8x128xf32>,
    return
  }
  func.func @transform_0(%arg0: i32) -> (i32, i32) {
    %c0_i32 = arith.constant 0 : i32
    %c0_i32_0 = arith.constant 0 : i32
    return %arg0, %c0_i32 : i32, i32
  }
  func.func @transform_1(%arg0: i32) -> (i32, i32) {
    %c0_i32 = arith.constant 0 : i32
    %c0_i32_0 = arith.constant 0 : i32
    %c0_i32_1 = arith.constant 0 : i32
    return %c0_i32, %c0_i32_0 : i32, i32
  }
  func.func @transform_2(%arg0: i32) -> (i32, i32) {
    %c0_i32 = arith.constant 0 : i32
    %c0_i32_0 = arith.constant 0 : i32
    %c0_i32_1 = arith.constant 0 : i32
    return %c0_i32, %c0_i32_0 : i32, i32
  }
  func.func @transform_3(%arg0: i32) -> (i32, i32) {
    %c0_i32 = arith.constant 0 : i32
    %c0_i32_0 = arith.constant 0 : i32
    %c0_i32_1 = arith.constant 0 : i32
    return %c0_i32, %c0_i32_0 : i32, i32
  }
  func.func @transform_4(%arg0: i32) -> (i32, i32) {
    %c0_i32 = arith.constant 0 : i32
    %c0_i32_0 = arith.constant 0 : i32
    %c0_i32_1 = arith.constant 0 : i32
    return %c0_i32, %c0_i32_0 : i32, i32
  }
  func.func @transform_5(%arg0: i32) -> (i32, i32) {
    %c0_i32 = arith.constant 0 : i32
    %c0_i32_0 = arith.constant 0 : i32
    %c0_i32_1 = arith.constant 0 : i32
    return %c0_i32, %c0_i32_0 : i32, i32
  }
  func.func @transform_6(%arg0: i32) -> (i32, i32) {
    %c0_i32 = arith.constant 0 : i32
    %c0_i32_0 = arith.constant 0 : i32
    %c0_i32_1 = arith.constant 0 : i32
    return %c0_i32, %c0_i32_0 : i32, i32
  }
  func.func @transform_7(%arg0: i32) -> (i32, i32) {
    %c0_i32 = arith.constant 0 : i32
    %c0_i32_0 = arith.constant 0 : i32
    %c0_i32_1 = arith.constant 0 : i32
    return %c0_i32, %c0_i32_0 : i32, i32
  }
  func.func @transform_8(%arg0: i32) -> (i32, i32) {
    %c0_i32 = arith.constant 0 : i32
    %c0_i32_0 = arith.constant 0 : i32
    %c0_i32_1 = arith.constant 0 : i32
    return %c0_i32, %c0_i32_0 : i32, i32
  }
  func.func @transform_9(%arg0: i32) -> (i32, i32) {
    %c0_i32 = arith.constant 0 : i32
    %c0_i32_0 = arith.constant 0 : i32
    %c0_i32_1 = arith.constant 0 : i32
    return %c0_i32, %c0_i32_0 : i32, i32
  }
  func.func @transform_10(%arg0: i32) -> (i32, i32) {
    %c0_i32 = arith.constant 0 : i32
    %c0_i32_0 = arith.constant 0 : i32
    %c0_i32_1 = arith.constant 0 : i32
    return %c0_i32, %c0_i32_0 : i32, i32
  }
  func.func @transform_11(%arg0: i32) -> (i32, i32) {
    %c0_i32 = arith.constant 0 : i32
    %c0_i32_0 = arith.constant 0 : i32
    %c0_i32_1 = arith.constant 0 : i32
    return %c0_i32, %c0_i32_0 : i32, i32
  }
  func.func @transform_12(%arg0: i32) -> (i32, i32) {
    %c0_i32 = arith.constant 0 : i32
    %c0_i32_0 = arith.constant 0 : i32
    %c0_i32_1 = arith.constant 0 : i32
    return %c0_i32, %c0_i32_0 : i32, i32
  }
  func.func @transform_13(%arg0: i32) -> (i32, i32) {
    %c0_i32 = arith.constant 0 : i32
    %c0_i32_0 = arith.constant 0 : i32
    return %arg0, %c0_i32 : i32, i32
  }
}

</mosaic_0001>

<bundles_post_ra>
// kernel: tpu_custom_call.1
= control target key start
LH: loop header
LB: loop body
LE: loop exit
PB: predicated region body
PF: predicated region fallthrough
CT: control target
= control target key end

     0   :  { %18 = vsyncpa [#allocation3], 0  ;;  %s9406_s0 = inlined_call_operand.hbm [shape: f32[8,10], index: 0, kind: input, shape index: {}]   ;;  %s9407_s1 = inlined_call_operand.hbm [shape: bf16[10,1024], index: 1, kind: input, shape index: {}]   ;;  %s9408_s2 = inlined_call_operand.hbm [shape: f32[1,1024], index: 2, kind: input, shape index: {}]   ;;  %s9409_s3 = inlined_call_operand.hbm [shape: bf16[1024,896], index: 3, kind: input, shape index: {}]   ;;  %s9410_s4 = inlined_call_operand.hbm [shape: f32[1,896], index: 4, kind: input, shape index: {}]   ;;  %s9411_s5 = inlined_call_operand.hbm [shape: bf16[896,512], index: 5, kind: input, shape index: {}]   ;;  %s9412_s6 = inlined_call_operand.hbm [shape: f32[1,512], index: 6, kind: input, shape index: {}]   ;;  %s9413_s7 = inlined_call_operand.hbm [shape: bf16[512,256], index: 7, kind: input, shape index: {}]   ;;  %s9414_s8 = inlined_call_operand.hbm [shape: f32[1,256], index: 8, kind: input, shape index: {}]   ;;  %s9415_s9 = inlined_call_operand.hbm [shape: bf16[256,128], index: 9, kind: input, shape index: {}]   ;;  %s9416_s10 = inlined_call_operand.hbm [shape: f32[1,128], index: 10, kind: input, shape index: {}]   ;;  %s9417_s11 = inlined_call_operand.hbm [shape: bf16[128,128], index: 11, kind: input, shape index: {}]   ;;  %s9418_s12 = inlined_call_operand.hbm [shape: f32[1,128], index: 12, kind: input, shape index: {}]   ;;  %s9419_s13 = inlined_call_operand.hbm [shape: f32[8,128], index: 13, kind: output, shape index: {}]  }
   0x1   :  { %19 = vsyncpa [#allocation6], 0 }
   0x2   :  { %20 = vsyncpa [#allocation9], 0 }
   0x3   :  { %21 = vsyncpa [#allocation12], 0 }
   0x4   :  { %22 = vsyncpa [#allocation15], 0 }
   0x5   :  { %23 = vsyncpa [#allocation18], 0 }
   0x6   :  { %24 = vsyncpa [#allocation21], 0 }
   0x7   :  { %25 = vsyncpa [#allocation4], 0  ;;  %s8955_s25 = smov [#allocation5]   ;;  %s8631_s29 = scalar_lea.hbm %s9407_s1, 1024 }
   0x8   :  { %s41_s26 = sshll.u32 %s8955_s25, 4  ;;  %p8632_p0 = scmp.ne.s32.totalorder %s9407_s1, %s8631_s29  ;;  %s42_s26 = int_to_ptr.vmem [resolvable:$true] %s41_s26 }
   0x9   :  { %p8635_p1 = scmp.lt.u32.totalorder %s8631_s29, %s9407_s1 }
   0xb   :  { %p8637_p2 = pnand %p8635_p1, %p8632_p0 }
   0xd   :  { %8640 = shalt.err (!%p8637_p2)
}
   0xe   :  { %s8641_s17 = scalar_lea.vmem %s42_s26, 1024  ;;  %p8646_p4 = scmp.lt.s32.totalorder %s42_s26, %s42_s26 }
   0xf   :  { %p8642_p3 = scmp.ne.s32.totalorder %s42_s26, %s8641_s17  ;;  %p8647_p5 = scmp.lt.s32.totalorder %s8641_s17, %s8641_s17 }
  0x11   :  { %p8648_p6 = por %p8647_p5, %p8646_p4 }
  0x13   :  { %p8649_p7 = pnand %p8648_p6, %p8642_p3 }
  0x15   :  { %8652 = shalt.err (!%p8649_p7)
}
  0x16   :  { %s8956_s18 = smov 512   ;;  %s8957_s19 = smov 32  }
  0x17   :  { %47 = dma.hbm_to_vmem [thread:$0]  %s9407_s1, 1024, %s42_s26, [#allocation6], %s8956_s18, %s8956_s18, %s8957_s19  }
  0x18   :  { %s8958_s22 = smov [#allocation8]   ;;  %s8653_s27 = scalar_lea.hbm %s9409_s3, 57344 }
  0x19   :  { %s63_s23 = sshll.u32 %s8958_s22, 4  ;;  %p8654_p8 = scmp.ne.s32.totalorder %s9409_s3, %s8653_s27  ;;  %s64_s23 = int_to_ptr.vmem [resolvable:$true] %s63_s23 }
  0x1a   :  { %p8657_p9 = scmp.lt.u32.totalorder %s8653_s27, %s9409_s3 }
  0x1c   :  { %p8659_p10 = pnand %p8657_p9, %p8654_p8 }
  0x1e   :  { %8662 = shalt.err (!%p8659_p10)
}
  0x1f   :  { %s8663_s15 = scalar_lea.vmem %s64_s23, 57344  ;;  %p8668_p12 = scmp.lt.s32.totalorder %s64_s23, %s64_s23 }
  0x20   :  { %p8664_p11 = scmp.ne.s32.totalorder %s64_s23, %s8663_s15  ;;  %p8669_p13 = scmp.lt.s32.totalorder %s8663_s15, %s8663_s15 }
  0x22   :  { %p8670_p0 = por %p8669_p13, %p8668_p12 }
  0x24   :  { %p8671_p1 = pnand %p8670_p0, %p8664_p11 }
  0x26   :  { %8674 = shalt.err (!%p8671_p1)
}
  0x27   :  { %s8959_s1 = smov 448   ;;  %s8960_s26 = smov 28  }
  0x28   :  { %69 = dma.hbm_to_vmem [thread:$0]  %s9409_s3, 57344, %s64_s23, [#allocation9], %s8959_s1, %s8959_s1, %s8960_s26  }
  0x29   :  { %s8961_s18 = smov [#allocation11]   ;;  %s8675_s22 = scalar_lea.hbm %s9411_s5, 28672 }
  0x2a   :  { %s85_s19 = sshll.u32 %s8961_s18, 4  ;;  %p8676_p2 = scmp.ne.s32.totalorder %s9411_s5, %s8675_s22  ;;  %s86_s19 = int_to_ptr.vmem [resolvable:$true] %s85_s19 }
  0x2b   :  { %p8679_p3 = scmp.lt.u32.totalorder %s8675_s22, %s9411_s5 }
  0x2d   :  { %p8681_p4 = pnand %p8679_p3, %p8676_p2 }
  0x2f   :  { %8684 = shalt.err (!%p8681_p4)
}
  0x30   :  { %s8685_s29 = scalar_lea.vmem %s86_s19, 28672  ;;  %p8690_p6 = scmp.lt.s32.totalorder %s86_s19, %s86_s19 }
  0x31   :  { %p8686_p5 = scmp.ne.s32.totalorder %s86_s19, %s8685_s29  ;;  %p8691_p7 = scmp.lt.s32.totalorder %s8685_s29, %s8685_s29 }
  0x33   :  { %p8692_p8 = por %p8691_p7, %p8690_p6 }
  0x35   :  { %p8693_p9 = pnand %p8692_p8, %p8686_p5 }
  0x37   :  { %8696 = shalt.err (!%p8693_p9)
}
  0x38   :  { %s8962_s3 = smov 256   ;;  %s8963_s23 = smov 16  }
  0x39   :  { %91 = dma.hbm_to_vmem [thread:$0]  %s9411_s5, 28672, %s86_s19, [#allocation12], %s8962_s3, %s8962_s3, %s8963_s23  }
  0x3a   :  { %s8964_s15 = smov [#allocation14]   ;;  %s8697_s17 = scalar_lea.hbm %s9413_s7, 8192 }
  0x3b   :  { %s107_s1 = sshll.u32 %s8964_s15, 4  ;;  %p8698_p10 = scmp.ne.s32.totalorder %s9413_s7, %s8697_s17  ;;  %s108_s1 = int_to_ptr.vmem [resolvable:$true] %s107_s1 }
  0x3c   :  { %p8701_p11 = scmp.lt.u32.totalorder %s8697_s17, %s9413_s7 }
  0x3e   :  { %p8703_p12 = pnand %p8701_p11, %p8698_p10 }
  0x40   :  { %8706 = shalt.err (!%p8703_p12)
}
  0x41   :  { %s8707_s24 = scalar_lea.vmem %s108_s1, 8192  ;;  %p8712_p0 = scmp.lt.s32.totalorder %s108_s1, %s108_s1 }
  0x42   :  { %p8708_p13 = scmp.ne.s32.totalorder %s108_s1, %s8707_s24  ;;  %p8713_p1 = scmp.lt.s32.totalorder %s8707_s24, %s8707_s24 }
  0x44   :  { %p8714_p2 = por %p8713_p1, %p8712_p0 }
  0x46   :  { %p8715_p3 = pnand %p8714_p2, %p8708_p13 }
  0x48   :  { %8718 = shalt.err (!%p8715_p3)
}
  0x49   :  { %s8965_s5 = smov 128   ;;  %s8966_s19 = smov 8  }
  0x4a   :  { %113 = dma.hbm_to_vmem [thread:$0]  %s9413_s7, 8192, %s108_s1, [#allocation15], %s8965_s5, %s8965_s5, %s8966_s19  }
  0x4b   :  { %s8967_s28 = smov [#allocation17]   ;;  %s8719_s30 = scalar_lea.hbm %s9415_s9, 2048 }
  0x4c   :  { %s129_s29 = sshll.u32 %s8967_s28, 4  ;;  %p8720_p4 = scmp.ne.s32.totalorder %s9415_s9, %s8719_s30  ;;  %s130_s29 = int_to_ptr.vmem [resolvable:$true] %s129_s29 }
  0x4d   :  { %p8723_p5 = scmp.lt.u32.totalorder %s8719_s30, %s9415_s9 }
  0x4f   :  { %p8725_p6 = pnand %p8723_p5, %p8720_p4 }
  0x51   :  { %8728 = shalt.err (!%p8725_p6)
}
  0x52   :  { %s8729_s17 = scalar_lea.vmem %s130_s29, 2048  ;;  %p8734_p8 = scmp.lt.s32.totalorder %s130_s29, %s130_s29 }
  0x53   :  { %p8730_p7 = scmp.ne.s32.totalorder %s130_s29, %s8729_s17  ;;  %p8735_p9 = scmp.lt.s32.totalorder %s8729_s17, %s8729_s17 }
  0x55   :  { %p8736_p10 = por %p8735_p9, %p8734_p8 }
  0x57   :  { %p8737_p11 = pnand %p8736_p10, %p8730_p7 }
  0x59   :  { %8740 = shalt.err (!%p8737_p11)
}
  0x5a   :  { %s8968_s7 = smov 64   ;;  %s8969_s1 = smov 4  }
  0x5b   :  { %135 = dma.hbm_to_vmem [thread:$0]  %s9415_s9, 2048, %s130_s29, [#allocation18], %s8968_s7, %s8968_s7, %s8969_s1  }
  0x5c   :  { %s8970_s21 = smov [#allocation20]   ;;  %s8971_s24 = smov [#allocation2]  }
  0x5d   :  { %s151_s22 = sshll.u32 %s8970_s21, 4  ;;  %s32_s5 = sshll.u32 %s8971_s24, 4  ;;  %s152_s22 = int_to_ptr.vmem [resolvable:$true] %s151_s22  ;;  %s33_s5 = int_to_ptr.vmem [resolvable:$true] %s32_s5 }
  0x5e   :  { %s8741_s27 = scalar_lea.hbm %s9417_s11, 1024 }
  0x5f   :  { %p8742_p12 = scmp.ne.s32.totalorder %s9417_s11, %s8741_s27  ;;  %p8745_p13 = scmp.lt.u32.totalorder %s8741_s27, %s9417_s11 }
  0x61   :  { %p8747_p0 = pnand %p8745_p13, %p8742_p12 }
  0x63   :  { %8750 = shalt.err (!%p8747_p0)
}
  0x64   :  { %s8751_s9 = scalar_lea.vmem %s152_s22, 1024  ;;  %p8756_p2 = scmp.lt.s32.totalorder %s152_s22, %s152_s22 }
  0x65   :  { %p8752_p1 = scmp.ne.s32.totalorder %s152_s22, %s8751_s9  ;;  %p8757_p3 = scmp.lt.s32.totalorder %s8751_s9, %s8751_s9 }
  0x67   :  { %p8758_p4 = por %p8757_p3, %p8756_p2 }
  0x69   :  { %p8759_p5 = pnand %p8758_p4, %p8752_p1 }
  0x6b   :  { %8762 = shalt.err (!%p8759_p5)
}
  0x6c   :  { %157 = dma.hbm_to_vmem [thread:$0]  %s9417_s11, 1024, %s152_s22, [#allocation21], %s8968_s7, %s8968_s7, %s8969_s1  }
  0x6d   :  { %s8763_s16 = scalar_lea.hbm %s9406_s0, 128 }
  0x6e   :  { %p8764_p6 = scmp.ne.s32.totalorder %s9406_s0, %s8763_s16  ;;  %p8767_p7 = scmp.lt.u32.totalorder %s8763_s16, %s9406_s0 }
  0x70   :  { %p8769_p8 = pnand %p8767_p7, %p8764_p6 }
  0x72   :  { %8772 = shalt.err (!%p8769_p8)
}
  0x73   :  { %s8773_s24 = scalar_lea.vmem %s33_s5, 128  ;;  %p8778_p10 = scmp.lt.s32.totalorder %s33_s5, %s33_s5 }
  0x74   :  { %p8774_p9 = scmp.ne.s32.totalorder %s33_s5, %s8773_s24  ;;  %p8779_p11 = scmp.lt.s32.totalorder %s8773_s24, %s8773_s24 }
  0x76   :  { %p8780_p12 = por %p8779_p11, %p8778_p10 }
  0x78   :  { %p8781_p13 = pnand %p8780_p12, %p8774_p9 }
  0x7a   :  { %8784 = shalt.err (!%p8781_p13)
}
  0x7b   :  { %35 = dma.hbm_to_vmem [thread:$0]  %s9406_s0, 128, %s33_s5, [#allocation3]  }
  0x7c   :  { %s8972_s1 = smov [#allocation7]   ;;  %s8973_s19 = smov [#allocation10]  }
  0x7d   :  { %s54_s22 = sshll.u32 %s8972_s1, 4  ;;  %s76_s25 = sshll.u32 %s8973_s19, 4  ;;  %s55_s22 = int_to_ptr.vmem [resolvable:$true] %s54_s22  ;;  %s77_s25 = int_to_ptr.vmem [resolvable:$true] %s76_s25 }
  0x7e   :  { %s8785_s3 = scalar_lea.hbm %s9408_s2, 128 }
  0x7f   :  { %p8786_p0 = scmp.ne.s32.totalorder %s9408_s2, %s8785_s3  ;;  %p8789_p1 = scmp.lt.u32.totalorder %s8785_s3, %s9408_s2 }
  0x81   :  { %p8791_p2 = pnand %p8789_p1, %p8786_p0 }
  0x83   :  { %8794 = shalt.err (!%p8791_p2)
}
  0x84   :  { %s8795_s0 = scalar_lea.vmem %s55_s22, 128  ;;  %p8800_p4 = scmp.lt.s32.totalorder %s55_s22, %s55_s22 }
  0x85   :  { %p8796_p3 = scmp.ne.s32.totalorder %s55_s22, %s8795_s0  ;;  %p8801_p5 = scmp.lt.s32.totalorder %s8795_s0, %s8795_s0 }
  0x87   :  { %p8802_p6 = por %p8801_p5, %p8800_p4 }
  0x89   :  { %p8803_p7 = pnand %p8802_p6, %p8796_p3 }
  0x8b   :  { %8806 = shalt.err (!%p8803_p7)
}
  0x8c   :  { %57 = dma.hbm_to_vmem [thread:$0]  %s9408_s2, 128, %s55_s22, [#allocation6]  }
  0x8d   :  { %s8807_s16 = scalar_lea.hbm %s9410_s4, 112 }
  0x8e   :  { %p8808_p8 = scmp.ne.s32.totalorder %s9410_s4, %s8807_s16  ;;  %p8811_p9 = scmp.lt.u32.totalorder %s8807_s16, %s9410_s4 }
  0x90   :  { %p8813_p10 = pnand %p8811_p9, %p8808_p8 }
  0x92   :  { %8816 = shalt.err (!%p8813_p10)
}
  0x93   :  { %s8817_s24 = scalar_lea.vmem %s77_s25, 112  ;;  %s8821_s11 = scalar_lea.vmem %s77_s25, 128 }
  0x94   :  { %p8818_p11 = scmp.ne.s32.totalorder %s77_s25, %s8817_s24  ;;  %p8822_p12 = scmp.lt.s32.totalorder %s77_s25, %s77_s25 }
  0x95   :  { %p8823_p13 = scmp.lt.s32.totalorder %s8821_s11, %s8817_s24 }
  0x97   :  { %p8824_p0 = por %p8823_p13, %p8822_p12 }
  0x99   :  { %p8825_p1 = pnand %p8824_p0, %p8818_p11 }
  0x9b   :  { %8828 = shalt.err (!%p8825_p1)
}
  0x9c   :  { %79 = dma.hbm_to_vmem [thread:$0]  %s9410_s4, 112, %s77_s25, [#allocation9]  }
  0x9d   :  { %s8974_s1 = smov [#allocation13]   ;;  %s8975_s19 = smov [#allocation16]  }
  0x9e   :  { %s98_s22 = sshll.u32 %s8974_s1, 4  ;;  %s120_s27 = sshll.u32 %s8975_s19, 4  ;;  %s99_s22 = int_to_ptr.vmem [resolvable:$true] %s98_s22  ;;  %s121_s27 = int_to_ptr.vmem [resolvable:$true] %s120_s27 }
  0x9f   :  { %s8829_s23 = scalar_lea.hbm %s9412_s6, 64 }
  0xa0   :  { %p8830_p2 = scmp.ne.s32.totalorder %s9412_s6, %s8829_s23  ;;  %p8833_p3 = scmp.lt.u32.totalorder %s8829_s23, %s9412_s6 }
  0xa2   :  { %p8835_p4 = pnand %p8833_p3, %p8830_p2 }
  0xa4   :  { %8838 = shalt.err (!%p8835_p4)
}
  0xa5   :  { %s8839_s4 = scalar_lea.vmem %s99_s22, 64  ;;  %p8844_p6 = scmp.lt.s32.totalorder %s99_s22, %s99_s22 }
  0xa6   :  { %p8840_p5 = scmp.ne.s32.totalorder %s99_s22, %s8839_s4  ;;  %p8845_p7 = scmp.lt.s32.totalorder %s8839_s4, %s8839_s4 }
  0xa8   :  { %p8846_p8 = por %p8845_p7, %p8844_p6 }
  0xaa   :  { %p8847_p9 = pnand %p8846_p8, %p8840_p5 }
  0xac   :  { %8850 = shalt.err (!%p8847_p9)
}
  0xad   :  { %101 = dma.hbm_to_vmem [thread:$0]  %s9412_s6, 64, %s99_s22, [#allocation12]  }
  0xae   :  { %s8851_s26 = scalar_lea.hbm %s9414_s8, 32 }
  0xaf   :  { %p8852_p10 = scmp.ne.s32.totalorder %s9414_s8, %s8851_s26  ;;  %p8855_p11 = scmp.lt.u32.totalorder %s8851_s26, %s9414_s8 }
  0xb1   :  { %p8857_p12 = pnand %p8855_p11, %p8852_p10 }
  0xb3   :  { %8860 = shalt.err (!%p8857_p12)
}
  0xb4   :  { %s8861_s21 = scalar_lea.vmem %s121_s27, 32  ;;  %p8866_p0 = scmp.lt.s32.totalorder %s121_s27, %s121_s27 }
  0xb5   :  { %p8862_p13 = scmp.ne.s32.totalorder %s121_s27, %s8861_s21  ;;  %p8867_p1 = scmp.lt.s32.totalorder %s8861_s21, %s8861_s21 }
  0xb7   :  { %p8868_p2 = por %p8867_p1, %p8866_p0 }
  0xb9   :  { %p8869_p3 = pnand %p8868_p2, %p8862_p13 }
  0xbb   :  { %8872 = shalt.err (!%p8869_p3)
}
  0xbc   :  { %123 = dma.hbm_to_vmem [thread:$0]  %s9414_s8, 32, %s121_s27, [#allocation15]  }
  0xbd   :  { %s8976_s11 = smov [#allocation19]   ;;  %s8977_s7 = smov [#allocation22]  }
  0xbe   :  { %s142_s2 = sshll.u32 %s8976_s11, 4  ;;  %s164_s1 = sshll.u32 %s8977_s7, 4  ;;  %s143_s2 = int_to_ptr.vmem [resolvable:$true] %s142_s2  ;;  %s165_s1 = int_to_ptr.vmem [resolvable:$true] %s164_s1 }
  0xbf   :  { %s8873_s28 = scalar_lea.hbm %s9416_s10, 16 }
  0xc0   :  { %p8874_p4 = scmp.ne.s32.totalorder %s9416_s10, %s8873_s28  ;;  %p8877_p5 = scmp.lt.u32.totalorder %s8873_s28, %s9416_s10 }
  0xc2   :  { %p8879_p6 = pnand %p8877_p5, %p8874_p4 }
  0xc4   :  { %8882 = shalt.err (!%p8879_p6)
}
  0xc5   :  { %s8883_s8 = scalar_lea.vmem %s143_s2, 16  ;;  %s8887_s27 = scalar_lea.vmem %s143_s2, 32 }
  0xc6   :  { %p8884_p7 = scmp.ne.s32.totalorder %s143_s2, %s8883_s8  ;;  %p8888_p8 = scmp.lt.s32.totalorder %s143_s2, %s143_s2 }
  0xc7   :  { %p8889_p9 = scmp.lt.s32.totalorder %s8887_s27, %s8883_s8 }
  0xc9   :  { %p8890_p10 = por %p8889_p9, %p8888_p8 }
  0xcb   :  { %p8891_p11 = pnand %p8890_p10, %p8884_p7 }
  0xcd   :  { %8894 = shalt.err (!%p8891_p11)
}
  0xce   :  { %145 = dma.hbm_to_vmem [thread:$0]  %s9416_s10, 16, %s143_s2, [#allocation18]  }
  0xcf   :  { %s8895_s5 = scalar_lea.hbm %s9418_s12, 16 }
  0xd0   :  { %p8896_p12 = scmp.ne.s32.totalorder %s9418_s12, %s8895_s5  ;;  %p8899_p13 = scmp.lt.u32.totalorder %s8895_s5, %s9418_s12 }
  0xd2   :  { %p8901_p0 = pnand %p8899_p13, %p8896_p12 }
  0xd4   :  { %8904 = shalt.err (!%p8901_p0)
}
  0xd5   :  { %s8905_s17 = scalar_lea.vmem %s165_s1, 16  ;;  %s8909_s18 = scalar_lea.vmem %s165_s1, 32 }
  0xd6   :  { %p8906_p1 = scmp.ne.s32.totalorder %s165_s1, %s8905_s17  ;;  %p8910_p2 = scmp.lt.s32.totalorder %s165_s1, %s165_s1 }
  0xd7   :  { %p8911_p3 = scmp.lt.s32.totalorder %s8909_s18, %s8905_s17 }
  0xd9   :  { %p8912_p4 = por %p8911_p3, %p8910_p2 }
  0xdb   :  { %p8913_p5 = pnand %p8912_p4, %p8906_p1 }
  0xdd   :  { %8916 = shalt.err (!%p8913_p5)
}
  0xde   :  { %167 = dma.hbm_to_vmem [thread:$0]  %s9418_s12, 16, %s165_s1, [#allocation21]  }
  0xdf   :  { %8939 = dma.done.wait [#allocation3], 128  }
  0xe0   :  { %8940 = vsyncadd [#allocation3], 4294967168 }
  0xe1   :  { %8941 = dma.done.wait [#allocation6], 1152  }
  0xe2   :  { %8942 = vsyncadd [#allocation6], 4294966144 }
  0xe3   :  { %8943 = dma.done.wait [#allocation9], 57456  }
  0xe4   :  { %8944 = vsyncadd [#allocation9], 4294909840 }
  0xe5   :  { %8945 = dma.done.wait [#allocation12], 28736  }
  0xe6   :  { %8946 = vsyncadd [#allocation12], 4294938560 }
  0xe7   :  { %8947 = dma.done.wait [#allocation15], 8224  }
  0xe8   :  { %8948 = vsyncadd [#allocation15], 4294959072 }
  0xe9   :  { %8949 = dma.done.wait [#allocation18], 2064  }
  0xea   :  { %8950 = vsyncadd [#allocation18], 4294965232 }
  0xeb   :  { %8951 = dma.done.wait [#allocation21], 1040  }
  0xec   :  { %8952 = vsyncadd [#allocation21], 4294966256  ;;  %v8978_v0 = vmov 0   ;;  %v210_v1 = vld [vmem:[#allocation5] sm:$0xff]  ;;  %vm296_vm0 = vcmask 1044480   ;;  %v208_v3 = vld [vmem:[#allocation2] sm:$0xff] }
  0xed   :  { %353 = vmatprep.mubr.bf16.mxu0 %v8978_v0  ;;  %394 = vmatprep.mubr.bf16.mxu1 %v8978_v0  ;;  %v214_v2 = vld [vmem:[#allocation5 + $0x20] sm:$0x11]  ;;  %v211_v6 = vld [vmem:[#allocation5 + $0x8] sm:$0xff]  ;;  %v212_v8 = vld [vmem:[#allocation5 + $0x10] sm:$0xff]  ;;  %v209_v9 = vpack.c.bf16 %v208_v3, %v208_v3  ;;  %vm292_vm1 = vcmask 80896   ;;  %vm8980_vm2 = vmmov 0  }
  0xee   :  { %v6515_v4 = vcombine.high %v210_v1, %v214_v2  ;;  %v6514_v5 = vcombine.low %v210_v1, %v214_v2  ;;  %v215_v7 = vld [vmem:[#allocation5 + $0x28] sm:$0x11]  ;;  %v216_v12 = vld [vmem:[#allocation5 + $0x30] sm:$0x11]  ;;  %v213_v13 = vld [vmem:[#allocation5 + $0x18] sm:$0xff]  ;;  %s8981_s12 = smov [#allocation23]  }
  0xef   :  { %v6517_v10 = vcombine.high %v211_v6, %v215_v7  ;;  %v6516_v11 = vcombine.low %v211_v6, %v215_v7  ;;  %v217_v14 = vld [vmem:[#allocation5 + $0x38] sm:$0x11]  ;;  %v6519_v16 = vcombine.high %v212_v8, %v216_v12  ;;  %v6518_v17 = vcombine.low %v212_v8, %v216_v12  ;;  %v7536_v23 = vld [vmem:[#allocation8 + $0x4] ss:$28 sps:$4 sm:$0xff]   ;;  %v7539_v24 = vld [vmem:[#allocation8 + $0xc] ss:$28 sps:$4 sm:$0xff]  }
  0xf0   :  { %6522 = vmatprep.subr.msk.bf16.mxu0 %vm296_vm0, %v6515_v4  ;;  %v298_v15 = vsel %vm296_vm0, %v6514_v5, 0  ;;  %v6521_v18 = vcombine.high %v213_v13, %v217_v14  ;;  %v6520_v20 = vcombine.low %v213_v13, %v217_v14  ;;  %v7534_v25 = vld [vmem:[#allocation8] ss:$28 sps:$4 sm:$0xff]   ;;  %v7537_v26 = vld [vmem:[#allocation8 + $0x8] ss:$28 sps:$4 sm:$0xff]   ;;  %s6499_s21 = sshll.u32 %s8981_s12, 4  ;;  %s6500_s21 = int_to_ptr.vmem [resolvable:$true] %s6499_s21 }
  0xf1   :  { %322 = vmatpush1.bf16.msra.mxu0 %v298_v15  ;;  %6524 = vmatprep.subr.msk.bf16.mxu1 %vm296_vm0, %v6517_v10  ;;  %v304_v19 = vsel %vm296_vm0, %v6516_v11, 0  ;;  %v310_v21 = vsel %vm296_vm0, %v6518_v17, 0  ;;  %v7542_v27 = vld [vmem:[#allocation8 + $0x3c] ss:$28 sps:$4 sm:$0xff]   ;;  %v7545_v28 = vld [vmem:[#allocation8 + $0x44] ss:$28 sps:$4 sm:$0xff]   ;;  %p8922_p7 = scmp.lt.s32.totalorder %s6500_s21, %s6500_s21 }
  0xf2   :  { %363 = vmatpush1.bf16.msra.mxu1 %v304_v19  ;;  %6526 = vmatprep.subr.msk.bf16.mxu0 %vm296_vm0, %v6519_v16  ;;  %v316_v22 = vsel %vm296_vm0, %v6520_v20, 0  ;;  %v7540_v29 = vld [vmem:[#allocation8 + $0x38] ss:$28 sps:$4 sm:$0xff]   ;;  %v7543_v30 = vld [vmem:[#allocation8 + $0x40] ss:$28 sps:$4 sm:$0xff]   ;;  %s8917_s6 = scalar_lea.vmem %s6500_s21, 128 }
  0xf3   :  { %6528 = vmatprep.subr.msk.bf16.mxu1 %vm296_vm0, %v6521_v18  ;;  %v7548_v31 = vld [vmem:[#allocation8 + $0x74] ss:$28 sps:$4 sm:$0xff]   ;;  %v7551_v32 = vld [vmem:[#allocation8 + $0x7c] ss:$28 sps:$4 sm:$0xff]   ;;  %v7554_v35 = vld [vmem:[#allocation8 + $0xac] ss:$28 sps:$4 sm:$0xff]   ;;  %p8918_p6 = scmp.ne.s32.totalorder %s6500_s21, %s8917_s6  ;;  %p8923_p8 = scmp.lt.s32.totalorder %s8917_s6, %s8917_s6 }
  0xf4   :  { %6523 = vmatmul.mubr.msk.bf16.vlgmr.msra.gmra.mrb[0].mxu0 %vm292_vm1, %v209_v9  ;;  %v7546_v33 = vld [vmem:[#allocation8 + $0x70] ss:$28 sps:$4 sm:$0xff]   ;;  %v7549_v34 = vld [vmem:[#allocation8 + $0x78] ss:$28 sps:$4 sm:$0xff]   ;;  %v7552_v37 = vld [vmem:[#allocation8 + $0xa8] ss:$28 sps:$4 sm:$0xff]  }
  0xf5   :  { %6525 = vmatmul.mubr.msk.bf16.vlgmr.msra.gmra.mrb[0].mxu1 %vm292_vm1, %v209_v9  ;;  %404 = vmatpush1.bf16.msra.mxu0 %v310_v21  ;;  %v7557_v36 = vld [vmem:[#allocation8 + $0xb4] ss:$28 sps:$4 sm:$0xff]   ;;  %v7560_v39 = vld [vmem:[#allocation8 + $0xe4] ss:$28 sps:$4 sm:$0xff]   ;;  %v7563_v40 = vld [vmem:[#allocation8 + $0xec] ss:$28 sps:$4 sm:$0xff]   ;;  %p8924_p9 = por %p8923_p8, %p8922_p7 }
  0xf6   :  { %435 = vmatprep.mubr.bf16.mxu0 %v8978_v0  ;;  %445 = vmatpush1.bf16.msra.mxu1 %v316_v22  ;;  %v7555_v38 = vld [vmem:[#allocation8 + $0xb0] ss:$28 sps:$4 sm:$0xff]   ;;  %v7558_v41 = vld [vmem:[#allocation8 + $0xe0] ss:$28 sps:$4 sm:$0xff]   ;;  %v7561_v42 = vld [vmem:[#allocation8 + $0xe8] ss:$28 sps:$4 sm:$0xff]  }
  0xf7   :  { %476 = vmatprep.mubr.bf16.mxu1 %v8978_v0  ;;  %3354 = vmatprep.subr.bf16.mxu0 %v7536_v23  ;;  %v7566_v43 = vld [vmem:[#allocation8 + $0x11c] ss:$28 sps:$4 sm:$0xff]   ;;  %v7569_v44 = vld [vmem:[#allocation8 + $0x124] ss:$28 sps:$4 sm:$0xff]   ;;  %v7572_v47 = vld [vmem:[#allocation8 + $0x154] ss:$28 sps:$4 sm:$0xff]   ;;  %p8925_p10 = pnand %p8924_p9, %p8918_p6 }
  0xf8   :  { %3518 = vmatprep.subr.bf16.mxu1 %v7539_v24  ;;  %v7564_v45 = vld [vmem:[#allocation8 + $0x118] ss:$28 sps:$4 sm:$0xff]   ;;  %v7567_v46 = vld [vmem:[#allocation8 + $0x120] ss:$28 sps:$4 sm:$0xff]   ;;  %v7570_v49 = vld [vmem:[#allocation8 + $0x150] ss:$28 sps:$4 sm:$0xff]  }
  0xf9   :  { %v7575_v48 = vld [vmem:[#allocation8 + $0x15c] ss:$28 sps:$4 sm:$0xff]   ;;  %v7578_v51 = vld [vmem:[#allocation8 + $0x18c] ss:$28 sps:$4 sm:$0xff]   ;;  %v7581_v53 = vld [vmem:[#allocation8 + $0x194] ss:$28 sps:$4 sm:$0xff]  }
  0xfa   :  { %v7573_v50 = vld [vmem:[#allocation8 + $0x158] ss:$28 sps:$4 sm:$0xff]   ;;  %v7576_v52 = vld [vmem:[#allocation8 + $0x188] ss:$28 sps:$4 sm:$0xff]   ;;  %v7579_v54 = vld [vmem:[#allocation8 + $0x190] ss:$28 sps:$4 sm:$0xff]  }
  0xfb   :  { %v7584_v55 = vld [vmem:[#allocation8 + $0x1c4] ss:$28 sps:$4 sm:$0xff]   ;;  %v7587_v56 = vld [vmem:[#allocation8 + $0x1cc] ss:$28 sps:$4 sm:$0xff]   ;;  %v7590_v59 = vld [vmem:[#allocation8 + $0x1fc] ss:$28 sps:$4 sm:$0xff]  }
  0xfc   :  { %6527 = vmatmul.mubr.msk.bf16.vlgmr.msra.gmra.mrb[4].mxu0 %vm292_vm1, %v209_v9  ;;  %v7582_v57 = vld [vmem:[#allocation8 + $0x1c0] ss:$28 sps:$4 sm:$0xff]   ;;  %v7585_v58 = vld [vmem:[#allocation8 + $0x1c8] ss:$28 sps:$4 sm:$0xff]   ;;  %v7588_v61 = vld [vmem:[#allocation8 + $0x1f8] ss:$28 sps:$4 sm:$0xff]  }
  0xfd   :  { %6529 = vmatmul.mubr.msk.bf16.vlgmr.msra.gmra.mrb[4].mxu1 %vm292_vm1, %v209_v9  ;;  %3355 = vmatpush1.bf16.msra.mxu0 %v7534_v25  ;;  %v7593_v60 = vld [vmem:[#allocation8 + $0x204] ss:$28 sps:$4 sm:$0xff]   ;;  %v7596_v63 = vld [vmem:[#allocation8 + $0x234] ss:$28 sps:$4 sm:$0xff]   ;;  %v7599_v1 = vld [vmem:[#allocation8 + $0x23c] ss:$28 sps:$4 sm:$0xff]  }
  0xfe   :  { %3519 = vmatpush1.bf16.msra.mxu1 %v7537_v26  ;;  %3356 = vmatprep.subr.bf16.mxu0 %v7542_v27  ;;  %v7591_v62 = vld [vmem:[#allocation8 + $0x200] ss:$28 sps:$4 sm:$0xff]   ;;  %v7594_v2 = vld [vmem:[#allocation8 + $0x230] ss:$28 sps:$4 sm:$0xff]   ;;  %v7597_v3 = vld [vmem:[#allocation8 + $0x238] ss:$28 sps:$4 sm:$0xff]   ;;  %v220_v26 = vlaneseq }
  0xff   :  { %3520 = vmatprep.subr.bf16.mxu1 %v7545_v28  ;;  %v7602_v4 = vld [vmem:[#allocation8 + $0x26c] ss:$28 sps:$4 sm:$0xff]   ;;  %v7605_v5 = vld [vmem:[#allocation8 + $0x274] ss:$28 sps:$4 sm:$0xff]   ;;  %v7608_v8 = vld [vmem:[#allocation8 + $0x2a4] ss:$28 sps:$4 sm:$0xff]  }
 0x100   :  { %v7600_v6 = vld [vmem:[#allocation8 + $0x268] ss:$28 sps:$4 sm:$0xff]   ;;  %v7603_v7 = vld [vmem:[#allocation8 + $0x270] ss:$28 sps:$4 sm:$0xff]   ;;  %v7606_v10 = vld [vmem:[#allocation8 + $0x2a0] ss:$28 sps:$4 sm:$0xff]  }
 0x101   :  { %3357 = vmatpush1.bf16.msra.mxu0 %v7540_v29  ;;  %v7611_v9 = vld [vmem:[#allocation8 + $0x2ac] ss:$28 sps:$4 sm:$0xff]   ;;  %v7614_v12 = vld [vmem:[#allocation8 + $0x2dc] ss:$28 sps:$4 sm:$0xff]   ;;  %v7617_v13 = vld [vmem:[#allocation8 + $0x2e4] ss:$28 sps:$4 sm:$0xff]  }
 0x102   :  { %3521 = vmatpush1.bf16.msra.mxu1 %v7543_v30  ;;  %3358 = vmatprep.subr.bf16.mxu0 %v7548_v31  ;;  %v7609_v11 = vld [vmem:[#allocation8 + $0x2a8] ss:$28 sps:$4 sm:$0xff]   ;;  %v7612_v14 = vld [vmem:[#allocation8 + $0x2d8] ss:$28 sps:$4 sm:$0xff]   ;;  %v7615_v15 = vld [vmem:[#allocation8 + $0x2e0] ss:$28 sps:$4 sm:$0xff]  }
 0x103   :  { %3522 = vmatprep.subr.bf16.mxu1 %v7551_v32  ;;  %v7620_v16 = vld [vmem:[#allocation8 + $0x314] ss:$28 sps:$4 sm:$0xff]   ;;  %v7623_v17 = vld [vmem:[#allocation8 + $0x31c] ss:$28 sps:$4 sm:$0xff]   ;;  %v7626_v20 = vld [vmem:[#allocation8 + $0x34c] ss:$28 sps:$4 sm:$0xff]  }
 0x104   :  { %v7618_v18 = vld [vmem:[#allocation8 + $0x310] ss:$28 sps:$4 sm:$0xff]   ;;  %v7621_v19 = vld [vmem:[#allocation8 + $0x318] ss:$28 sps:$4 sm:$0xff]   ;;  %v7624_v22 = vld [vmem:[#allocation8 + $0x348] ss:$28 sps:$4 sm:$0xff]  }
 0x105   :  { %3359 = vmatpush1.bf16.msra.mxu0 %v7546_v33  ;;  %v7629_v21 = vld [vmem:[#allocation8 + $0x354] ss:$28 sps:$4 sm:$0xff]   ;;  %v7632_v24 = vld [vmem:[#allocation8 + $0x384] ss:$28 sps:$4 sm:$0xff]   ;;  %v7635_v25 = vld [vmem:[#allocation8 + $0x38c] ss:$28 sps:$4 sm:$0xff]  }
 0x106   :  { %3523 = vmatpush1.bf16.msra.mxu1 %v7549_v34  ;;  %3360 = vmatprep.subr.bf16.mxu0 %v7554_v35  ;;  %v7627_v23 = vld [vmem:[#allocation8 + $0x350] ss:$28 sps:$4 sm:$0xff]   ;;  %v9224_v27 = vshrl.u32 %v220_v26, 7  ;;  %v9229_v29 = vld [vmem:[#allocation7] sm:$0xff]  ;;  %v7681_v26 = vld [vmem:[#allocation8 + $0x548] ss:$28 sps:$4 sm:$0xff]  }
 0x107   :  { %3524 = vmatprep.subr.bf16.mxu1 %v7557_v36 }
 0x108   :  { %v9227_v28 = vsub.s32 0, %v9224_v27  ;;  %v9232_v30 = vsub.s32 1, %v9224_v27  ;;  %v9235_v31 = vsub.s32 3, %v9224_v27 }
 0x109   :  { %3361 = vmatpush1.bf16.msra.mxu0 %v7552_v37 }
 0x10a   :  { %3525 = vmatpush1.bf16.msra.mxu1 %v7555_v38  ;;  %3362 = vmatprep.subr.bf16.mxu0 %v7560_v39  ;;  %v223_v32 = vrot.slane %v9229_v29, %v9227_v28  ;;  %v227_v33 = vrot.slane %v9229_v29, %v9232_v30  ;;  %v235_v34 = vrot.slane %v9229_v29, %v9235_v31 }
 0x10b   :  { %3526 = vmatprep.subr.bf16.mxu1 %v7563_v40 }
 0x10d   :  { %3363 = vmatpush1.bf16.msra.mxu0 %v7558_v41 }
 0x10e   :  { %3527 = vmatpush1.bf16.msra.mxu1 %v7561_v42  ;;  %3364 = vmatprep.subr.bf16.mxu0 %v7566_v43 }
 0x10f   :  { %3528 = vmatprep.subr.bf16.mxu1 %v7569_v44 }
 0x111   :  { %3365 = vmatpush1.bf16.msra.mxu0 %v7564_v45 }
 0x112   :  { %3529 = vmatpush1.bf16.msra.mxu1 %v7567_v46  ;;  %3366 = vmatprep.subr.bf16.mxu0 %v7572_v47  ;;  %v7630_v47 = vld [vmem:[#allocation8 + $0x380] ss:$28 sps:$4 sm:$0xff]  }
 0x113   :  { %3530 = vmatprep.subr.bf16.mxu1 %v7575_v48  ;;  %v7633_v48 = vld [vmem:[#allocation8 + $0x388] ss:$28 sps:$4 sm:$0xff]  }
 0x115   :  { %3367 = vmatpush1.bf16.msra.mxu0 %v7570_v49 }
 0x116   :  { %3531 = vmatpush1.bf16.msra.mxu1 %v7573_v50  ;;  %3368 = vmatprep.subr.bf16.mxu0 %v7578_v51 }
 0x117   :  { %3532 = vmatprep.subr.bf16.mxu1 %v7581_v53  ;;  %v7638_v53 = vld [vmem:[#allocation8 + $0x3bc] ss:$28 sps:$4 sm:$0xff]  }
 0x119   :  { %3369 = vmatpush1.bf16.msra.mxu0 %v7576_v52 }
 0x11a   :  { %3533 = vmatpush1.bf16.msra.mxu1 %v7579_v54  ;;  %3370 = vmatprep.subr.bf16.mxu0 %v7584_v55  ;;  %v7641_v54 = vld [vmem:[#allocation8 + $0x3c4] ss:$28 sps:$4 sm:$0xff]  }
 0x11b   :  { %3534 = vmatprep.subr.bf16.mxu1 %v7587_v56 }
 0x11d   :  { %3371 = vmatpush1.bf16.msra.mxu0 %v7582_v57 }
 0x11e   :  { %3535 = vmatpush1.bf16.msra.mxu1 %v7585_v58  ;;  %3372 = vmatprep.subr.bf16.mxu0 %v7590_v59  ;;  %v7636_v58 = vld [vmem:[#allocation8 + $0x3b8] ss:$28 sps:$4 sm:$0xff]   ;;  %v7639_v59 = vld [vmem:[#allocation8 + $0x3c0] ss:$28 sps:$4 sm:$0xff]  }
 0x11f   :  { %3536 = vmatprep.subr.bf16.mxu1 %v7593_v60 }
 0x121   :  { %3373 = vmatpush1.bf16.msra.mxu0 %v7588_v61  ;;  %v7644_v61 = vld [vmem:[#allocation8 + $0x3f4] ss:$28 sps:$4 sm:$0xff]  }
 0x122   :  { %3537 = vmatpush1.bf16.msra.mxu1 %v7591_v62  ;;  %3374 = vmatprep.subr.bf16.mxu0 %v7596_v63  ;;  %v7647_v62 = vld [vmem:[#allocation8 + $0x3fc] ss:$28 sps:$4 sm:$0xff]  }
 0x123   :  { %3538 = vmatprep.subr.bf16.mxu1 %v7599_v1  ;;  %v7642_v1 = vld [vmem:[#allocation8 + $0x3f0] ss:$28 sps:$4 sm:$0xff]  }
 0x125   :  { %3375 = vmatpush1.bf16.msra.mxu0 %v7594_v2  ;;  %v7645_v2 = vld [vmem:[#allocation8 + $0x3f8] ss:$28 sps:$4 sm:$0xff]  }
 0x126   :  { %3539 = vmatpush1.bf16.msra.mxu1 %v7597_v3  ;;  %3376 = vmatprep.subr.bf16.mxu0 %v7602_v4  ;;  %v7650_v3 = vld [vmem:[#allocation8 + $0x42c] ss:$28 sps:$4 sm:$0xff]   ;;  %v7653_v4 = vld [vmem:[#allocation8 + $0x434] ss:$28 sps:$4 sm:$0xff]  }
 0x127   :  { %3540 = vmatprep.subr.bf16.mxu1 %v7605_v5  ;;  %v7648_v5 = vld [vmem:[#allocation8 + $0x428] ss:$28 sps:$4 sm:$0xff]  }
 0x129   :  { %3377 = vmatpush1.bf16.msra.mxu0 %v7600_v6  ;;  %v7651_v6 = vld [vmem:[#allocation8 + $0x430] ss:$28 sps:$4 sm:$0xff]  }
 0x12a   :  { %3541 = vmatpush1.bf16.msra.mxu1 %v7603_v7  ;;  %3378 = vmatprep.subr.bf16.mxu0 %v7608_v8  ;;  %v7656_v7 = vld [vmem:[#allocation8 + $0x464] ss:$28 sps:$4 sm:$0xff]   ;;  %v7659_v8 = vld [vmem:[#allocation8 + $0x46c] ss:$28 sps:$4 sm:$0xff]  }
 0x12b   :  { %3542 = vmatprep.subr.bf16.mxu1 %v7611_v9  ;;  %v7654_v9 = vld [vmem:[#allocation8 + $0x460] ss:$28 sps:$4 sm:$0xff]  }
 0x12d   :  { %3379 = vmatpush1.bf16.msra.mxu0 %v7606_v10  ;;  %v7657_v10 = vld [vmem:[#allocation8 + $0x468] ss:$28 sps:$4 sm:$0xff]  }
 0x12e   :  { %3543 = vmatpush1.bf16.msra.mxu1 %v7609_v11  ;;  %3380 = vmatprep.subr.bf16.mxu0 %v7614_v12  ;;  %v7662_v11 = vld [vmem:[#allocation8 + $0x49c] ss:$28 sps:$4 sm:$0xff]   ;;  %v7665_v12 = vld [vmem:[#allocation8 + $0x4a4] ss:$28 sps:$4 sm:$0xff]  }
 0x12f   :  { %3544 = vmatprep.subr.bf16.mxu1 %v7617_v13  ;;  %v7660_v13 = vld [vmem:[#allocation8 + $0x498] ss:$28 sps:$4 sm:$0xff]  }
 0x131   :  { %3381 = vmatpush1.bf16.msra.mxu0 %v7612_v14  ;;  %v7663_v14 = vld [vmem:[#allocation8 + $0x4a0] ss:$28 sps:$4 sm:$0xff]  }
 0x132   :  { %3545 = vmatpush1.bf16.msra.mxu1 %v7615_v15  ;;  %3382 = vmatprep.subr.bf16.mxu0 %v7620_v16  ;;  %v7668_v15 = vld [vmem:[#allocation8 + $0x4d4] ss:$28 sps:$4 sm:$0xff]   ;;  %v7671_v16 = vld [vmem:[#allocation8 + $0x4dc] ss:$28 sps:$4 sm:$0xff]  }
 0x133   :  { %3546 = vmatprep.subr.bf16.mxu1 %v7623_v17  ;;  %v7666_v17 = vld [vmem:[#allocation8 + $0x4d0] ss:$28 sps:$4 sm:$0xff]  }
 0x135   :  { %3383 = vmatpush1.bf16.msra.mxu0 %v7618_v18  ;;  %v7669_v18 = vld [vmem:[#allocation8 + $0x4d8] ss:$28 sps:$4 sm:$0xff]  }
 0x136   :  { %3547 = vmatpush1.bf16.msra.mxu1 %v7621_v19  ;;  %3384 = vmatprep.subr.bf16.mxu0 %v7626_v20  ;;  %v7674_v19 = vld [vmem:[#allocation8 + $0x50c] ss:$28 sps:$4 sm:$0xff]   ;;  %v7677_v20 = vld [vmem:[#allocation8 + $0x514] ss:$28 sps:$4 sm:$0xff]  }
 0x137   :  { %3548 = vmatprep.subr.bf16.mxu1 %v7629_v21  ;;  %v7672_v21 = vld [vmem:[#allocation8 + $0x508] ss:$28 sps:$4 sm:$0xff]  }
 0x139   :  { %3385 = vmatpush1.bf16.msra.mxu0 %v7624_v22  ;;  %v7675_v22 = vld [vmem:[#allocation8 + $0x510] ss:$28 sps:$4 sm:$0xff]  }
 0x13a   :  { %3549 = vmatpush1.bf16.msra.mxu1 %v7627_v23  ;;  %3395 = vmatprep.subr.bf16.mxu0 %v7632_v24  ;;  %v7680_v23 = vld [vmem:[#allocation8 + $0x544] ss:$28 sps:$4 sm:$0xff]   ;;  %v7683_v24 = vld [vmem:[#allocation8 + $0x54c] ss:$28 sps:$4 sm:$0xff]  }
 0x13b   :  { %3559 = vmatprep.subr.bf16.mxu1 %v7635_v25  ;;  %v7678_v25 = vld [vmem:[#allocation8 + $0x540] ss:$28 sps:$4 sm:$0xff]  }
 0x1c7   :  { %v355_v35 = vpop.f32.mrb[0].mxu0 }
 0x1c8   :  { %v356_v36 = vadd.f32 %v355_v35, %v223_v32  ;;  %v357_v37 = vpop.f32.mrb[1].mxu0  ;;  %v9243_v38 = vpop.f32.mrb[0].mxu1  ;;  %v7686_v32 = vld [vmem:[#allocation8 + $0x57c] ss:$28 sps:$4 sm:$0xff]  }
 0x1c9   :  { %v358_v39 = vadd.f32 %v357_v37, %v227_v33  ;;  %v359_v40 = vpop.f32.mrb[2].mxu0  ;;  %v398_v41 = vpop.f32.mrb[1].mxu1  ;;  %v7689_v33 = vld [vmem:[#allocation8 + $0x584] ss:$28 sps:$4 sm:$0xff]   ;;  %v7695_v37 = vld [vmem:[#allocation8 + $0x5bc] ss:$28 sps:$4 sm:$0xff]  }
 0x1ca   :  { %v485_v42 = vmax.f32 %v356_v36, 0.0  ;;  %v360_v43 = vpop.f32.mrb[3].mxu0  ;;  %v399_v44 = vadd.f32 %v398_v41, %v235_v34  ;;  %v400_v45 = vpop.f32.mrb[2].mxu1  ;;  %v7684_v34 = vld [vmem:[#allocation8 + $0x578] ss:$28 sps:$4 sm:$0xff]  }
 0x1cb   :  { %v486_v46 = vmax.f32 %v358_v39, 0.0  ;;  %v401_v49 = vpop.f32.mrb[3].mxu1  ;;  %v7687_v35 = vld [vmem:[#allocation8 + $0x580] ss:$28 sps:$4 sm:$0xff]   ;;  %v7692_v36 = vld [vmem:[#allocation8 + $0x5b4] ss:$28 sps:$4 sm:$0xff]  }
 0x1cc   :  { %v488_v50 = vmax.f32 %v399_v44, 0.0  ;;  %v9247_v52 = vpack.c.bf16 %v485_v42, %v485_v42  ;;  %v7690_v39 = vld [vmem:[#allocation8 + $0x5b0] ss:$28 sps:$4 sm:$0xff]   ;;  %v7693_v40 = vld [vmem:[#allocation8 + $0x5b8] ss:$28 sps:$4 sm:$0xff]  }
 0x1cd   :  { %v9245_v51 = vpack.c.bf16 %v486_v46, %v486_v46  ;;  %v7698_v41 = vld [vmem:[#allocation8 + $0x5ec] ss:$28 sps:$4 sm:$0xff]   ;;  %v7701_v42 = vld [vmem:[#allocation8 + $0x5f4] ss:$28 sps:$4 sm:$0xff]   ;;  %v7704_v45 = vld [vmem:[#allocation8 + $0x624] ss:$28 sps:$4 sm:$0xff]  }
 0x1ce   :  { %v9251_v55 = vpack.c.bf16 %v488_v50, %v488_v50  ;;  %v7696_v43 = vld [vmem:[#allocation8 + $0x5e8] ss:$28 sps:$4 sm:$0xff]   ;;  %v7699_v44 = vld [vmem:[#allocation8 + $0x5f0] ss:$28 sps:$4 sm:$0xff]   ;;  %v7710_v50 = vld [vmem:[#allocation8 + $0x65c] ss:$28 sps:$4 sm:$0xff]  }
 0x1cf   :  { %3386 = vmatprep.mubr.bf16.mxu0 %v9245_v51  ;;  %3550 = vmatprep.mubr.bf16.mxu1 %v9245_v51  ;;  %v9253_v56 = vpop.f32.mrb[4].mxu0  ;;  %v7707_v46 = vld [vmem:[#allocation8 + $0x62c] ss:$28 sps:$4 sm:$0xff]  }
 0x1d0   :  { %3387 = vmatmul.mubr.bf16.vlgmr.msra.gmra.mrb[8].mxu0 %v9247_v52  ;;  %3551 = vmatmul.mubr.bf16.vlgmr.msra.gmra.mrb[8].mxu1 %v9247_v52  ;;  %v9257_v57 = vpop.f32.mrb[5].mxu0  ;;  %v7705_v49 = vld [vmem:[#allocation8 + $0x628] ss:$28 sps:$4 sm:$0xff]  }
 0x1d1   :  { %3396 = vmatpush1.bf16.msra.mxu0 %v7630_v47  ;;  %3560 = vmatpush1.bf16.msra.mxu1 %v7633_v48  ;;  %v441_v60 = vpop.f32.mrb[6].mxu0  ;;  %v9262_v47 = vsub.s32 2, %v9224_v27  ;;  %v7702_v48 = vld [vmem:[#allocation8 + $0x620] ss:$28 sps:$4 sm:$0xff]  }
 0x1d2   :  { %3397 = vmatprep.subr.bf16.mxu0 %v7638_v53  ;;  %3561 = vmatprep.subr.bf16.mxu1 %v7641_v54  ;;  %v442_v63 = vpop.f32.mrb[7].mxu0  ;;  %v7713_v53 = vld [vmem:[#allocation8 + $0x664] ss:$28 sps:$4 sm:$0xff]   ;;  %v242_v54 = vsub.s32 5, %v9224_v27 }
 0x1d3   :  { %3427 = vmatprep.mubr.bf16.mxu0 %v9251_v55  ;;  %3591 = vmatprep.mubr.bf16.mxu1 %v9251_v55  ;;  %v7711_v60 = vld [vmem:[#allocation8 + $0x660] ss:$28 sps:$4 sm:$0xff]   ;;  %v9267_v63 = vpop.f32.mrb[4].mxu1 }
 0x1d5   :  { %3398 = vmatpush1.bf16.msra.mxu0 %v7636_v58  ;;  %3562 = vmatpush1.bf16.msra.mxu1 %v7639_v59  ;;  %v231_v58 = vrot.slane %v9229_v29, %v9262_v47  ;;  %v7708_v59 = vld [vmem:[#allocation8 + $0x658] ss:$28 sps:$4 sm:$0xff]  }
 0x1d6   :  { %3399 = vmatprep.subr.bf16.mxu0 %v7644_v61  ;;  %3563 = vmatprep.subr.bf16.mxu1 %v7647_v62  ;;  %v7716_v61 = vld [vmem:[#allocation8 + $0x694] ss:$28 sps:$4 sm:$0xff]   ;;  %v7719_v62 = vld [vmem:[#allocation8 + $0x69c] ss:$28 sps:$4 sm:$0xff]  }
 0x1d9   :  { %3400 = vmatpush1.bf16.msra.mxu0 %v7642_v1  ;;  %3564 = vmatpush1.bf16.msra.mxu1 %v7645_v2  ;;  %v243_v1 = vrot.slane %v9229_v29, %v242_v54  ;;  %v397_v2 = vadd.f32 %v9243_v38, %v231_v58  ;;  %v7720_v29 = vld [vmem:[#allocation8 + $0x6c8] ss:$28 sps:$4 sm:$0xff]   ;;  %v7771_v58 = vld [vmem:[#allocation8 + $0x890] ss:$28 sps:$4 sm:$0xff]  }
 0x1da   :  { %3401 = vmatprep.subr.bf16.mxu0 %v7650_v3  ;;  %3565 = vmatprep.subr.bf16.mxu1 %v7653_v4  ;;  %v7714_v3 = vld [vmem:[#allocation8 + $0x690] ss:$28 sps:$4 sm:$0xff]   ;;  %v7717_v4 = vld [vmem:[#allocation8 + $0x698] ss:$28 sps:$4 sm:$0xff]   ;;  %v7728_v38 = vld [vmem:[#allocation8 + $0x704] ss:$28 sps:$4 sm:$0xff]  }
 0x1dd   :  { %3402 = vmatpush1.bf16.msra.mxu0 %v7648_v5  ;;  %3566 = vmatpush1.bf16.msra.mxu1 %v7651_v6  ;;  %v9273_v5 = vpop.f32.mrb[5].mxu1  ;;  %v7722_v6 = vld [vmem:[#allocation8 + $0x6cc] ss:$28 sps:$4 sm:$0xff]  }
 0x1de   :  { %3403 = vmatprep.subr.bf16.mxu0 %v7656_v7  ;;  %3567 = vmatprep.subr.bf16.mxu1 %v7659_v8  ;;  %v7725_v7 = vld [vmem:[#allocation8 + $0x6d4] ss:$28 sps:$4 sm:$0xff]   ;;  %v482_v8 = vpop.f32.mrb[6].mxu1 }
 0x1df   :  { %v7786_v8 = vld [vmem:[#allocation8 + $0x930] ss:$28 sps:$4 sm:$0xff]  }
 0x1e1   :  { %3404 = vmatpush1.bf16.msra.mxu0 %v7654_v9  ;;  %3568 = vmatpush1.bf16.msra.mxu1 %v7657_v10  ;;  %v440_v9 = vadd.f32 %v9257_v57, %v243_v1  ;;  %v483_v10 = vpop.f32.mrb[7].mxu1  ;;  %v7734_v57 = vld [vmem:[#allocation8 + $0x73c] ss:$28 sps:$4 sm:$0xff]  }
 0x1e2   :  { %3405 = vmatprep.subr.bf16.mxu0 %v7662_v11  ;;  %3569 = vmatprep.subr.bf16.mxu1 %v7665_v12  ;;  %v487_v11 = vmax.f32 %v397_v2, 0.0  ;;  %v7723_v12 = vld [vmem:[#allocation8 + $0x6d0] ss:$28 sps:$4 sm:$0xff]   ;;  %v7782_v1 = vld [vmem:[#allocation8 + $0x8fc] ss:$28 sps:$4 sm:$0xff]  }
 0x1e3   :  { %v7785_v2 = vld [vmem:[#allocation8 + $0x904] ss:$28 sps:$4 sm:$0xff]   ;;  %v7794_v10 = vld [vmem:[#allocation8 + $0x96c] ss:$28 sps:$4 sm:$0xff]  }
 0x1e5   :  { %3406 = vmatpush1.bf16.msra.mxu0 %v7660_v13  ;;  %3570 = vmatpush1.bf16.msra.mxu1 %v7663_v14  ;;  %v7731_v13 = vld [vmem:[#allocation8 + $0x70c] ss:$28 sps:$4 sm:$0xff]   ;;  %v7726_v14 = vld [vmem:[#allocation8 + $0x700] ss:$28 sps:$4 sm:$0xff]  }
 0x1e6   :  { %3407 = vmatprep.subr.bf16.mxu0 %v7668_v15  ;;  %3571 = vmatprep.subr.bf16.mxu1 %v7671_v16  ;;  %v7729_v15 = vld [vmem:[#allocation8 + $0x708] ss:$28 sps:$4 sm:$0xff]   ;;  %v490_v16 = vmax.f32 %v440_v9, 0.0  ;;  %v7789_v9 = vld [vmem:[#allocation8 + $0x938] ss:$28 sps:$4 sm:$0xff]  }
 0x1e9   :  { %3408 = vmatpush1.bf16.msra.mxu0 %v7666_v17  ;;  %3572 = vmatpush1.bf16.msra.mxu1 %v7669_v18  ;;  %v9276_v17 = vpack.c.bf16 %v487_v11, %v487_v11  ;;  %v7737_v18 = vld [vmem:[#allocation8 + $0x744] ss:$28 sps:$4 sm:$0xff]   ;;  %v7797_v11 = vld [vmem:[#allocation8 + $0x974] ss:$28 sps:$4 sm:$0xff]  }
 0x1ea   :  { %3409 = vmatprep.subr.bf16.mxu0 %v7674_v19  ;;  %3573 = vmatprep.subr.bf16.mxu1 %v7677_v20  ;;  %v7732_v19 = vld [vmem:[#allocation8 + $0x738] ss:$28 sps:$4 sm:$0xff]   ;;  %v7735_v20 = vld [vmem:[#allocation8 + $0x740] ss:$28 sps:$4 sm:$0xff]  }
 0x1ed   :  { %3410 = vmatpush1.bf16.msra.mxu0 %v7672_v21  ;;  %3574 = vmatpush1.bf16.msra.mxu1 %v7675_v22  ;;  %v9278_v21 = vpack.c.bf16 %v490_v16, %v490_v16  ;;  %v7740_v22 = vld [vmem:[#allocation8 + $0x774] ss:$28 sps:$4 sm:$0xff]   ;;  %v238_v16 = vsub.s32 4, %v9224_v27 }
 0x1ee   :  { %3411 = vmatprep.subr.bf16.mxu0 %v7680_v23  ;;  %3575 = vmatprep.subr.bf16.mxu1 %v7683_v24  ;;  %v7743_v23 = vld [vmem:[#allocation8 + $0x77c] ss:$28 sps:$4 sm:$0xff]   ;;  %v7738_v24 = vld [vmem:[#allocation8 + $0x770] ss:$28 sps:$4 sm:$0xff]  }
 0x1f1   :  { %3412 = vmatpush1.bf16.msra.mxu0 %v7678_v25  ;;  %3576 = vmatpush1.bf16.msra.mxu1 %v7681_v26  ;;  %v7741_v25 = vld [vmem:[#allocation8 + $0x778] ss:$28 sps:$4 sm:$0xff]   ;;  %v7746_v26 = vld [vmem:[#allocation8 + $0x7ac] ss:$28 sps:$4 sm:$0xff]  }
 0x1f2   :  { %3413 = vmatprep.subr.bf16.mxu0 %v7686_v32  ;;  %3577 = vmatprep.subr.bf16.mxu1 %v7689_v33  ;;  %v7749_v32 = vld [vmem:[#allocation8 + $0x7b4] ss:$28 sps:$4 sm:$0xff]   ;;  %v7744_v33 = vld [vmem:[#allocation8 + $0x7a8] ss:$28 sps:$4 sm:$0xff]  }
 0x1f5   :  { %3414 = vmatpush1.bf16.msra.mxu0 %v7684_v34  ;;  %3578 = vmatpush1.bf16.msra.mxu1 %v7687_v35  ;;  %v7747_v34 = vld [vmem:[#allocation8 + $0x7b0] ss:$28 sps:$4 sm:$0xff]   ;;  %v7752_v35 = vld [vmem:[#allocation8 + $0x7e4] ss:$28 sps:$4 sm:$0xff]  }
 0x1f6   :  { %3415 = vmatprep.subr.bf16.mxu0 %v7692_v36  ;;  %3579 = vmatprep.subr.bf16.mxu1 %v7695_v37  ;;  %v7755_v36 = vld [vmem:[#allocation8 + $0x7ec] ss:$28 sps:$4 sm:$0xff]   ;;  %v7750_v37 = vld [vmem:[#allocation8 + $0x7e0] ss:$28 sps:$4 sm:$0xff]  }
 0x1f9   :  { %3416 = vmatpush1.bf16.msra.mxu0 %v7690_v39  ;;  %3580 = vmatpush1.bf16.msra.mxu1 %v7693_v40  ;;  %v7753_v39 = vld [vmem:[#allocation8 + $0x7e8] ss:$28 sps:$4 sm:$0xff]   ;;  %v7758_v40 = vld [vmem:[#allocation8 + $0x81c] ss:$28 sps:$4 sm:$0xff]  }
 0x1fa   :  { %3417 = vmatprep.subr.bf16.mxu0 %v7698_v41  ;;  %3581 = vmatprep.subr.bf16.mxu1 %v7701_v42  ;;  %v7761_v41 = vld [vmem:[#allocation8 + $0x824] ss:$28 sps:$4 sm:$0xff]   ;;  %v7756_v42 = vld [vmem:[#allocation8 + $0x818] ss:$28 sps:$4 sm:$0xff]  }
 0x1fd   :  { %3418 = vmatpush1.bf16.msra.mxu0 %v7696_v43  ;;  %3582 = vmatpush1.bf16.msra.mxu1 %v7699_v44  ;;  %v7759_v43 = vld [vmem:[#allocation8 + $0x820] ss:$28 sps:$4 sm:$0xff]   ;;  %v7764_v44 = vld [vmem:[#allocation8 + $0x854] ss:$28 sps:$4 sm:$0xff]  }
 0x1fe   :  { %3419 = vmatprep.subr.bf16.mxu0 %v7704_v45  ;;  %3583 = vmatprep.subr.bf16.mxu1 %v7707_v46  ;;  %v7767_v45 = vld [vmem:[#allocation8 + $0x85c] ss:$28 sps:$4 sm:$0xff]   ;;  %v7762_v46 = vld [vmem:[#allocation8 + $0x850] ss:$28 sps:$4 sm:$0xff]  }
 0x201   :  { %3420 = vmatpush1.bf16.msra.mxu0 %v7702_v48  ;;  %3584 = vmatpush1.bf16.msra.mxu1 %v7705_v49  ;;  %v7765_v48 = vld [vmem:[#allocation8 + $0x858] ss:$28 sps:$4 sm:$0xff]   ;;  %v7770_v49 = vld [vmem:[#allocation8 + $0x88c] ss:$28 sps:$4 sm:$0xff]  }
 0x202   :  { %3421 = vmatprep.subr.bf16.mxu0 %v7710_v50  ;;  %3585 = vmatprep.subr.bf16.mxu1 %v7713_v53  ;;  %v7773_v50 = vld [vmem:[#allocation8 + $0x894] ss:$28 sps:$4 sm:$0xff]   ;;  %v7768_v53 = vld [vmem:[#allocation8 + $0x888] ss:$28 sps:$4 sm:$0xff]  }
 0x205   :  { %3422 = vmatpush1.bf16.msra.mxu0 %v7708_v59  ;;  %3586 = vmatpush1.bf16.msra.mxu1 %v7711_v60  ;;  %v7776_v59 = vld [vmem:[#allocation8 + $0x8c4] ss:$28 sps:$4 sm:$0xff]   ;;  %v7779_v60 = vld [vmem:[#allocation8 + $0x8cc] ss:$28 sps:$4 sm:$0xff]  }
 0x206   :  { %3423 = vmatprep.subr.bf16.mxu0 %v7716_v61  ;;  %3587 = vmatprep.subr.bf16.mxu1 %v7719_v62  ;;  %v7774_v61 = vld [vmem:[#allocation8 + $0x8c0] ss:$28 sps:$4 sm:$0xff]   ;;  %v7777_v62 = vld [vmem:[#allocation8 + $0x8c8] ss:$28 sps:$4 sm:$0xff]  }
 0x209   :  { %3424 = vmatpush1.bf16.msra.mxu0 %v7714_v3  ;;  %3588 = vmatpush1.bf16.msra.mxu1 %v7717_v4  ;;  %v7780_v3 = vld [vmem:[#allocation8 + $0x8f8] ss:$28 sps:$4 sm:$0xff]   ;;  %v7783_v4 = vld [vmem:[#allocation8 + $0x900] ss:$28 sps:$4 sm:$0xff]  }
 0x20a   :  { %3425 = vmatprep.subr.bf16.mxu0 %v7722_v6  ;;  %3589 = vmatprep.subr.bf16.mxu1 %v7725_v7  ;;  %v7788_v6 = vld [vmem:[#allocation8 + $0x934] ss:$28 sps:$4 sm:$0xff]   ;;  %v7791_v7 = vld [vmem:[#allocation8 + $0x93c] ss:$28 sps:$4 sm:$0xff]  }
 0x20d   :  { %3426 = vmatpush1.bf16.msra.mxu0 %v7720_v29  ;;  %3590 = vmatpush1.bf16.msra.mxu1 %v7723_v12  ;;  %v7792_v29 = vld [vmem:[#allocation8 + $0x968] ss:$28 sps:$4 sm:$0xff]   ;;  %v7795_v12 = vld [vmem:[#allocation8 + $0x970] ss:$28 sps:$4 sm:$0xff]  }
 0x20e   :  { %3436 = vmatprep.subr.bf16.mxu0 %v7728_v38  ;;  %3600 = vmatprep.subr.bf16.mxu1 %v7731_v13  ;;  %v7800_v38 = vld [vmem:[#allocation8 + $0x9a4] ss:$28 sps:$4 sm:$0xff]   ;;  %v7803_v13 = vld [vmem:[#allocation8 + $0x9ac] ss:$28 sps:$4 sm:$0xff]  }
 0x210   :  { %3428 = vmatmul.mubr.bf16.vlgmr.msra.gmra.mrb[8].mxu0 %v9276_v17  ;;  %3592 = vmatmul.mubr.bf16.vlgmr.msra.gmra.mrb[8].mxu1 %v9276_v17 }
 0x211   :  { %3437 = vmatpush1.bf16.msra.mxu0 %v7726_v14  ;;  %3601 = vmatpush1.bf16.msra.mxu1 %v7729_v15  ;;  %v7798_v14 = vld [vmem:[#allocation8 + $0x9a0] ss:$28 sps:$4 sm:$0xff]   ;;  %v7801_v15 = vld [vmem:[#allocation8 + $0x9a8] ss:$28 sps:$4 sm:$0xff]  }
 0x212   :  { %3438 = vmatprep.subr.bf16.mxu0 %v7734_v57  ;;  %3602 = vmatprep.subr.bf16.mxu1 %v7737_v18  ;;  %v7806_v57 = vld [vmem:[#allocation8 + $0x9dc] ss:$28 sps:$4 sm:$0xff]   ;;  %v7809_v18 = vld [vmem:[#allocation8 + $0x9e4] ss:$28 sps:$4 sm:$0xff]  }
 0x213   :  { %3468 = vmatprep.mubr.bf16.mxu0 %v9278_v21  ;;  %3632 = vmatprep.mubr.bf16.mxu1 %v9278_v21 }
 0x215   :  { %3439 = vmatpush1.bf16.msra.mxu0 %v7732_v19  ;;  %3603 = vmatpush1.bf16.msra.mxu1 %v7735_v20  ;;  %v7804_v19 = vld [vmem:[#allocation8 + $0x9d8] ss:$28 sps:$4 sm:$0xff]   ;;  %v250_v20 = vsub.s32 7, %v9224_v27 }
 0x216   :  { %3440 = vmatprep.subr.bf16.mxu0 %v7740_v22  ;;  %3604 = vmatprep.subr.bf16.mxu1 %v7743_v23  ;;  %v7807_v22 = vld [vmem:[#allocation8 + $0x9e0] ss:$28 sps:$4 sm:$0xff]  }
 0x217   :  { %v9286_v23 = vld [vmem:[#allocation7] sm:$0xff] }
 0x219   :  { %3441 = vmatpush1.bf16.msra.mxu0 %v7738_v24  ;;  %3605 = vmatpush1.bf16.msra.mxu1 %v7741_v25  ;;  %v239_v24 = vrot.slane %v9286_v23, %v238_v16  ;;  %v7812_v25 = vld [vmem:[#allocation8 + $0xa14] ss:$28 sps:$4 sm:$0xff]  }
 0x21a   :  { %3442 = vmatprep.subr.bf16.mxu0 %v7746_v26  ;;  %3606 = vmatprep.subr.bf16.mxu1 %v7749_v32  ;;  %v7815_v26 = vld [vmem:[#allocation8 + $0xa1c] ss:$28 sps:$4 sm:$0xff]   ;;  %v7810_v32 = vld [vmem:[#allocation8 + $0xa10] ss:$28 sps:$4 sm:$0xff]  }
 0x21d   :  { %3443 = vmatpush1.bf16.msra.mxu0 %v7744_v33  ;;  %3607 = vmatpush1.bf16.msra.mxu1 %v7747_v34  ;;  %v251_v33 = vrot.slane %v9286_v23, %v250_v20  ;;  %v438_v34 = vadd.f32 %v9253_v56, %v239_v24  ;;  %v7825_v56 = vld [vmem:[#allocation8 + $0xa88] ss:$28 sps:$4 sm:$0xff]   ;;  %v7867_v20 = vld [vmem:[#allocation8 + $0xc10] ss:$28 sps:$4 sm:$0xff]  }
 0x21e   :  { %3444 = vmatprep.subr.bf16.mxu0 %v7752_v35  ;;  %3608 = vmatprep.subr.bf16.mxu1 %v7755_v36  ;;  %v7813_v35 = vld [vmem:[#allocation8 + $0xa18] ss:$28 sps:$4 sm:$0xff]   ;;  %v7818_v36 = vld [vmem:[#allocation8 + $0xa4c] ss:$28 sps:$4 sm:$0xff]  }
 0x21f   :  { %v7875_v24 = vld [vmem:[#allocation8 + $0xc4c] ss:$28 sps:$4 sm:$0xff]  }
 0x221   :  { %3445 = vmatpush1.bf16.msra.mxu0 %v7750_v37  ;;  %3609 = vmatpush1.bf16.msra.mxu1 %v7753_v39  ;;  %v7821_v37 = vld [vmem:[#allocation8 + $0xa54] ss:$28 sps:$4 sm:$0xff]   ;;  %v7816_v39 = vld [vmem:[#allocation8 + $0xa48] ss:$28 sps:$4 sm:$0xff]  }
 0x222   :  { %3446 = vmatprep.subr.bf16.mxu0 %v7758_v40  ;;  %3610 = vmatprep.subr.bf16.mxu1 %v7761_v41  ;;  %v481_v40 = vadd.f32 %v9273_v5, %v251_v33  ;;  %v489_v41 = vmax.f32 %v438_v34, 0.0  ;;  %v7828_v5 = vld [vmem:[#allocation8 + $0xab8] ss:$28 sps:$4 sm:$0xff]   ;;  %v7881_v33 = vld [vmem:[#allocation8 + $0xc84] ss:$28 sps:$4 sm:$0xff]  }
 0x223   :  { %v7876_v34 = vld [vmem:[#allocation8 + $0xc78] ss:$28 sps:$4 sm:$0xff]  }
 0x225   :  { %3447 = vmatpush1.bf16.msra.mxu0 %v7756_v42  ;;  %3611 = vmatpush1.bf16.msra.mxu1 %v7759_v43  ;;  %v7819_v42 = vld [vmem:[#allocation8 + $0xa50] ss:$28 sps:$4 sm:$0xff]   ;;  %v7824_v43 = vld [vmem:[#allocation8 + $0xa84] ss:$28 sps:$4 sm:$0xff]  }
 0x226   :  { %3448 = vmatprep.subr.bf16.mxu0 %v7764_v44  ;;  %3612 = vmatprep.subr.bf16.mxu1 %v7767_v45  ;;  %v7827_v44 = vld [vmem:[#allocation8 + $0xa8c] ss:$28 sps:$4 sm:$0xff]   ;;  %v7822_v45 = vld [vmem:[#allocation8 + $0xa80] ss:$28 sps:$4 sm:$0xff]  }
 0x229   :  { %3449 = vmatpush1.bf16.msra.mxu0 %v7762_v46  ;;  %3613 = vmatpush1.bf16.msra.mxu1 %v7765_v48  ;;  %v492_v46 = vmax.f32 %v481_v40, 0.0  ;;  %v9294_v48 = vpack.c.bf16 %v489_v41, %v489_v41  ;;  %v7885_v40 = vld [vmem:[#allocation8 + $0xcb8] ss:$28 sps:$4 sm:$0xff]   ;;  %v7890_v41 = vld [vmem:[#allocation8 + $0xcec] ss:$28 sps:$4 sm:$0xff]  }
 0x22a   :  { %3450 = vmatprep.subr.bf16.mxu0 %v7770_v49  ;;  %3614 = vmatprep.subr.bf16.mxu1 %v7773_v50  ;;  %v7830_v49 = vld [vmem:[#allocation8 + $0xabc] ss:$28 sps:$4 sm:$0xff]   ;;  %v7833_v50 = vld [vmem:[#allocation8 + $0xac4] ss:$28 sps:$4 sm:$0xff]  }
 0x22d   :  { %3451 = vmatpush1.bf16.msra.mxu0 %v7768_v53  ;;  %3615 = vmatpush1.bf16.msra.mxu1 %v7771_v58  ;;  %v7831_v53 = vld [vmem:[#allocation8 + $0xac0] ss:$28 sps:$4 sm:$0xff]   ;;  %v9296_v58 = vpack.c.bf16 %v492_v46, %v492_v46  ;;  %v246_v46 = vsub.s32 6, %v9224_v27  ;;  %v8468_v27 = vld [vmem:[#allocation11 + $0x620] ss:$16 sps:$4 sm:$0xff]  }
 0x22e   :  { %3452 = vmatprep.subr.bf16.mxu0 %v7776_v59  ;;  %3616 = vmatprep.subr.bf16.mxu1 %v7779_v60  ;;  %v7836_v59 = vld [vmem:[#allocation8 + $0xaf4] ss:$28 sps:$4 sm:$0xff]   ;;  %v7839_v60 = vld [vmem:[#allocation8 + $0xafc] ss:$28 sps:$4 sm:$0xff]  }
 0x231   :  { %3453 = vmatpush1.bf16.msra.mxu0 %v7774_v61  ;;  %3617 = vmatpush1.bf16.msra.mxu1 %v7777_v62  ;;  %v7834_v61 = vld [vmem:[#allocation8 + $0xaf0] ss:$28 sps:$4 sm:$0xff]   ;;  %v7837_v62 = vld [vmem:[#allocation8 + $0xaf8] ss:$28 sps:$4 sm:$0xff]  }
 0x232   :  { %3454 = vmatprep.subr.bf16.mxu0 %v7782_v1  ;;  %3618 = vmatprep.subr.bf16.mxu1 %v7785_v2  ;;  %v7842_v1 = vld [vmem:[#allocation8 + $0xb2c] ss:$28 sps:$4 sm:$0xff]   ;;  %v7845_v2 = vld [vmem:[#allocation8 + $0xb34] ss:$28 sps:$4 sm:$0xff]  }
 0x235   :  { %3455 = vmatpush1.bf16.msra.mxu0 %v7780_v3  ;;  %3619 = vmatpush1.bf16.msra.mxu1 %v7783_v4  ;;  %v7840_v3 = vld [vmem:[#allocation8 + $0xb28] ss:$28 sps:$4 sm:$0xff]   ;;  %v7843_v4 = vld [vmem:[#allocation8 + $0xb30] ss:$28 sps:$4 sm:$0xff]  }
 0x236   :  { %3456 = vmatprep.subr.bf16.mxu0 %v7788_v6  ;;  %3620 = vmatprep.subr.bf16.mxu1 %v7791_v7  ;;  %v7848_v6 = vld [vmem:[#allocation8 + $0xb64] ss:$28 sps:$4 sm:$0xff]   ;;  %v7851_v7 = vld [vmem:[#allocation8 + $0xb6c] ss:$28 sps:$4 sm:$0xff]  }
 0x239   :  { %3457 = vmatpush1.bf16.msra.mxu0 %v7786_v8  ;;  %3621 = vmatpush1.bf16.msra.mxu1 %v7789_v9  ;;  %v7846_v8 = vld [vmem:[#allocation8 + $0xb60] ss:$28 sps:$4 sm:$0xff]   ;;  %v7849_v9 = vld [vmem:[#allocation8 + $0xb68] ss:$28 sps:$4 sm:$0xff]  }
 0x23a   :  { %3458 = vmatprep.subr.bf16.mxu0 %v7794_v10  ;;  %3622 = vmatprep.subr.bf16.mxu1 %v7797_v11  ;;  %v7854_v10 = vld [vmem:[#allocation8 + $0xb9c] ss:$28 sps:$4 sm:$0xff]   ;;  %v7857_v11 = vld [vmem:[#allocation8 + $0xba4] ss:$28 sps:$4 sm:$0xff]  }
 0x23d   :  { %3459 = vmatpush1.bf16.msra.mxu0 %v7792_v29  ;;  %3623 = vmatpush1.bf16.msra.mxu1 %v7795_v12  ;;  %v7852_v29 = vld [vmem:[#allocation8 + $0xb98] ss:$28 sps:$4 sm:$0xff]   ;;  %v7855_v12 = vld [vmem:[#allocation8 + $0xba0] ss:$28 sps:$4 sm:$0xff]  }
 0x23e   :  { %3460 = vmatprep.subr.bf16.mxu0 %v7800_v38  ;;  %3624 = vmatprep.subr.bf16.mxu1 %v7803_v13  ;;  %v7860_v38 = vld [vmem:[#allocation8 + $0xbd4] ss:$28 sps:$4 sm:$0xff]   ;;  %v7863_v13 = vld [vmem:[#allocation8 + $0xbdc] ss:$28 sps:$4 sm:$0xff]  }
 0x241   :  { %3461 = vmatpush1.bf16.msra.mxu0 %v7798_v14  ;;  %3625 = vmatpush1.bf16.msra.mxu1 %v7801_v15  ;;  %v7858_v14 = vld [vmem:[#allocation8 + $0xbd0] ss:$28 sps:$4 sm:$0xff]   ;;  %v7861_v15 = vld [vmem:[#allocation8 + $0xbd8] ss:$28 sps:$4 sm:$0xff]  }
 0x242   :  { %3462 = vmatprep.subr.bf16.mxu0 %v7806_v57  ;;  %3626 = vmatprep.subr.bf16.mxu1 %v7809_v18  ;;  %v7866_v57 = vld [vmem:[#allocation8 + $0xc0c] ss:$28 sps:$4 sm:$0xff]   ;;  %v7869_v18 = vld [vmem:[#allocation8 + $0xc14] ss:$28 sps:$4 sm:$0xff]  }
 0x245   :  { %3463 = vmatpush1.bf16.msra.mxu0 %v7804_v19  ;;  %3627 = vmatpush1.bf16.msra.mxu1 %v7807_v22  ;;  %v7864_v19 = vld [vmem:[#allocation8 + $0xc08] ss:$28 sps:$4 sm:$0xff]  }
 0x246   :  { %3464 = vmatprep.subr.bf16.mxu0 %v7812_v25  ;;  %3628 = vmatprep.subr.bf16.mxu1 %v7815_v26  ;;  %v7872_v22 = vld [vmem:[#allocation8 + $0xc44] ss:$28 sps:$4 sm:$0xff]  }
 0x247   :  { %v7870_v25 = vld [vmem:[#allocation8 + $0xc40] ss:$28 sps:$4 sm:$0xff]   ;;  %v7873_v26 = vld [vmem:[#allocation8 + $0xc48] ss:$28 sps:$4 sm:$0xff]  }
 0x249   :  { %3465 = vmatpush1.bf16.msra.mxu0 %v7810_v32  ;;  %3629 = vmatpush1.bf16.msra.mxu1 %v7813_v35  ;;  %v7878_v32 = vld [vmem:[#allocation8 + $0xc7c] ss:$28 sps:$4 sm:$0xff]  }
 0x24a   :  { %3466 = vmatprep.subr.bf16.mxu0 %v7818_v36  ;;  %3630 = vmatprep.subr.bf16.mxu1 %v7821_v37  ;;  %v7879_v35 = vld [vmem:[#allocation8 + $0xc80] ss:$28 sps:$4 sm:$0xff]   ;;  %v7884_v36 = vld [vmem:[#allocation8 + $0xcb4] ss:$28 sps:$4 sm:$0xff]  }
 0x24b   :  { %v7887_v37 = vld [vmem:[#allocation8 + $0xcbc] ss:$28 sps:$4 sm:$0xff]  }
 0x24d   :  { %3467 = vmatpush1.bf16.msra.mxu0 %v7816_v39  ;;  %3631 = vmatpush1.bf16.msra.mxu1 %v7819_v42  ;;  %v7882_v39 = vld [vmem:[#allocation8 + $0xcb0] ss:$28 sps:$4 sm:$0xff]  }
 0x24e   :  { %3477 = vmatprep.subr.bf16.mxu0 %v7824_v43  ;;  %3641 = vmatprep.subr.bf16.mxu1 %v7827_v44  ;;  %v7893_v42 = vld [vmem:[#allocation8 + $0xcf4] ss:$28 sps:$4 sm:$0xff]   ;;  %v7888_v43 = vld [vmem:[#allocation8 + $0xce8] ss:$28 sps:$4 sm:$0xff]  }
 0x24f   :  { %v7891_v44 = vld [vmem:[#allocation8 + $0xcf0] ss:$28 sps:$4 sm:$0xff]  }
 0x250   :  { %3469 = vmatmul.mubr.bf16.vlgmr.msra.gmra.mrb[8].mxu0 %v9294_v48  ;;  %3633 = vmatmul.mubr.bf16.vlgmr.msra.gmra.mrb[8].mxu1 %v9294_v48 }
 0x251   :  { %3478 = vmatpush1.bf16.msra.mxu0 %v7822_v45  ;;  %3642 = vmatpush1.bf16.msra.mxu1 %v7825_v56  ;;  %v7896_v45 = vld [vmem:[#allocation8 + $0xd24] ss:$28 sps:$4 sm:$0xff]   ;;  %v7899_v56 = vld [vmem:[#allocation8 + $0xd2c] ss:$28 sps:$4 sm:$0xff]  }
 0x252   :  { %3479 = vmatprep.subr.bf16.mxu0 %v7830_v49  ;;  %3643 = vmatprep.subr.bf16.mxu1 %v7833_v50  ;;  %v7894_v49 = vld [vmem:[#allocation8 + $0xd20] ss:$28 sps:$4 sm:$0xff]   ;;  %v7897_v50 = vld [vmem:[#allocation8 + $0xd28] ss:$28 sps:$4 sm:$0xff]  }
 0x253   :  { %3509 = vmatprep.mubr.bf16.mxu0 %v9296_v58  ;;  %3673 = vmatprep.mubr.bf16.mxu1 %v9296_v58 }
 0x255   :  { %3480 = vmatpush1.bf16.msra.mxu0 %v7828_v5  ;;  %3644 = vmatpush1.bf16.msra.mxu1 %v7831_v53  ;;  %v7902_v5 = vld [vmem:[#allocation8 + $0xd5c] ss:$28 sps:$4 sm:$0xff]   ;;  %v7905_v53 = vld [vmem:[#allocation8 + $0xd64] ss:$28 sps:$4 sm:$0xff]  }
 0x256   :  { %3481 = vmatprep.subr.bf16.mxu0 %v7836_v59  ;;  %3645 = vmatprep.subr.bf16.mxu1 %v7839_v60  ;;  %v247_v59 = vrot.slane %v9286_v23, %v246_v46  ;;  %v7900_v60 = vld [vmem:[#allocation8 + $0xd58] ss:$28 sps:$4 sm:$0xff]   ;;  %v7912_v23 = vld [vmem:[#allocation8 + $0xdc8] ss:$28 sps:$4 sm:$0xff]  }
 0x259   :  { %3482 = vmatpush1.bf16.msra.mxu0 %v7834_v61  ;;  %3646 = vmatpush1.bf16.msra.mxu1 %v7837_v62  ;;  %v7903_v61 = vld [vmem:[#allocation8 + $0xd60] ss:$28 sps:$4 sm:$0xff]   ;;  %v479_v62 = vadd.f32 %v9267_v63, %v247_v59  ;;  %v7962_v59 = vld [vmem:[#allocation8 + $0x398] ss:$28 sps:$4 sm:$0xff]  }
 0x25a   :  { %3483 = vmatprep.subr.bf16.mxu0 %v7842_v1  ;;  %3647 = vmatprep.subr.bf16.mxu1 %v7845_v2  ;;  %v7908_v1 = vld [vmem:[#allocation8 + $0xd94] ss:$28 sps:$4 sm:$0xff]   ;;  %v7911_v2 = vld [vmem:[#allocation8 + $0xd9c] ss:$28 sps:$4 sm:$0xff]  }
 0x25d   :  { %3484 = vmatpush1.bf16.msra.mxu0 %v7840_v3  ;;  %3648 = vmatpush1.bf16.msra.mxu1 %v7843_v4  ;;  %v7906_v3 = vld [vmem:[#allocation8 + $0xd90] ss:$28 sps:$4 sm:$0xff]   ;;  %v7909_v4 = vld [vmem:[#allocation8 + $0xd98] ss:$28 sps:$4 sm:$0xff]  }
 0x25e   :  { %3485 = vmatprep.subr.bf16.mxu0 %v7848_v6  ;;  %3649 = vmatprep.subr.bf16.mxu1 %v7851_v7  ;;  %v491_v6 = vmax.f32 %v479_v62, 0.0  ;;  %v7914_v7 = vld [vmem:[#allocation8 + $0xdcc] ss:$28 sps:$4 sm:$0xff]  }
 0x25f   :  { %v7963_v62 = vld [vmem:[#allocation8 + $0x208] ss:$28 sps:$4 sm:$0xff]  }
 0x260   :  { %v9307_v63 = vpack.c.bf16 %v491_v6, %v491_v6  ;;  %v7972_v6 = vld [vmem:[#allocation8 + $0x408] ss:$28 sps:$4 sm:$0xff]  }
 0x261   :  { %3486 = vmatpush1.bf16.msra.mxu0 %v7846_v8  ;;  %3650 = vmatpush1.bf16.msra.mxu1 %v7849_v9  ;;  %v7917_v8 = vld [vmem:[#allocation8 + $0xdd4] ss:$28 sps:$4 sm:$0xff]  }
 0x262   :  { %3487 = vmatprep.subr.bf16.mxu0 %v7854_v10  ;;  %3651 = vmatprep.subr.bf16.mxu1 %v7857_v11  ;;  %v7915_v9 = vld [vmem:[#allocation8 + $0xdd0] ss:$28 sps:$4 sm:$0xff]   ;;  %v7921_v11 = vld [vmem:[#allocation8 + $0x1d8] ss:$28 sps:$4 sm:$0xff]  }
 0x263   :  { %v7920_v10 = vld [vmem:[#allocation8 + $0x14] ss:$28 sps:$4 sm:$0xff]  }
 0x265   :  { %3488 = vmatpush1.bf16.msra.mxu0 %v7852_v29  ;;  %3652 = vmatpush1.bf16.msra.mxu1 %v7855_v12  ;;  %v7918_v29 = vld [vmem:[#allocation8 + $0x10] ss:$28 sps:$4 sm:$0xff]   ;;  %v7922_v12 = vld [vmem:[#allocation8 + $0x18] ss:$28 sps:$4 sm:$0xff]  }
 0x266   :  { %3489 = vmatprep.subr.bf16.mxu0 %v7860_v38  ;;  %3653 = vmatprep.subr.bf16.mxu1 %v7863_v13  ;;  %v7925_v38 = vld [vmem:[#allocation8 + $0x4c] ss:$28 sps:$4 sm:$0xff]  }
 0x267   :  { %v7926_v13 = vld [vmem:[#allocation8 + $0x210] ss:$28 sps:$4 sm:$0xff]  }
 0x269   :  { %3490 = vmatpush1.bf16.msra.mxu0 %v7858_v14  ;;  %3654 = vmatpush1.bf16.msra.mxu1 %v7861_v15  ;;  %v7923_v14 = vld [vmem:[#allocation8 + $0x48] ss:$28 sps:$4 sm:$0xff]   ;;  %v7927_v15 = vld [vmem:[#allocation8 + $0x50] ss:$28 sps:$4 sm:$0xff]  }
 0x26a   :  { %3491 = vmatprep.subr.bf16.mxu0 %v7866_v57  ;;  %3655 = vmatprep.subr.bf16.mxu1 %v7869_v18  ;;  %v7930_v57 = vld [vmem:[#allocation8 + $0x84] ss:$28 sps:$4 sm:$0xff]  }
 0x26b   :  { %v7931_v18 = vld [vmem:[#allocation8 + $0x248] ss:$28 sps:$4 sm:$0xff]  }
 0x26d   :  { %3492 = vmatpush1.bf16.msra.mxu0 %v7864_v19  ;;  %3656 = vmatpush1.bf16.msra.mxu1 %v7867_v20  ;;  %v7928_v19 = vld [vmem:[#allocation8 + $0x80] ss:$28 sps:$4 sm:$0xff]   ;;  %v7932_v20 = vld [vmem:[#allocation8 + $0x88] ss:$28 sps:$4 sm:$0xff]  }
 0x26e   :  { %3493 = vmatprep.subr.bf16.mxu0 %v7872_v22  ;;  %3657 = vmatprep.subr.bf16.mxu1 %v7875_v24  ;;  %v7935_v22 = vld [vmem:[#allocation8 + $0xbc] ss:$28 sps:$4 sm:$0xff]  }
 0x26f   :  { %v7936_v24 = vld [vmem:[#allocation8 + $0x280] ss:$28 sps:$4 sm:$0xff]  }
 0x271   :  { %3494 = vmatpush1.bf16.msra.mxu0 %v7870_v25  ;;  %3658 = vmatpush1.bf16.msra.mxu1 %v7873_v26  ;;  %v7933_v25 = vld [vmem:[#allocation8 + $0xb8] ss:$28 sps:$4 sm:$0xff]   ;;  %v7937_v26 = vld [vmem:[#allocation8 + $0xc0] ss:$28 sps:$4 sm:$0xff]  }
 0x272   :  { %3495 = vmatprep.subr.bf16.mxu0 %v7878_v32  ;;  %3659 = vmatprep.subr.bf16.mxu1 %v7881_v33  ;;  %v7940_v32 = vld [vmem:[#allocation8 + $0xf4] ss:$28 sps:$4 sm:$0xff]  }
 0x273   :  { %v7938_v33 = vld [vmem:[#allocation8 + $0xf0] ss:$28 sps:$4 sm:$0xff]  }
 0x275   :  { %3496 = vmatpush1.bf16.msra.mxu0 %v7876_v34  ;;  %3660 = vmatpush1.bf16.msra.mxu1 %v7879_v35  ;;  %v7942_v34 = vld [vmem:[#allocation8 + $0xf8] ss:$28 sps:$4 sm:$0xff]   ;;  %v7945_v35 = vld [vmem:[#allocation8 + $0x12c] ss:$28 sps:$4 sm:$0xff]  }
 0x276   :  { %3497 = vmatprep.subr.bf16.mxu0 %v7884_v36  ;;  %3661 = vmatprep.subr.bf16.mxu1 %v7887_v37  ;;  %v7946_v36 = vld [vmem:[#allocation8 + $0x2f0] ss:$28 sps:$4 sm:$0xff]   ;;  %v7943_v37 = vld [vmem:[#allocation8 + $0x128] ss:$28 sps:$4 sm:$0xff]  }
 0x279   :  { %3498 = vmatpush1.bf16.msra.mxu0 %v7882_v39  ;;  %3662 = vmatpush1.bf16.msra.mxu1 %v7885_v40  ;;  %v7947_v39 = vld [vmem:[#allocation8 + $0x130] ss:$28 sps:$4 sm:$0xff]   ;;  %v7950_v40 = vld [vmem:[#allocation8 + $0x164] ss:$28 sps:$4 sm:$0xff]  }
 0x27a   :  { %3499 = vmatprep.subr.bf16.mxu0 %v7890_v41  ;;  %3663 = vmatprep.subr.bf16.mxu1 %v7893_v42  ;;  %v7951_v41 = vld [vmem:[#allocation8 + $0x328] ss:$28 sps:$4 sm:$0xff]   ;;  %v7948_v42 = vld [vmem:[#allocation8 + $0x160] ss:$28 sps:$4 sm:$0xff]  }
 0x27d   :  { %3500 = vmatpush1.bf16.msra.mxu0 %v7888_v43  ;;  %3664 = vmatpush1.bf16.msra.mxu1 %v7891_v44  ;;  %v7952_v43 = vld [vmem:[#allocation8 + $0x168] ss:$28 sps:$4 sm:$0xff]   ;;  %v7955_v44 = vld [vmem:[#allocation8 + $0x19c] ss:$28 sps:$4 sm:$0xff]  }
 0x27e   :  { %3501 = vmatprep.subr.bf16.mxu0 %v7896_v45  ;;  %3665 = vmatprep.subr.bf16.mxu1 %v7899_v56  ;;  %v7956_v45 = vld [vmem:[#allocation8 + $0x360] ss:$28 sps:$4 sm:$0xff]   ;;  %v7953_v56 = vld [vmem:[#allocation8 + $0x198] ss:$28 sps:$4 sm:$0xff]  }
 0x281   :  { %3502 = vmatpush1.bf16.msra.mxu0 %v7894_v49  ;;  %3666 = vmatpush1.bf16.msra.mxu1 %v7897_v50  ;;  %v7957_v49 = vld [vmem:[#allocation8 + $0x1a0] ss:$28 sps:$4 sm:$0xff]   ;;  %v7960_v50 = vld [vmem:[#allocation8 + $0x1d4] ss:$28 sps:$4 sm:$0xff]  }
 0x282   :  { %3503 = vmatprep.subr.bf16.mxu0 %v7902_v5  ;;  %3667 = vmatprep.subr.bf16.mxu1 %v7905_v53  ;;  %v7961_v5 = vld [vmem:[#allocation8 + $0x558] ss:$28 sps:$4 sm:$0xff]   ;;  %v7958_v53 = vld [vmem:[#allocation8 + $0x1d0] ss:$28 sps:$4 sm:$0xff]  }
 0x285   :  { %3504 = vmatpush1.bf16.msra.mxu0 %v7900_v60  ;;  %3668 = vmatpush1.bf16.msra.mxu1 %v7903_v61  ;;  %v7965_v60 = vld [vmem:[#allocation8 + $0x20c] ss:$28 sps:$4 sm:$0xff]  }
 0x286   :  { %3505 = vmatprep.subr.bf16.mxu0 %v7908_v1  ;;  %3669 = vmatprep.subr.bf16.mxu1 %v7911_v2  ;;  %v7966_v61 = vld [vmem:[#allocation8 + $0x590] ss:$28 sps:$4 sm:$0xff]   ;;  %v7970_v2 = vld [vmem:[#allocation8 + $0x244] ss:$28 sps:$4 sm:$0xff]  }
 0x287   :  { %v7967_v1 = vld [vmem:[#allocation8 + $0x3d0] ss:$28 sps:$4 sm:$0xff]  }
 0x289   :  { %3506 = vmatpush1.bf16.msra.mxu0 %v7906_v3  ;;  %3670 = vmatpush1.bf16.msra.mxu1 %v7909_v4  ;;  %v7971_v3 = vld [vmem:[#allocation8 + $0x5c8] ss:$28 sps:$4 sm:$0xff]   ;;  %v7968_v4 = vld [vmem:[#allocation8 + $0x240] ss:$28 sps:$4 sm:$0xff]  }
 0x28a   :  { %3507 = vmatprep.subr.bf16.mxu0 %v7914_v7  ;;  %3671 = vmatprep.subr.bf16.mxu1 %v7917_v8  ;;  %v7975_v7 = vld [vmem:[#allocation8 + $0x27c] ss:$28 sps:$4 sm:$0xff]  }
 0x28b   :  { %v7976_v8 = vld [vmem:[#allocation8 + $0x600] ss:$28 sps:$4 sm:$0xff]  }
 0x28d   :  { %3508 = vmatpush1.bf16.msra.mxu0 %v7912_v23  ;;  %3672 = vmatpush1.bf16.msra.mxu1 %v7915_v9  ;;  %v7973_v23 = vld [vmem:[#allocation8 + $0x278] ss:$28 sps:$4 sm:$0xff]   ;;  %v7977_v9 = vld [vmem:[#allocation8 + $0x440] ss:$28 sps:$4 sm:$0xff]  }
 0x28e   :  { %3682 = vmatprep.subr.bf16.mxu0 %v7920_v10  ;;  %7292 = vmatprep.subr.bf16.mxu1 %v7921_v11  ;;  %v7980_v10 = vld [vmem:[#allocation8 + $0x2b4] ss:$28 sps:$4 sm:$0xff]  }
 0x28f   :  { %v7981_v11 = vld [vmem:[#allocation8 + $0x638] ss:$28 sps:$4 sm:$0xff]  }
 0x290   :  { %3510 = vmatmul.mubr.bf16.vlgmr.msra.gmra.mrb[8].mxu0 %v9307_v63  ;;  %3674 = vmatmul.mubr.bf16.vlgmr.msra.gmra.mrb[8].mxu1 %v9307_v63 }
 0x291   :  { %3683 = vmatpush1.bf16.msra.mxu0 %v7918_v29  ;;  %3714 = vmatprep.mubr.bf16.mxu0 %v9245_v51  ;;  %v7978_v29 = vld [vmem:[#allocation8 + $0x2b0] ss:$28 sps:$4 sm:$0xff]  }
 0x292   :  { %7293 = vmatpush3.bf16.msra.mxu1 %v7922_v12  ;;  %3878 = vmatprep.mubr.bf16.mxu1 %v9245_v51  ;;  %v7941_v51 = vld [vmem:[#allocation8 + $0x2b8] ss:$28 sps:$4 sm:$0xff]  }
 0x293   :  { %3684 = vmatprep.subr.bf16.mxu0 %v7925_v38  ;;  %7294 = vmatprep.subr.bf16.mxu1 %v7926_v13  ;;  %v7982_v12 = vld [vmem:[#allocation8 + $0x478] ss:$28 sps:$4 sm:$0xff]   ;;  %v7985_v38 = vld [vmem:[#allocation8 + $0x2ec] ss:$28 sps:$4 sm:$0xff]  }
 0x294   :  { %v7986_v13 = vld [vmem:[#allocation8 + $0x670] ss:$28 sps:$4 sm:$0xff]  }
 0x295   :  { %3685 = vmatpush1.bf16.msra.mxu0 %v7923_v14  ;;  %v7983_v14 = vld [vmem:[#allocation8 + $0x2e8] ss:$28 sps:$4 sm:$0xff]  }
 0x296   :  { %7295 = vmatpush3.bf16.msra.mxu1 %v7927_v15  ;;  %3686 = vmatprep.subr.bf16.mxu0 %v7930_v57  ;;  %v7987_v15 = vld [vmem:[#allocation8 + $0x4b0] ss:$28 sps:$4 sm:$0xff]   ;;  %v7990_v57 = vld [vmem:[#allocation8 + $0x324] ss:$28 sps:$4 sm:$0xff]  }
 0x297   :  { %7296 = vmatprep.subr.bf16.mxu1 %v7931_v18  ;;  %v7991_v18 = vld [vmem:[#allocation8 + $0x6a8] ss:$28 sps:$4 sm:$0xff]  }
 0x299   :  { %3687 = vmatpush1.bf16.msra.mxu0 %v7928_v19  ;;  %v7988_v19 = vld [vmem:[#allocation8 + $0x320] ss:$28 sps:$4 sm:$0xff]  }
 0x29a   :  { %7297 = vmatpush3.bf16.msra.mxu1 %v7932_v20  ;;  %3688 = vmatprep.subr.bf16.mxu0 %v7935_v22  ;;  %v7992_v20 = vld [vmem:[#allocation8 + $0x4e8] ss:$28 sps:$4 sm:$0xff]   ;;  %v7995_v22 = vld [vmem:[#allocation8 + $0x35c] ss:$28 sps:$4 sm:$0xff]  }
 0x29b   :  { %7298 = vmatprep.subr.bf16.mxu1 %v7936_v24  ;;  %v7996_v24 = vld [vmem:[#allocation8 + $0x6e0] ss:$28 sps:$4 sm:$0xff]  }
 0x29d   :  { %3689 = vmatpush1.bf16.msra.mxu0 %v7933_v25  ;;  %v7993_v25 = vld [vmem:[#allocation8 + $0x358] ss:$28 sps:$4 sm:$0xff]  }
 0x29e   :  { %7299 = vmatpush3.bf16.msra.mxu1 %v7937_v26  ;;  %3690 = vmatprep.subr.bf16.mxu0 %v7940_v32  ;;  %v7997_v26 = vld [vmem:[#allocation8 + $0x520] ss:$28 sps:$4 sm:$0xff]   ;;  %v8000_v32 = vld [vmem:[#allocation8 + $0x394] ss:$28 sps:$4 sm:$0xff]  }
 0x29f   :  { %7300 = vmatprep.subr.bf16.mxu1 %v7941_v51  ;;  %v8001_v51 = vld [vmem:[#allocation8 + $0x8d8] ss:$28 sps:$4 sm:$0xff]  }
 0x2a1   :  { %3691 = vmatpush1.bf16.msra.mxu0 %v7938_v33  ;;  %v7998_v33 = vld [vmem:[#allocation8 + $0x390] ss:$28 sps:$4 sm:$0xff]  }
 0x2a2   :  { %7301 = vmatpush3.bf16.msra.mxu1 %v7942_v34  ;;  %3692 = vmatprep.subr.bf16.mxu0 %v7945_v35  ;;  %v8002_v34 = vld [vmem:[#allocation8 + $0x718] ss:$28 sps:$4 sm:$0xff]   ;;  %v8005_v35 = vld [vmem:[#allocation8 + $0x3cc] ss:$28 sps:$4 sm:$0xff]  }
 0x2a3   :  { %7302 = vmatprep.subr.bf16.mxu1 %v7946_v36  ;;  %v8006_v36 = vld [vmem:[#allocation8 + $0x910] ss:$28 sps:$4 sm:$0xff]  }
 0x2a5   :  { %3693 = vmatpush1.bf16.msra.mxu0 %v7943_v37  ;;  %v8003_v37 = vld [vmem:[#allocation8 + $0x3c8] ss:$28 sps:$4 sm:$0xff]  }
 0x2a6   :  { %7303 = vmatpush3.bf16.msra.mxu1 %v7947_v39  ;;  %3694 = vmatprep.subr.bf16.mxu0 %v7950_v40  ;;  %v8007_v39 = vld [vmem:[#allocation8 + $0x750] ss:$28 sps:$4 sm:$0xff]   ;;  %v8010_v40 = vld [vmem:[#allocation8 + $0x404] ss:$28 sps:$4 sm:$0xff]  }
 0x2a7   :  { %7304 = vmatprep.subr.bf16.mxu1 %v7951_v41  ;;  %v8011_v41 = vld [vmem:[#allocation8 + $0x948] ss:$28 sps:$4 sm:$0xff]  }
 0x2a9   :  { %3695 = vmatpush1.bf16.msra.mxu0 %v7948_v42  ;;  %v8008_v42 = vld [vmem:[#allocation8 + $0x400] ss:$28 sps:$4 sm:$0xff]  }
 0x2aa   :  { %7305 = vmatpush3.bf16.msra.mxu1 %v7952_v43  ;;  %3696 = vmatprep.subr.bf16.mxu0 %v7955_v44  ;;  %v8015_v43 = vld [vmem:[#allocation8 + $0x43c] ss:$28 sps:$4 sm:$0xff]  }
 0x2ab   :  { %7306 = vmatprep.subr.bf16.mxu1 %v7956_v45  ;;  %v8016_v44 = vld [vmem:[#allocation8 + $0x980] ss:$28 sps:$4 sm:$0xff]   ;;  %v8013_v45 = vld [vmem:[#allocation8 + $0x438] ss:$28 sps:$4 sm:$0xff]  }
 0x2ad   :  { %3697 = vmatpush1.bf16.msra.mxu0 %v7953_v56  ;;  %v8020_v56 = vld [vmem:[#allocation8 + $0x474] ss:$28 sps:$4 sm:$0xff]  }
 0x2ae   :  { %7307 = vmatpush3.bf16.msra.mxu1 %v7957_v49  ;;  %3698 = vmatprep.subr.bf16.mxu0 %v7960_v50  ;;  %v8021_v49 = vld [vmem:[#allocation8 + $0x9b8] ss:$28 sps:$4 sm:$0xff]   ;;  %v8018_v50 = vld [vmem:[#allocation8 + $0x470] ss:$28 sps:$4 sm:$0xff]  }
 0x2af   :  { %7314 = vmatprep.subr.bf16.mxu1 %v7961_v5  ;;  %v8022_v5 = vld [vmem:[#allocation8 + $0x7f8] ss:$28 sps:$4 sm:$0xff]  }
 0x2b1   :  { %3879 = vmatmul.mubr.bf16.vlgmr.msra.gmra.mrb[12].mxu1 %v9247_v52  ;;  %3699 = vmatpush1.bf16.msra.mxu0 %v7958_v53  ;;  %v8025_v53 = vld [vmem:[#allocation8 + $0x4ac] ss:$28 sps:$4 sm:$0xff]  }
 0x2b2   :  { %7315 = vmatpush3.bf16.msra.mxu1 %v7962_v59  ;;  %3918 = vmatprep.mubr.bf16.mxu1 %v9251_v55  ;;  %v8026_v59 = vld [vmem:[#allocation8 + $0x9f0] ss:$28 sps:$4 sm:$0xff]  }
 0x2b3   :  { %3700 = vmatprep.subr.bf16.mxu0 %v7965_v60  ;;  %7316 = vmatprep.subr.bf16.mxu1 %v7966_v61  ;;  %v8023_v60 = vld [vmem:[#allocation8 + $0x4a8] ss:$28 sps:$4 sm:$0xff]   ;;  %v8027_v61 = vld [vmem:[#allocation8 + $0x830] ss:$28 sps:$4 sm:$0xff]  }
 0x2b5   :  { %3701 = vmatpush1.bf16.msra.mxu0 %v7963_v62  ;;  %v8030_v62 = vld [vmem:[#allocation8 + $0x4e4] ss:$28 sps:$4 sm:$0xff]  }
 0x2b6   :  { %7317 = vmatpush3.bf16.msra.mxu1 %v7967_v1  ;;  %3702 = vmatprep.subr.bf16.mxu0 %v7970_v2  ;;  %v8031_v1 = vld [vmem:[#allocation8 + $0xa28] ss:$28 sps:$4 sm:$0xff]   ;;  %v8028_v2 = vld [vmem:[#allocation8 + $0x4e0] ss:$28 sps:$4 sm:$0xff]  }
 0x2b7   :  { %7318 = vmatprep.subr.bf16.mxu1 %v7971_v3  ;;  %v8032_v3 = vld [vmem:[#allocation8 + $0x868] ss:$28 sps:$4 sm:$0xff]  }
 0x2b9   :  { %3703 = vmatpush1.bf16.msra.mxu0 %v7968_v4  ;;  %v8035_v4 = vld [vmem:[#allocation8 + $0x51c] ss:$28 sps:$4 sm:$0xff]  }
 0x2ba   :  { %7319 = vmatpush3.bf16.msra.mxu1 %v7972_v6  ;;  %3704 = vmatprep.subr.bf16.mxu0 %v7975_v7  ;;  %v8036_v6 = vld [vmem:[#allocation8 + $0xa60] ss:$28 sps:$4 sm:$0xff]   ;;  %v8033_v7 = vld [vmem:[#allocation8 + $0x518] ss:$28 sps:$4 sm:$0xff]  }
 0x2bb   :  { %7320 = vmatprep.subr.bf16.mxu1 %v7976_v8  ;;  %v8037_v8 = vld [vmem:[#allocation8 + $0x8a0] ss:$28 sps:$4 sm:$0xff]  }
 0x2bd   :  { %3705 = vmatpush1.bf16.msra.mxu0 %v7973_v23  ;;  %v8040_v23 = vld [vmem:[#allocation8 + $0x554] ss:$28 sps:$4 sm:$0xff]  }
 0x2be   :  { %7321 = vmatpush3.bf16.msra.mxu1 %v7977_v9  ;;  %3706 = vmatprep.subr.bf16.mxu0 %v7980_v10  ;;  %v8041_v9 = vld [vmem:[#allocation8 + $0xc58] ss:$28 sps:$4 sm:$0xff]   ;;  %v8038_v10 = vld [vmem:[#allocation8 + $0x550] ss:$28 sps:$4 sm:$0xff]  }
 0x2bf   :  { %7322 = vmatprep.subr.bf16.mxu1 %v7981_v11  ;;  %v8042_v11 = vld [vmem:[#allocation8 + $0xa98] ss:$28 sps:$4 sm:$0xff]  }
 0x2c1   :  { %3707 = vmatpush1.bf16.msra.mxu0 %v7978_v29  ;;  %v8045_v29 = vld [vmem:[#allocation8 + $0x58c] ss:$28 sps:$4 sm:$0xff]  }
 0x2c2   :  { %7323 = vmatpush3.bf16.msra.mxu1 %v7982_v12  ;;  %3708 = vmatprep.subr.bf16.mxu0 %v7985_v38  ;;  %v8046_v12 = vld [vmem:[#allocation8 + $0xc90] ss:$28 sps:$4 sm:$0xff]   ;;  %v8043_v38 = vld [vmem:[#allocation8 + $0x588] ss:$28 sps:$4 sm:$0xff]  }
 0x2c3   :  { %7324 = vmatprep.subr.bf16.mxu1 %v7986_v13  ;;  %v8047_v13 = vld [vmem:[#allocation8 + $0xad0] ss:$28 sps:$4 sm:$0xff]  }
 0x2c5   :  { %3709 = vmatpush1.bf16.msra.mxu0 %v7983_v14  ;;  %v8050_v14 = vld [vmem:[#allocation8 + $0x5c4] ss:$28 sps:$4 sm:$0xff]  }
 0x2c6   :  { %7325 = vmatpush3.bf16.msra.mxu1 %v7987_v15  ;;  %3710 = vmatprep.subr.bf16.mxu0 %v7990_v57  ;;  %v8051_v15 = vld [vmem:[#allocation8 + $0xcc8] ss:$28 sps:$4 sm:$0xff]   ;;  %v8048_v57 = vld [vmem:[#allocation8 + $0x5c0] ss:$28 sps:$4 sm:$0xff]  }
 0x2c7   :  { %7326 = vmatprep.subr.bf16.mxu1 %v7991_v18  ;;  %v8052_v18 = vld [vmem:[#allocation8 + $0xb08] ss:$28 sps:$4 sm:$0xff]  }
 0x2c9   :  { %3711 = vmatpush1.bf16.msra.mxu0 %v7988_v19  ;;  %v8055_v19 = vld [vmem:[#allocation8 + $0x5fc] ss:$28 sps:$4 sm:$0xff]  }
 0x2ca   :  { %7327 = vmatpush3.bf16.msra.mxu1 %v7992_v20  ;;  %3712 = vmatprep.subr.bf16.mxu0 %v7995_v22  ;;  %v8056_v20 = vld [vmem:[#allocation8 + $0xd00] ss:$28 sps:$4 sm:$0xff]   ;;  %v8053_v22 = vld [vmem:[#allocation8 + $0x5f8] ss:$28 sps:$4 sm:$0xff]  }
 0x2cb   :  { %7328 = vmatprep.subr.bf16.mxu1 %v7996_v24  ;;  %v8057_v24 = vld [vmem:[#allocation8 + $0xb40] ss:$28 sps:$4 sm:$0xff]  }
 0x2cd   :  { %3713 = vmatpush1.bf16.msra.mxu0 %v7993_v25  ;;  %v8060_v25 = vld [vmem:[#allocation8 + $0x634] ss:$28 sps:$4 sm:$0xff]  }
 0x2ce   :  { %7329 = vmatpush3.bf16.msra.mxu1 %v7997_v26  ;;  %3723 = vmatprep.subr.bf16.mxu0 %v8000_v32  ;;  %v8061_v26 = vld [vmem:[#allocation8 + $0xd38] ss:$28 sps:$4 sm:$0xff]   ;;  %v8058_v32 = vld [vmem:[#allocation8 + $0x630] ss:$28 sps:$4 sm:$0xff]  }
 0x2cf   :  { %7336 = vmatprep.subr.bf16.mxu1 %v8001_v51  ;;  %v8062_v51 = vld [vmem:[#allocation8 + $0xb78] ss:$28 sps:$4 sm:$0xff]  }
 0x2d0   :  { %3715 = vmatmul.mubr.bf16.vlgmr.msra.gmra.mrb[12].mxu0 %v9247_v52  ;;  %v8012_v52 = vld [vmem:[#allocation8 + $0x788] ss:$28 sps:$4 sm:$0xff]  }
 0x2d1   :  { %3919 = vmatmul.mubr.bf16.vlgmr.msra.gmra.mrb[16].mxu1 %v9276_v17  ;;  %3724 = vmatpush1.bf16.msra.mxu0 %v7998_v33  ;;  %v8065_v33 = vld [vmem:[#allocation8 + $0x66c] ss:$28 sps:$4 sm:$0xff]  }
 0x2d2   :  { %3755 = vmatprep.mubr.bf16.mxu0 %v9251_v55  ;;  %7337 = vmatpush3.bf16.msra.mxu1 %v8002_v34  ;;  %v8017_v55 = vld [vmem:[#allocation8 + $0x7c0] ss:$28 sps:$4 sm:$0xff]   ;;  %v8066_v34 = vld [vmem:[#allocation8 + $0xd70] ss:$28 sps:$4 sm:$0xff]  }
 0x2d3   :  { %3958 = vmatprep.mubr.bf16.mxu1 %v9278_v21  ;;  %3725 = vmatprep.subr.bf16.mxu0 %v8005_v35  ;;  %v8063_v35 = vld [vmem:[#allocation8 + $0x668] ss:$28 sps:$4 sm:$0xff]  }
 0x2d4   :  { %7338 = vmatprep.subr.bf16.mxu1 %v8006_v36  ;;  %v8067_v36 = vld [vmem:[#allocation8 + $0xbb0] ss:$28 sps:$4 sm:$0xff]  }
 0x2d5   :  { %3726 = vmatpush1.bf16.msra.mxu0 %v8003_v37  ;;  %v8070_v37 = vld [vmem:[#allocation8 + $0x6a4] ss:$28 sps:$4 sm:$0xff]  }
 0x2d6   :  { %7339 = vmatpush3.bf16.msra.mxu1 %v8007_v39  ;;  %3727 = vmatprep.subr.bf16.mxu0 %v8010_v40  ;;  %v8071_v39 = vld [vmem:[#allocation8 + $0xda8] ss:$28 sps:$4 sm:$0xff]   ;;  %v8068_v40 = vld [vmem:[#allocation8 + $0x6a0] ss:$28 sps:$4 sm:$0xff]  }
 0x2d7   :  { %7340 = vmatprep.subr.bf16.mxu1 %v8011_v41  ;;  %v8072_v41 = vld [vmem:[#allocation8 + $0xbe8] ss:$28 sps:$4 sm:$0xff]  }
 0x2d9   :  { %3728 = vmatpush1.bf16.msra.mxu0 %v8008_v42  ;;  %v8075_v42 = vld [vmem:[#allocation8 + $0x6dc] ss:$28 sps:$4 sm:$0xff]  }
 0x2da   :  { %7341 = vmatpush3.bf16.msra.mxu1 %v8012_v52  ;;  %3729 = vmatprep.subr.bf16.mxu0 %v8015_v43  ;;  %v8076_v52 = vld [vmem:[#allocation8 + $0xde0] ss:$28 sps:$4 sm:$0xff]   ;;  %v8073_v43 = vld [vmem:[#allocation8 + $0x6d8] ss:$28 sps:$4 sm:$0xff]  }
 0x2db   :  { %7342 = vmatprep.subr.bf16.mxu1 %v8016_v44  ;;  %v8077_v44 = vld [vmem:[#allocation8 + $0xc20] ss:$28 sps:$4 sm:$0xff]  }
 0x2dd   :  { %3730 = vmatpush1.bf16.msra.mxu0 %v8013_v45  ;;  %v8080_v45 = vld [vmem:[#allocation8 + $0x714] ss:$28 sps:$4 sm:$0xff]  }
 0x2de   :  { %7343 = vmatpush3.bf16.msra.mxu1 %v8017_v55  ;;  %3731 = vmatprep.subr.bf16.mxu0 %v8020_v56  ;;  %v8101_v55 = vld [vmem:[#allocation11 + $0x4] ss:$16 sps:$4 sm:$0xff]  }
 0x2df   :  { %7344 = vmatprep.subr.bf16.mxu1 %v8021_v49  ;;  %v8078_v56 = vld [vmem:[#allocation8 + $0x710] ss:$28 sps:$4 sm:$0xff]  }
 0x2e0   :  { %v8083_v49 = vld [vmem:[#allocation8 + $0x74c] ss:$28 sps:$4 sm:$0xff]  }
 0x2e1   :  { %3732 = vmatpush1.bf16.msra.mxu0 %v8018_v50  ;;  %v8099_v50 = vld [vmem:[#allocation11] ss:$16 sps:$4 sm:$0xff]  }
 0x2e2   :  { %7345 = vmatpush3.bf16.msra.mxu1 %v8022_v5  ;;  %3733 = vmatprep.subr.bf16.mxu0 %v8025_v53  ;;  %v8107_v5 = vld [vmem:[#allocation11 + $0x24] ss:$16 sps:$4 sm:$0xff]   ;;  %v8081_v53 = vld [vmem:[#allocation8 + $0x748] ss:$28 sps:$4 sm:$0xff]  }
 0x2e3   :  { %7346 = vmatprep.subr.bf16.mxu1 %v8026_v59  ;;  %v8086_v59 = vld [vmem:[#allocation8 + $0x784] ss:$28 sps:$4 sm:$0xff]  }
 0x2e5   :  { %3734 = vmatpush1.bf16.msra.mxu0 %v8023_v60  ;;  %v8105_v60 = vld [vmem:[#allocation11 + $0x20] ss:$16 sps:$4 sm:$0xff]  }
 0x2e6   :  { %7347 = vmatpush3.bf16.msra.mxu1 %v8027_v61  ;;  %3735 = vmatprep.subr.bf16.mxu0 %v8030_v62  ;;  %v8113_v61 = vld [vmem:[#allocation11 + $0x44] ss:$16 sps:$4 sm:$0xff]  }
 0x2e7   :  { %7348 = vmatprep.subr.bf16.mxu1 %v8031_v1  ;;  %v8084_v62 = vld [vmem:[#allocation8 + $0x780] ss:$28 sps:$4 sm:$0xff]  }
 0x2e8   :  { %v8089_v1 = vld [vmem:[#allocation8 + $0x7bc] ss:$28 sps:$4 sm:$0xff]  }
 0x2e9   :  { %3736 = vmatpush1.bf16.msra.mxu0 %v8028_v2  ;;  %v8111_v2 = vld [vmem:[#allocation11 + $0x40] ss:$16 sps:$4 sm:$0xff]  }
 0x2ea   :  { %7349 = vmatpush3.bf16.msra.mxu1 %v8032_v3  ;;  %3737 = vmatprep.subr.bf16.mxu0 %v8035_v4  ;;  %v8087_v3 = vld [vmem:[#allocation8 + $0x7b8] ss:$28 sps:$4 sm:$0xff]  }
 0x2eb   :  { %7350 = vmatprep.subr.bf16.mxu1 %v8036_v6  ;;  %v8092_v4 = vld [vmem:[#allocation8 + $0x7f4] ss:$28 sps:$4 sm:$0xff]   ;;  %v8125_v6 = vld [vmem:[#allocation11 + $0x84] ss:$16 sps:$4 sm:$0xff]  }
 0x2ed   :  { %3738 = vmatpush1.bf16.msra.mxu0 %v8033_v7  ;;  %v8090_v7 = vld [vmem:[#allocation8 + $0x7f0] ss:$28 sps:$4 sm:$0xff]  }
 0x2ee   :  { %7351 = vmatpush3.bf16.msra.mxu1 %v8037_v8  ;;  %3739 = vmatprep.subr.bf16.mxu0 %v8040_v23  ;;  %v8095_v8 = vld [vmem:[#allocation8 + $0x82c] ss:$28 sps:$4 sm:$0xff]  }
 0x2ef   :  { %7358 = vmatprep.subr.bf16.mxu1 %v8041_v9  ;;  %v8123_v23 = vld [vmem:[#allocation11 + $0x80] ss:$16 sps:$4 sm:$0xff]   ;;  %v8131_v9 = vld [vmem:[#allocation11 + $0xa4] ss:$16 sps:$4 sm:$0xff]  }
 0x2f1   :  { %3959 = vmatmul.mubr.bf16.vlgmr.msra.gmra.mrb[20].mxu1 %v9294_v48  ;;  %3740 = vmatpush1.bf16.msra.mxu0 %v8038_v10  ;;  %v8093_v10 = vld [vmem:[#allocation8 + $0x828] ss:$28 sps:$4 sm:$0xff]  }
 0x2f2   :  { %7359 = vmatpush3.bf16.msra.mxu1 %v8042_v11  ;;  %3998 = vmatprep.mubr.bf16.mxu1 %v9296_v58  ;;  %v8098_v11 = vld [vmem:[#allocation8 + $0x864] ss:$28 sps:$4 sm:$0xff]  }
 0x2f3   :  { %3741 = vmatprep.subr.bf16.mxu0 %v8045_v29  ;;  %7360 = vmatprep.subr.bf16.mxu1 %v8046_v12  ;;  %v8129_v29 = vld [vmem:[#allocation11 + $0xa0] ss:$16 sps:$4 sm:$0xff]   ;;  %v8137_v12 = vld [vmem:[#allocation11 + $0xc4] ss:$16 sps:$4 sm:$0xff]  }
 0x2f5   :  { %3742 = vmatpush1.bf16.msra.mxu0 %v8043_v38  ;;  %v8096_v38 = vld [vmem:[#allocation8 + $0x860] ss:$28 sps:$4 sm:$0xff]  }
 0x2f6   :  { %7361 = vmatpush3.bf16.msra.mxu1 %v8047_v13  ;;  %3743 = vmatprep.subr.bf16.mxu0 %v8050_v14  ;;  %v8104_v13 = vld [vmem:[#allocation8 + $0x89c] ss:$28 sps:$4 sm:$0xff]  }
 0x2f7   :  { %7362 = vmatprep.subr.bf16.mxu1 %v8051_v15  ;;  %v8135_v14 = vld [vmem:[#allocation11 + $0xc0] ss:$16 sps:$4 sm:$0xff]   ;;  %v8143_v15 = vld [vmem:[#allocation11 + $0xe4] ss:$16 sps:$4 sm:$0xff]  }
 0x2f9   :  { %3744 = vmatpush1.bf16.msra.mxu0 %v8048_v57  ;;  %v8102_v57 = vld [vmem:[#allocation8 + $0x898] ss:$28 sps:$4 sm:$0xff]  }
 0x2fa   :  { %7363 = vmatpush3.bf16.msra.mxu1 %v8052_v18  ;;  %3745 = vmatprep.subr.bf16.mxu0 %v8055_v19  ;;  %v8110_v18 = vld [vmem:[#allocation8 + $0x8d4] ss:$28 sps:$4 sm:$0xff]   ;;  %v8141_v19 = vld [vmem:[#allocation11 + $0xe0] ss:$16 sps:$4 sm:$0xff]  }
 0x2fb   :  { %7364 = vmatprep.subr.bf16.mxu1 %v8056_v20  ;;  %v8149_v20 = vld [vmem:[#allocation11 + $0x104] ss:$16 sps:$4 sm:$0xff]  }
 0x2fd   :  { %3746 = vmatpush1.bf16.msra.mxu0 %v8053_v22  ;;  %v8108_v22 = vld [vmem:[#allocation8 + $0x8d0] ss:$28 sps:$4 sm:$0xff]  }
 0x2fe   :  { %7365 = vmatpush3.bf16.msra.mxu1 %v8057_v24  ;;  %3747 = vmatprep.subr.bf16.mxu0 %v8060_v25  ;;  %v8116_v24 = vld [vmem:[#allocation8 + $0x90c] ss:$28 sps:$4 sm:$0xff]  }
 0x2ff   :  { %7366 = vmatprep.subr.bf16.mxu1 %v8061_v26  ;;  %v8147_v25 = vld [vmem:[#allocation11 + $0x100] ss:$16 sps:$4 sm:$0xff]   ;;  %v8155_v26 = vld [vmem:[#allocation11 + $0x124] ss:$16 sps:$4 sm:$0xff]  }
 0x301   :  { %3748 = vmatpush1.bf16.msra.mxu0 %v8058_v32  ;;  %v8114_v32 = vld [vmem:[#allocation8 + $0x908] ss:$28 sps:$4 sm:$0xff]  }
 0x302   :  { %7367 = vmatpush3.bf16.msra.mxu1 %v8062_v51  ;;  %3749 = vmatprep.subr.bf16.mxu0 %v8065_v33  ;;  %v8122_v51 = vld [vmem:[#allocation8 + $0x944] ss:$28 sps:$4 sm:$0xff]   ;;  %v8153_v33 = vld [vmem:[#allocation11 + $0x120] ss:$16 sps:$4 sm:$0xff]  }
 0x303   :  { %7368 = vmatprep.subr.bf16.mxu1 %v8066_v34  ;;  %v8161_v34 = vld [vmem:[#allocation11 + $0x144] ss:$16 sps:$4 sm:$0xff]  }
 0x305   :  { %3750 = vmatpush1.bf16.msra.mxu0 %v8063_v35  ;;  %v8120_v35 = vld [vmem:[#allocation8 + $0x940] ss:$28 sps:$4 sm:$0xff]  }
 0x306   :  { %7369 = vmatpush3.bf16.msra.mxu1 %v8067_v36  ;;  %3751 = vmatprep.subr.bf16.mxu0 %v8070_v37  ;;  %v8128_v36 = vld [vmem:[#allocation8 + $0x97c] ss:$28 sps:$4 sm:$0xff]  }
 0x307   :  { %7370 = vmatprep.subr.bf16.mxu1 %v8071_v39  ;;  %v8159_v37 = vld [vmem:[#allocation11 + $0x140] ss:$16 sps:$4 sm:$0xff]   ;;  %v8167_v39 = vld [vmem:[#allocation11 + $0x164] ss:$16 sps:$4 sm:$0xff]  }
 0x309   :  { %3752 = vmatpush1.bf16.msra.mxu0 %v8068_v40  ;;  %v8126_v40 = vld [vmem:[#allocation8 + $0x978] ss:$28 sps:$4 sm:$0xff]  }
 0x30a   :  { %7371 = vmatpush3.bf16.msra.mxu1 %v8072_v41  ;;  %3753 = vmatprep.subr.bf16.mxu0 %v8075_v42  ;;  %v8134_v41 = vld [vmem:[#allocation8 + $0x9b4] ss:$28 sps:$4 sm:$0xff]   ;;  %v8165_v42 = vld [vmem:[#allocation11 + $0x160] ss:$16 sps:$4 sm:$0xff]  }
 0x30b   :  { %7372 = vmatprep.subr.bf16.mxu1 %v8076_v52  ;;  %v8173_v52 = vld [vmem:[#allocation11 + $0x184] ss:$16 sps:$4 sm:$0xff]  }
 0x30d   :  { %3754 = vmatpush1.bf16.msra.mxu0 %v8073_v43  ;;  %v8132_v43 = vld [vmem:[#allocation8 + $0x9b0] ss:$28 sps:$4 sm:$0xff]  }
 0x30e   :  { %7373 = vmatpush3.bf16.msra.mxu1 %v8077_v44  ;;  %3764 = vmatprep.subr.bf16.mxu0 %v8080_v45  ;;  %v8140_v44 = vld [vmem:[#allocation8 + $0x9ec] ss:$28 sps:$4 sm:$0xff]  }
 0x30f   :  { %5386 = vmatprep.subr.bf16.mxu1 %v8101_v55  ;;  %v8171_v45 = vld [vmem:[#allocation11 + $0x180] ss:$16 sps:$4 sm:$0xff]   ;;  %v8179_v55 = vld [vmem:[#allocation11 + $0x1a4] ss:$16 sps:$4 sm:$0xff]  }
 0x310   :  { %3756 = vmatmul.mubr.bf16.vlgmr.msra.gmra.mrb[12].mxu0 %v9276_v17  ;;  %v8119_v17 = vld [vmem:[#allocation11 + $0x64] ss:$16 sps:$4 sm:$0xff]  }
 0x311   :  { %3999 = vmatmul.mubr.bf16.vlgmr.msra.gmra.mrb[24].mxu1 %v9307_v63  ;;  %3765 = vmatpush1.bf16.msra.mxu0 %v8078_v56  ;;  %v8138_v56 = vld [vmem:[#allocation8 + $0x9e8] ss:$28 sps:$4 sm:$0xff]  }
 0x312   :  { %3796 = vmatprep.mubr.bf16.mxu0 %v9278_v21  ;;  %3766 = vmatprep.subr.bf16.mxu0 %v8083_v49  ;;  %v8117_v21 = vld [vmem:[#allocation11 + $0x60] ss:$16 sps:$4 sm:$0xff]   ;;  %v8146_v49 = vld [vmem:[#allocation8 + $0xa24] ss:$28 sps:$4 sm:$0xff]  }
 0x313   :  { %5387 = vmatpush1.bf16.msra.mxu1 %v8099_v50  ;;  %v8177_v50 = vld [vmem:[#allocation11 + $0x1a0] ss:$16 sps:$4 sm:$0xff]  }
 0x314   :  { %5388 = vmatprep.subr.bf16.mxu1 %v8107_v5  ;;  %v8185_v5 = vld [vmem:[#allocation11 + $0x1c4] ss:$16 sps:$4 sm:$0xff]  }
 0x315   :  { %3767 = vmatpush1.bf16.msra.mxu0 %v8081_v53  ;;  %v8144_v53 = vld [vmem:[#allocation8 + $0xa20] ss:$28 sps:$4 sm:$0xff]  }
 0x316   :  { %3768 = vmatprep.subr.bf16.mxu0 %v8086_v59  ;;  %v8152_v59 = vld [vmem:[#allocation8 + $0xa5c] ss:$28 sps:$4 sm:$0xff]  }
 0x317   :  { %5389 = vmatpush1.bf16.msra.mxu1 %v8105_v60  ;;  %v8183_v60 = vld [vmem:[#allocation11 + $0x1c0] ss:$16 sps:$4 sm:$0xff]  }
 0x318   :  { %5390 = vmatprep.subr.bf16.mxu1 %v8113_v61  ;;  %v8191_v61 = vld [vmem:[#allocation11 + $0x1e4] ss:$16 sps:$4 sm:$0xff]  }
 0x319   :  { %3769 = vmatpush1.bf16.msra.mxu0 %v8084_v62  ;;  %v8150_v62 = vld [vmem:[#allocation8 + $0xa58] ss:$28 sps:$4 sm:$0xff]  }
 0x31a   :  { %3770 = vmatprep.subr.bf16.mxu0 %v8089_v1  ;;  %v8158_v1 = vld [vmem:[#allocation8 + $0xa94] ss:$28 sps:$4 sm:$0xff]  }
 0x31b   :  { %5391 = vmatpush1.bf16.msra.mxu1 %v8111_v2  ;;  %v8189_v2 = vld [vmem:[#allocation11 + $0x1e0] ss:$16 sps:$4 sm:$0xff]  }
 0x31c   :  { %5392 = vmatprep.subr.bf16.mxu1 %v8119_v17  ;;  %v8197_v17 = vld [vmem:[#allocation11 + $0x204] ss:$16 sps:$4 sm:$0xff]  }
 0x31d   :  { %3771 = vmatpush1.bf16.msra.mxu0 %v8087_v3  ;;  %v8156_v3 = vld [vmem:[#allocation8 + $0xa90] ss:$28 sps:$4 sm:$0xff]  }
 0x31e   :  { %3772 = vmatprep.subr.bf16.mxu0 %v8092_v4  ;;  %v8164_v4 = vld [vmem:[#allocation8 + $0xacc] ss:$28 sps:$4 sm:$0xff]  }
 0x31f   :  { %5393 = vmatpush1.bf16.msra.mxu1 %v8117_v21  ;;  %v8162_v21 = vld [vmem:[#allocation8 + $0xac8] ss:$28 sps:$4 sm:$0xff]  }
 0x320   :  { %5394 = vmatprep.subr.bf16.mxu1 %v8125_v6  ;;  %v8170_v6 = vld [vmem:[#allocation8 + $0xb04] ss:$28 sps:$4 sm:$0xff]  }
 0x321   :  { %3773 = vmatpush1.bf16.msra.mxu0 %v8090_v7  ;;  %v8168_v7 = vld [vmem:[#allocation8 + $0xb00] ss:$28 sps:$4 sm:$0xff]  }
 0x322   :  { %3774 = vmatprep.subr.bf16.mxu0 %v8095_v8  ;;  %v8176_v8 = vld [vmem:[#allocation8 + $0xb3c] ss:$28 sps:$4 sm:$0xff]  }
 0x323   :  { %5395 = vmatpush1.bf16.msra.mxu1 %v8123_v23  ;;  %v8174_v23 = vld [vmem:[#allocation8 + $0xb38] ss:$28 sps:$4 sm:$0xff]  }
 0x324   :  { %5396 = vmatprep.subr.bf16.mxu1 %v8131_v9  ;;  %v8182_v9 = vld [vmem:[#allocation8 + $0xb74] ss:$28 sps:$4 sm:$0xff]  }
 0x325   :  { %3775 = vmatpush1.bf16.msra.mxu0 %v8093_v10  ;;  %v8180_v10 = vld [vmem:[#allocation8 + $0xb70] ss:$28 sps:$4 sm:$0xff]  }
 0x326   :  { %3776 = vmatprep.subr.bf16.mxu0 %v8098_v11  ;;  %v9326_v11 = vld [vmem:[#allocation10] sm:$0xff] }
 0x327   :  { %5397 = vmatpush1.bf16.msra.mxu1 %v8129_v29  ;;  %v1022_v29 = vrot.slane %v9326_v11, %v9232_v30 }
 0x328   :  { %5398 = vmatprep.subr.bf16.mxu1 %v8137_v12  ;;  %v1030_v12 = vrot.slane %v9326_v11, %v9235_v31 }
 0x329   :  { %3777 = vmatpush1.bf16.msra.mxu0 %v8096_v38  ;;  %v8186_v38 = vld [vmem:[#allocation8 + $0xba8] ss:$28 sps:$4 sm:$0xff]  }
 0x32a   :  { %3778 = vmatprep.subr.bf16.mxu0 %v8104_v13  ;;  %v8194_v13 = vld [vmem:[#allocation8 + $0xbe4] ss:$28 sps:$4 sm:$0xff]  }
 0x32b   :  { %5399 = vmatpush1.bf16.msra.mxu1 %v8135_v14 }
 0x32c   :  { %5400 = vmatprep.subr.bf16.mxu1 %v8143_v15 }
 0x32d   :  { %3779 = vmatpush1.bf16.msra.mxu0 %v8102_v57 }
 0x32e   :  { %3780 = vmatprep.subr.bf16.mxu0 %v8110_v18 }
 0x32f   :  { %5401 = vmatpush1.bf16.msra.mxu1 %v8141_v19 }
 0x330   :  { %5402 = vmatprep.subr.bf16.mxu1 %v8149_v20 }
 0x331   :  { %3781 = vmatpush1.bf16.msra.mxu0 %v8108_v22 }
 0x332   :  { %3782 = vmatprep.subr.bf16.mxu0 %v8116_v24 }
 0x333   :  { %5403 = vmatpush1.bf16.msra.mxu1 %v8147_v25 }
 0x334   :  { %5404 = vmatprep.subr.bf16.mxu1 %v8155_v26  ;;  %v8192_v26 = vld [vmem:[#allocation8 + $0xbe0] ss:$28 sps:$4 sm:$0xff]  }
 0x335   :  { %3783 = vmatpush1.bf16.msra.mxu0 %v8114_v32 }
 0x336   :  { %3784 = vmatprep.subr.bf16.mxu0 %v8122_v51 }
 0x337   :  { %5405 = vmatpush1.bf16.msra.mxu1 %v8153_v33 }
 0x338   :  { %5406 = vmatprep.subr.bf16.mxu1 %v8161_v34  ;;  %v8200_v34 = vld [vmem:[#allocation8 + $0xc1c] ss:$28 sps:$4 sm:$0xff]  }
 0x339   :  { %3785 = vmatpush1.bf16.msra.mxu0 %v8120_v35 }
 0x33a   :  { %3786 = vmatprep.subr.bf16.mxu0 %v8128_v36 }
 0x33b   :  { %5407 = vmatpush1.bf16.msra.mxu1 %v8159_v37 }
 0x33c   :  { %5408 = vmatprep.subr.bf16.mxu1 %v8167_v39  ;;  %v8195_v39 = vld [vmem:[#allocation11 + $0x200] ss:$16 sps:$4 sm:$0xff]  }
 0x33d   :  { %3787 = vmatpush1.bf16.msra.mxu0 %v8126_v40  ;;  %v8198_v40 = vld [vmem:[#allocation8 + $0xc18] ss:$28 sps:$4 sm:$0xff]  }
 0x33e   :  { %3788 = vmatprep.subr.bf16.mxu0 %v8134_v41 }
 0x33f   :  { %5409 = vmatpush1.bf16.msra.mxu1 %v8165_v42  ;;  %v8203_v42 = vld [vmem:[#allocation11 + $0x224] ss:$16 sps:$4 sm:$0xff]  }
 0x340   :  { %5410 = vmatprep.subr.bf16.mxu1 %v8173_v52  ;;  %v8206_v52 = vld [vmem:[#allocation8 + $0xc54] ss:$28 sps:$4 sm:$0xff]  }
 0x341   :  { %3789 = vmatpush1.bf16.msra.mxu0 %v8132_v43 }
 0x342   :  { %3790 = vmatprep.subr.bf16.mxu0 %v8140_v44  ;;  %v8201_v44 = vld [vmem:[#allocation11 + $0x220] ss:$16 sps:$4 sm:$0xff]  }
 0x343   :  { %5411 = vmatpush1.bf16.msra.mxu1 %v8171_v45  ;;  %v8204_v45 = vld [vmem:[#allocation8 + $0xc50] ss:$28 sps:$4 sm:$0xff]  }
 0x344   :  { %5412 = vmatprep.subr.bf16.mxu1 %v8179_v55  ;;  %v8209_v55 = vld [vmem:[#allocation11 + $0x244] ss:$16 sps:$4 sm:$0xff]  }
 0x345   :  { %3791 = vmatpush1.bf16.msra.mxu0 %v8138_v56  ;;  %v8212_v56 = vld [vmem:[#allocation8 + $0xc8c] ss:$28 sps:$4 sm:$0xff]  }
 0x346   :  { %3792 = vmatprep.subr.bf16.mxu0 %v8146_v49  ;;  %v8207_v49 = vld [vmem:[#allocation11 + $0x240] ss:$16 sps:$4 sm:$0xff]  }
 0x347   :  { %5413 = vmatpush1.bf16.msra.mxu1 %v8177_v50  ;;  %v8210_v50 = vld [vmem:[#allocation8 + $0xc88] ss:$28 sps:$4 sm:$0xff]  }
 0x348   :  { %5414 = vmatprep.subr.bf16.mxu1 %v8185_v5  ;;  %v8215_v5 = vld [vmem:[#allocation11 + $0x264] ss:$16 sps:$4 sm:$0xff]  }
 0x349   :  { %3793 = vmatpush1.bf16.msra.mxu0 %v8144_v53  ;;  %v8218_v53 = vld [vmem:[#allocation8 + $0xcc4] ss:$28 sps:$4 sm:$0xff]  }
 0x34a   :  { %3794 = vmatprep.subr.bf16.mxu0 %v8152_v59  ;;  %v8213_v59 = vld [vmem:[#allocation11 + $0x260] ss:$16 sps:$4 sm:$0xff]  }
 0x34b   :  { %5415 = vmatpush1.bf16.msra.mxu1 %v8183_v60  ;;  %v8216_v60 = vld [vmem:[#allocation8 + $0xcc0] ss:$28 sps:$4 sm:$0xff]  }
 0x34c   :  { %5416 = vmatprep.subr.bf16.mxu1 %v8191_v61  ;;  %v8221_v61 = vld [vmem:[#allocation11 + $0x284] ss:$16 sps:$4 sm:$0xff]  }
 0x34d   :  { %3795 = vmatpush1.bf16.msra.mxu0 %v8150_v62  ;;  %v8224_v62 = vld [vmem:[#allocation8 + $0xcfc] ss:$28 sps:$4 sm:$0xff]  }
 0x34e   :  { %3805 = vmatprep.subr.bf16.mxu0 %v8158_v1  ;;  %v8219_v1 = vld [vmem:[#allocation11 + $0x280] ss:$16 sps:$4 sm:$0xff]  }
 0x34f   :  { %5417 = vmatpush1.bf16.msra.mxu1 %v8189_v2  ;;  %v8222_v2 = vld [vmem:[#allocation8 + $0xcf8] ss:$28 sps:$4 sm:$0xff]  }
 0x350   :  { %3797 = vmatmul.mubr.bf16.vlgmr.msra.gmra.mrb[12].mxu0 %v9294_v48  ;;  %5427 = vmatprep.subr.bf16.mxu1 %v8197_v17  ;;  %v8188_v48 = vld [vmem:[#allocation8 + $0xbac] ss:$28 sps:$4 sm:$0xff]  }
 0x351   :  { %3806 = vmatpush1.bf16.msra.mxu0 %v8156_v3  ;;  %3837 = vmatprep.mubr.bf16.mxu0 %v9296_v58  ;;  %v1018_v58 = vrot.slane %v9326_v11, %v9227_v28  ;;  %v8227_v17 = vld [vmem:[#allocation11 + $0x2a4] ss:$16 sps:$4 sm:$0xff]   ;;  %v8230_v3 = vld [vmem:[#allocation8 + $0xd34] ss:$28 sps:$4 sm:$0xff]  }
 0x352   :  { %3807 = vmatprep.subr.bf16.mxu0 %v8164_v4  ;;  %v8225_v4 = vld [vmem:[#allocation11 + $0x2a0] ss:$16 sps:$4 sm:$0xff]  }
 0x355   :  { %3808 = vmatpush1.bf16.msra.mxu0 %v8162_v21  ;;  %v8228_v21 = vld [vmem:[#allocation8 + $0xd30] ss:$28 sps:$4 sm:$0xff]  }
 0x356   :  { %3809 = vmatprep.subr.bf16.mxu0 %v8170_v6  ;;  %v8233_v6 = vld [vmem:[#allocation11 + $0x2c4] ss:$16 sps:$4 sm:$0xff]  }
 0x359   :  { %3810 = vmatpush1.bf16.msra.mxu0 %v8168_v7  ;;  %v8236_v7 = vld [vmem:[#allocation8 + $0xd6c] ss:$28 sps:$4 sm:$0xff]  }
 0x35a   :  { %3811 = vmatprep.subr.bf16.mxu0 %v8176_v8  ;;  %v8231_v8 = vld [vmem:[#allocation11 + $0x2c0] ss:$16 sps:$4 sm:$0xff]  }
 0x35d   :  { %3812 = vmatpush1.bf16.msra.mxu0 %v8174_v23  ;;  %v8234_v23 = vld [vmem:[#allocation8 + $0xd68] ss:$28 sps:$4 sm:$0xff]  }
 0x35e   :  { %3813 = vmatprep.subr.bf16.mxu0 %v8182_v9  ;;  %v8239_v9 = vld [vmem:[#allocation11 + $0x2e4] ss:$16 sps:$4 sm:$0xff]  }
 0x361   :  { %3814 = vmatpush1.bf16.msra.mxu0 %v8180_v10  ;;  %v8242_v10 = vld [vmem:[#allocation8 + $0xda4] ss:$28 sps:$4 sm:$0xff]  }
 0x362   :  { %3815 = vmatprep.subr.bf16.mxu0 %v8188_v48 }
 0x363   :  { %v3511_v14 = vpop.f32.mrb[8].mxu0  ;;  %v9334_v15 = vpop.f32.mrb[8].mxu1 }
 0x364   :  { %v7431_v57 = vadd.f32 %v3511_v14, %v1018_v58  ;;  %v3513_v18 = vpop.f32.mrb[9].mxu0  ;;  %v3677_v19 = vpop.f32.mrb[9].mxu1  ;;  %v8245_v14 = vld [vmem:[#allocation11 + $0x304] ss:$16 sps:$4 sm:$0xff]  }
 0x365   :  { %v7432_v20 = vadd.f32 %v3513_v18, %v1022_v29  ;;  %v7434_v22 = vadd.f32 %v3677_v19, %v1030_v12  ;;  %v3515_v24 = vpop.f32.mrb[10].mxu0  ;;  %v3679_v25 = vpop.f32.mrb[10].mxu1  ;;  %3816 = vmatpush1.bf16.msra.mxu0 %v8186_v38  ;;  %v8237_v29 = vld [vmem:[#allocation11 + $0x2e0] ss:$16 sps:$4 sm:$0xff]   ;;  %v8240_v12 = vld [vmem:[#allocation8 + $0xda0] ss:$28 sps:$4 sm:$0xff]  }
 0x366   :  { %v4006_v32 = vmax.f32 %v7431_v57, 0.0  ;;  %v3516_v51 = vpop.f32.mrb[11].mxu0  ;;  %v3680_v33 = vpop.f32.mrb[11].mxu1  ;;  %3817 = vmatprep.subr.bf16.mxu0 %v8194_v13  ;;  %v8248_v57 = vld [vmem:[#allocation8 + $0xddc] ss:$28 sps:$4 sm:$0xff]  }
 0x367   :  { %v4007_v35 = vmax.f32 %v7432_v20, 0.0  ;;  %v4009_v36 = vmax.f32 %v7434_v22, 0.0  ;;  %v8243_v19 = vld [vmem:[#allocation11 + $0x300] ss:$16 sps:$4 sm:$0xff]   ;;  %v8251_v22 = vld [vmem:[#allocation11 + $0x324] ss:$16 sps:$4 sm:$0xff]  }
 0x368   :  { %v9338_v41 = vpack.c.bf16 %v4006_v32, %v4006_v32  ;;  %v8246_v20 = vld [vmem:[#allocation8 + $0xdd8] ss:$28 sps:$4 sm:$0xff]   ;;  %v8257_v32 = vld [vmem:[#allocation11 + $0x344] ss:$16 sps:$4 sm:$0xff]  }
 0x369   :  { %v9336_v37 = vpack.c.bf16 %v4007_v35, %v4007_v35  ;;  %3818 = vmatpush1.bf16.msra.mxu0 %v8192_v26  ;;  %v9341_v43 = vpack.c.bf16 %v4009_v36, %v4009_v36  ;;  %v8254_v24 = vld [vmem:[#allocation11 + $0xc] ss:$16 sps:$4 sm:$0xff]   ;;  %v8249_v25 = vld [vmem:[#allocation11 + $0x320] ss:$16 sps:$4 sm:$0xff]   ;;  %v8252_v26 = vld [vmem:[#allocation11 + $0x8] ss:$16 sps:$4 sm:$0xff]  }
 0x36a   :  { %3819 = vmatprep.subr.bf16.mxu0 %v8200_v34  ;;  %v8260_v51 = vld [vmem:[#allocation11 + $0x2c] ss:$16 sps:$4 sm:$0xff]   ;;  %v8255_v33 = vld [vmem:[#allocation11 + $0x340] ss:$16 sps:$4 sm:$0xff]   ;;  %v8258_v34 = vld [vmem:[#allocation11 + $0x28] ss:$16 sps:$4 sm:$0xff]  }
 0x36b   :  { %5418 = vmatprep.mubr.bf16.mxu1 %v9336_v37  ;;  %v8263_v35 = vld [vmem:[#allocation11 + $0x364] ss:$16 sps:$4 sm:$0xff]   ;;  %v8266_v36 = vld [vmem:[#allocation11 + $0x4c] ss:$16 sps:$4 sm:$0xff]  }
 0x36c   :  { %5419 = vmatmul.mubr.bf16.vlgmr.msra.gmra.mrb[28].mxu1 %v9338_v41 }
 0x36d   :  { %5428 = vmatpush1.bf16.msra.mxu1 %v8195_v39  ;;  %3820 = vmatpush1.bf16.msra.mxu0 %v8198_v40  ;;  %v8261_v39 = vld [vmem:[#allocation11 + $0x360] ss:$16 sps:$4 sm:$0xff]   ;;  %v8264_v40 = vld [vmem:[#allocation11 + $0x48] ss:$16 sps:$4 sm:$0xff]  }
 0x36e   :  { %5459 = vmatprep.mubr.bf16.mxu1 %v9341_v43  ;;  %5429 = vmatprep.subr.bf16.mxu1 %v8203_v42  ;;  %v8269_v42 = vld [vmem:[#allocation11 + $0x384] ss:$16 sps:$4 sm:$0xff]  }
 0x36f   :  { %3821 = vmatprep.subr.bf16.mxu0 %v8206_v52  ;;  %v8272_v52 = vld [vmem:[#allocation11 + $0x6c] ss:$16 sps:$4 sm:$0xff]  }
 0x371   :  { %5430 = vmatpush1.bf16.msra.mxu1 %v8201_v44  ;;  %3822 = vmatpush1.bf16.msra.mxu0 %v8204_v45  ;;  %v8270_v44 = vld [vmem:[#allocation11 + $0x68] ss:$16 sps:$4 sm:$0xff]   ;;  %v8275_v45 = vld [vmem:[#allocation11 + $0x3a4] ss:$16 sps:$4 sm:$0xff]  }
 0x372   :  { %5431 = vmatprep.subr.bf16.mxu1 %v8209_v55  ;;  %3823 = vmatprep.subr.bf16.mxu0 %v8212_v56  ;;  %v8273_v55 = vld [vmem:[#allocation11 + $0x3a0] ss:$16 sps:$4 sm:$0xff]   ;;  %v8276_v56 = vld [vmem:[#allocation11 + $0x88] ss:$16 sps:$4 sm:$0xff]  }
 0x375   :  { %5432 = vmatpush1.bf16.msra.mxu1 %v8207_v49  ;;  %3824 = vmatpush1.bf16.msra.mxu0 %v8210_v50  ;;  %v1026_v49 = vrot.slane %v9326_v11, %v9262_v47  ;;  %v8281_v50 = vld [vmem:[#allocation11 + $0x3c4] ss:$16 sps:$4 sm:$0xff]  }
 0x376   :  { %5433 = vmatprep.subr.bf16.mxu1 %v8215_v5  ;;  %3825 = vmatprep.subr.bf16.mxu0 %v8218_v53  ;;  %v8284_v5 = vld [vmem:[#allocation11 + $0xac] ss:$16 sps:$4 sm:$0xff]   ;;  %v8279_v53 = vld [vmem:[#allocation11 + $0x3c0] ss:$16 sps:$4 sm:$0xff]  }
 0x379   :  { %5434 = vmatpush1.bf16.msra.mxu1 %v8213_v59  ;;  %3826 = vmatpush1.bf16.msra.mxu0 %v8216_v60  ;;  %v8282_v59 = vld [vmem:[#allocation11 + $0xa8] ss:$16 sps:$4 sm:$0xff]   ;;  %v7433_v60 = vadd.f32 %v9334_v15, %v1026_v49  ;;  %v8293_v15 = vld [vmem:[#allocation11 + $0xec] ss:$16 sps:$4 sm:$0xff]   ;;  %v8408_v49 = vld [vmem:[#allocation11 + $0x4e0] ss:$16 sps:$4 sm:$0xff]  }
 0x37a   :  { %5435 = vmatprep.subr.bf16.mxu1 %v8221_v61  ;;  %3827 = vmatprep.subr.bf16.mxu0 %v8224_v62  ;;  %v1042_v61 = vrot.slane %v9326_v11, %v246_v46  ;;  %v8287_v62 = vld [vmem:[#allocation11 + $0x3e4] ss:$16 sps:$4 sm:$0xff]  }
 0x37d   :  { %5436 = vmatpush1.bf16.msra.mxu1 %v8219_v1  ;;  %3828 = vmatpush1.bf16.msra.mxu0 %v8222_v2  ;;  %v8290_v1 = vld [vmem:[#allocation11 + $0xcc] ss:$16 sps:$4 sm:$0xff]  }
 0x37e   :  { %5437 = vmatprep.subr.bf16.mxu1 %v8227_v17  ;;  %3829 = vmatprep.subr.bf16.mxu0 %v8230_v3  ;;  %v8285_v3 = vld [vmem:[#allocation11 + $0x3e0] ss:$16 sps:$4 sm:$0xff]  }
 0x381   :  { %5438 = vmatpush1.bf16.msra.mxu1 %v8225_v4  ;;  %3830 = vmatpush1.bf16.msra.mxu0 %v8228_v21  ;;  %v8288_v4 = vld [vmem:[#allocation11 + $0xc8] ss:$16 sps:$4 sm:$0xff]   ;;  %v4008_v21 = vmax.f32 %v7433_v60, 0.0 }
 0x382   :  { %5439 = vmatprep.subr.bf16.mxu1 %v8233_v6  ;;  %3831 = vmatprep.subr.bf16.mxu0 %v8236_v7 }
 0x384   :  { %v7308_v48 = vpop.f32.mrb[12].mxu1 }
 0x385   :  { %v7309_v58 = vpop.f32.mrb[13].mxu1  ;;  %5440 = vmatpush1.bf16.msra.mxu1 %v8231_v8  ;;  %3832 = vmatpush1.bf16.msra.mxu0 %v8234_v23  ;;  %v8368_v23 = vld [vmem:[#allocation11 + $0x404] ss:$16 sps:$4 sm:$0xff]  }
 0x386   :  { %v9345_v38 = vadd.f32 %v7309_v58, %v7308_v48  ;;  %v7311_v13 = vpop.f32.mrb[14].mxu1  ;;  %5441 = vmatprep.subr.bf16.mxu1 %v8239_v9  ;;  %3833 = vmatprep.subr.bf16.mxu0 %v8242_v10  ;;  %v8291_v10 = vld [vmem:[#allocation11 + $0xe8] ss:$16 sps:$4 sm:$0xff]   ;;  %v8366_v48 = vld [vmem:[#allocation11 + $0x400] ss:$16 sps:$4 sm:$0xff]   ;;  %v9358_v58 = vpack.c.bf16 %v4008_v21, %v4008_v21 }
 0x387   :  { %v7312_v18 = vpop.f32.mrb[15].mxu1  ;;  %v8372_v13 = vld [vmem:[#allocation11 + $0x420] ss:$16 sps:$4 sm:$0xff]  }
 0x388   :  { %v3881_v6 = vadd.f32 %v9345_v38, %v1042_v61  ;;  %v8294_v38 = vld [vmem:[#allocation11 + $0x108] ss:$16 sps:$4 sm:$0xff]   ;;  %v8420_v21 = vld [vmem:[#allocation11 + $0x520] ss:$16 sps:$4 sm:$0xff]  }
 0x389   :  { %5442 = vmatpush1.bf16.msra.mxu1 %v8237_v29  ;;  %3834 = vmatpush1.bf16.msra.mxu0 %v8240_v12  ;;  %v8296_v29 = vld [vmem:[#allocation11 + $0x10c] ss:$16 sps:$4 sm:$0xff]   ;;  %v8374_v12 = vld [vmem:[#allocation11 + $0x424] ss:$16 sps:$4 sm:$0xff]   ;;  %v8297_v18 = vld [vmem:[#allocation11 + $0x128] ss:$16 sps:$4 sm:$0xff]  }
 0x38a   :  { %5443 = vmatprep.subr.bf16.mxu1 %v8245_v14  ;;  %3835 = vmatprep.subr.bf16.mxu0 %v8248_v57  ;;  %v8299_v14 = vld [vmem:[#allocation11 + $0x12c] ss:$16 sps:$4 sm:$0xff]   ;;  %v8380_v57 = vld [vmem:[#allocation11 + $0x444] ss:$16 sps:$4 sm:$0xff]  }
 0x38d   :  { %5444 = vmatpush1.bf16.msra.mxu1 %v8243_v19  ;;  %3836 = vmatpush1.bf16.msra.mxu0 %v8246_v20  ;;  %v8378_v19 = vld [vmem:[#allocation11 + $0x440] ss:$16 sps:$4 sm:$0xff]   ;;  %v8302_v20 = vld [vmem:[#allocation11 + $0x14c] ss:$16 sps:$4 sm:$0xff]  }
 0x38e   :  { %5445 = vmatprep.subr.bf16.mxu1 %v8251_v22  ;;  %5550 = vmatprep.subr.bf16.mxu0 %v8254_v24  ;;  %v8386_v22 = vld [vmem:[#allocation11 + $0x464] ss:$16 sps:$4 sm:$0xff]   ;;  %v8300_v24 = vld [vmem:[#allocation11 + $0x148] ss:$16 sps:$4 sm:$0xff]  }
 0x390   :  { %3838 = vmatmul.mubr.bf16.vlgmr.msra.gmra.mrb[12].mxu0 %v9307_v63  ;;  %v8267_v63 = vld [vmem:[#allocation11 + $0x380] ss:$16 sps:$4 sm:$0xff]  }
 0x391   :  { %5446 = vmatpush1.bf16.msra.mxu1 %v8249_v25  ;;  %5551 = vmatpush1.bf16.msra.mxu0 %v8252_v26  ;;  %v8384_v25 = vld [vmem:[#allocation11 + $0x460] ss:$16 sps:$4 sm:$0xff]   ;;  %v8305_v26 = vld [vmem:[#allocation11 + $0x16c] ss:$16 sps:$4 sm:$0xff]  }
 0x392   :  { %5582 = vmatprep.mubr.bf16.mxu0 %v9336_v37  ;;  %5447 = vmatprep.subr.bf16.mxu1 %v8257_v32  ;;  %v8278_v37 = vld [vmem:[#allocation11 + $0x8c] ss:$16 sps:$4 sm:$0xff]   ;;  %v8392_v32 = vld [vmem:[#allocation11 + $0x484] ss:$16 sps:$4 sm:$0xff]  }
 0x393   :  { %5552 = vmatprep.subr.bf16.mxu0 %v8260_v51  ;;  %v8303_v51 = vld [vmem:[#allocation11 + $0x168] ss:$16 sps:$4 sm:$0xff]  }
 0x395   :  { %5448 = vmatpush1.bf16.msra.mxu1 %v8255_v33  ;;  %5553 = vmatpush1.bf16.msra.mxu0 %v8258_v34  ;;  %v8390_v33 = vld [vmem:[#allocation11 + $0x480] ss:$16 sps:$4 sm:$0xff]   ;;  %v8308_v34 = vld [vmem:[#allocation11 + $0x18c] ss:$16 sps:$4 sm:$0xff]  }
 0x396   :  { %5449 = vmatprep.subr.bf16.mxu1 %v8263_v35  ;;  %5554 = vmatprep.subr.bf16.mxu0 %v8266_v36  ;;  %v8398_v35 = vld [vmem:[#allocation11 + $0x4a4] ss:$16 sps:$4 sm:$0xff]   ;;  %v8306_v36 = vld [vmem:[#allocation11 + $0x188] ss:$16 sps:$4 sm:$0xff]  }
 0x399   :  { %5450 = vmatpush1.bf16.msra.mxu1 %v8261_v39  ;;  %5555 = vmatpush1.bf16.msra.mxu0 %v8264_v40  ;;  %v8396_v39 = vld [vmem:[#allocation11 + $0x4a0] ss:$16 sps:$4 sm:$0xff]   ;;  %v8311_v40 = vld [vmem:[#allocation11 + $0x1ac] ss:$16 sps:$4 sm:$0xff]  }
 0x39a   :  { %5451 = vmatprep.subr.bf16.mxu1 %v8269_v42  ;;  %5556 = vmatprep.subr.bf16.mxu0 %v8272_v52  ;;  %v8404_v42 = vld [vmem:[#allocation11 + $0x4c4] ss:$16 sps:$4 sm:$0xff]   ;;  %v8309_v52 = vld [vmem:[#allocation11 + $0x1a8] ss:$16 sps:$4 sm:$0xff]  }
 0x39d   :  { %5452 = vmatpush1.bf16.msra.mxu1 %v8267_v63  ;;  %5557 = vmatpush1.bf16.msra.mxu0 %v8270_v44  ;;  %v8402_v63 = vld [vmem:[#allocation11 + $0x4c0] ss:$16 sps:$4 sm:$0xff]   ;;  %v8314_v44 = vld [vmem:[#allocation11 + $0x1cc] ss:$16 sps:$4 sm:$0xff]  }
 0x39e   :  { %5453 = vmatprep.subr.bf16.mxu1 %v8275_v45  ;;  %5558 = vmatprep.subr.bf16.mxu0 %v8278_v37  ;;  %v8410_v45 = vld [vmem:[#allocation11 + $0x4e4] ss:$16 sps:$4 sm:$0xff]  }
 0x3a1   :  { %5454 = vmatpush1.bf16.msra.mxu1 %v8273_v55  ;;  %5559 = vmatpush1.bf16.msra.mxu0 %v8276_v56  ;;  %v8312_v56 = vld [vmem:[#allocation11 + $0x1c8] ss:$16 sps:$4 sm:$0xff]  }
 0x3a2   :  { %5455 = vmatprep.subr.bf16.mxu1 %v8281_v50  ;;  %5560 = vmatprep.subr.bf16.mxu0 %v8284_v5 }
 0x3a4   :  { %v7330_v2 = vpop.f32.mrb[16].mxu1 }
 0x3a5   :  { %v7331_v17 = vpop.f32.mrb[17].mxu1  ;;  %5456 = vmatpush1.bf16.msra.mxu1 %v8279_v53  ;;  %5561 = vmatpush1.bf16.msra.mxu0 %v8282_v59  ;;  %v8317_v53 = vld [vmem:[#allocation11 + $0x1ec] ss:$16 sps:$4 sm:$0xff]   ;;  %v8416_v59 = vld [vmem:[#allocation11 + $0x504] ss:$16 sps:$4 sm:$0xff]  }
 0x3a6   :  { %v7332_v7 = vadd.f32 %v7331_v17, %v7330_v2  ;;  %v7333_v8 = vpop.f32.mrb[18].mxu1  ;;  %5457 = vmatprep.subr.bf16.mxu1 %v8287_v62  ;;  %5562 = vmatprep.subr.bf16.mxu0 %v8290_v1  ;;  %v8315_v62 = vld [vmem:[#allocation11 + $0x1e8] ss:$16 sps:$4 sm:$0xff]   ;;  %v8414_v1 = vld [vmem:[#allocation11 + $0x500] ss:$16 sps:$4 sm:$0xff]  }
 0x3a7   :  { %v7334_v46 = vpop.f32.mrb[19].mxu1  ;;  %v8320_v2 = vld [vmem:[#allocation11 + $0x20c] ss:$16 sps:$4 sm:$0xff]   ;;  %v8422_v17 = vld [vmem:[#allocation11 + $0x524] ss:$16 sps:$4 sm:$0xff]  }
 0x3a8   :  { %v9356_v9 = vadd.f32 %v7332_v7, %v3881_v6  ;;  %v8428_v6 = vld [vmem:[#allocation11 + $0x544] ss:$16 sps:$4 sm:$0xff]   ;;  %v8321_v7 = vld [vmem:[#allocation11 + $0x228] ss:$16 sps:$4 sm:$0xff]   ;;  %v8326_v8 = vld [vmem:[#allocation11 + $0x24c] ss:$16 sps:$4 sm:$0xff]  }
 0x3a9   :  { %5458 = vmatpush1.bf16.msra.mxu1 %v8285_v3  ;;  %5563 = vmatpush1.bf16.msra.mxu0 %v8288_v4  ;;  %v8318_v3 = vld [vmem:[#allocation11 + $0x208] ss:$16 sps:$4 sm:$0xff]   ;;  %v8323_v4 = vld [vmem:[#allocation11 + $0x22c] ss:$16 sps:$4 sm:$0xff]  }
 0x3aa   :  { %5564 = vmatprep.subr.bf16.mxu0 %v8293_v15  ;;  %5468 = vmatprep.subr.bf16.mxu1 %v8368_v23  ;;  %v8426_v15 = vld [vmem:[#allocation11 + $0x540] ss:$16 sps:$4 sm:$0xff]   ;;  %v8434_v23 = vld [vmem:[#allocation11 + $0x564] ss:$16 sps:$4 sm:$0xff]   ;;  %v8324_v46 = vld [vmem:[#allocation11 + $0x248] ss:$16 sps:$4 sm:$0xff]  }
 0x3ac   :  { %5460 = vmatmul.mubr.bf16.vlgmr.msra.gmra.mrb[28].mxu1 %v9358_v58 }
 0x3ad   :  { %5565 = vmatpush1.bf16.msra.mxu0 %v8291_v10  ;;  %5469 = vmatpush1.bf16.msra.mxu1 %v8366_v48  ;;  %v8432_v10 = vld [vmem:[#allocation11 + $0x560] ss:$16 sps:$4 sm:$0xff]   ;;  %v8440_v48 = vld [vmem:[#allocation11 + $0x584] ss:$16 sps:$4 sm:$0xff]  }
 0x3ae   :  { %5566 = vmatprep.subr.bf16.mxu0 %v8296_v29  ;;  %5470 = vmatprep.subr.bf16.mxu1 %v8374_v12  ;;  %v8332_v29 = vld [vmem:[#allocation11 + $0x28c] ss:$16 sps:$4 sm:$0xff]   ;;  %v8446_v12 = vld [vmem:[#allocation11 + $0x5a4] ss:$16 sps:$4 sm:$0xff]  }
 0x3b1   :  { %5567 = vmatpush1.bf16.msra.mxu0 %v8294_v38  ;;  %5471 = vmatpush1.bf16.msra.mxu1 %v8372_v13  ;;  %v8330_v38 = vld [vmem:[#allocation11 + $0x288] ss:$16 sps:$4 sm:$0xff]   ;;  %v8335_v13 = vld [vmem:[#allocation11 + $0x2ac] ss:$16 sps:$4 sm:$0xff]  }
 0x3b2   :  { %5568 = vmatprep.subr.bf16.mxu0 %v8299_v14  ;;  %5472 = vmatprep.subr.bf16.mxu1 %v8380_v57  ;;  %v8444_v14 = vld [vmem:[#allocation11 + $0x5a0] ss:$16 sps:$4 sm:$0xff]   ;;  %v8333_v57 = vld [vmem:[#allocation11 + $0x2a8] ss:$16 sps:$4 sm:$0xff]  }
 0x3b5   :  { %5569 = vmatpush1.bf16.msra.mxu0 %v8297_v18  ;;  %5473 = vmatpush1.bf16.msra.mxu1 %v8378_v19  ;;  %v8338_v18 = vld [vmem:[#allocation11 + $0x2cc] ss:$16 sps:$4 sm:$0xff]   ;;  %v8452_v19 = vld [vmem:[#allocation11 + $0x5c4] ss:$16 sps:$4 sm:$0xff]  }
 0x3b6   :  { %5570 = vmatprep.subr.bf16.mxu0 %v8302_v20  ;;  %5474 = vmatprep.subr.bf16.mxu1 %v8386_v22  ;;  %v8450_v22 = vld [vmem:[#allocation11 + $0x5c0] ss:$16 sps:$4 sm:$0xff]  }
 0x3b9   :  { %5571 = vmatpush1.bf16.msra.mxu0 %v8300_v24  ;;  %5475 = vmatpush1.bf16.msra.mxu1 %v8384_v25  ;;  %v8336_v25 = vld [vmem:[#allocation11 + $0x2c8] ss:$16 sps:$4 sm:$0xff]  }
 0x3ba   :  { %5572 = vmatprep.subr.bf16.mxu0 %v8305_v26  ;;  %5476 = vmatprep.subr.bf16.mxu1 %v8392_v32 }
 0x3bd   :  { %5573 = vmatpush1.bf16.msra.mxu0 %v8303_v51  ;;  %5477 = vmatpush1.bf16.msra.mxu1 %v8390_v33  ;;  %v8341_v51 = vld [vmem:[#allocation11 + $0x2ec] ss:$16 sps:$4 sm:$0xff]  }
 0x3be   :  { %5574 = vmatprep.subr.bf16.mxu0 %v8308_v34  ;;  %5478 = vmatprep.subr.bf16.mxu1 %v8398_v35  ;;  %v8458_v34 = vld [vmem:[#allocation11 + $0x5e4] ss:$16 sps:$4 sm:$0xff]  }
 0x3c1   :  { %5575 = vmatpush1.bf16.msra.mxu0 %v8306_v36  ;;  %5479 = vmatpush1.bf16.msra.mxu1 %v8396_v39  ;;  %v8456_v36 = vld [vmem:[#allocation11 + $0x5e0] ss:$16 sps:$4 sm:$0xff]   ;;  %v8339_v39 = vld [vmem:[#allocation11 + $0x2e8] ss:$16 sps:$4 sm:$0xff]  }
 0x3c2   :  { %5576 = vmatprep.subr.bf16.mxu0 %v8311_v40  ;;  %5480 = vmatprep.subr.bf16.mxu1 %v8404_v42  ;;  %v8344_v40 = vld [vmem:[#allocation11 + $0x30c] ss:$16 sps:$4 sm:$0xff]   ;;  %v8464_v42 = vld [vmem:[#allocation11 + $0x604] ss:$16 sps:$4 sm:$0xff]  }
 0x3c4   :  { %v7352_v37 = vpop.f32.mrb[20].mxu1 }
 0x3c5   :  { %v7353_v55 = vpop.f32.mrb[21].mxu1  ;;  %5577 = vmatpush1.bf16.msra.mxu0 %v8309_v52  ;;  %5481 = vmatpush1.bf16.msra.mxu1 %v8402_v63  ;;  %v8342_v52 = vld [vmem:[#allocation11 + $0x308] ss:$16 sps:$4 sm:$0xff]   ;;  %v8347_v63 = vld [vmem:[#allocation11 + $0x32c] ss:$16 sps:$4 sm:$0xff]  }
 0x3c6   :  { %v7354_v50 = vadd.f32 %v7353_v55, %v7352_v37  ;;  %v7355_v5 = vpop.f32.mrb[22].mxu1  ;;  %5578 = vmatprep.subr.bf16.mxu0 %v8314_v44  ;;  %5482 = vmatprep.subr.bf16.mxu1 %v8410_v45  ;;  %v8345_v44 = vld [vmem:[#allocation11 + $0x328] ss:$16 sps:$4 sm:$0xff]   ;;  %v8350_v45 = vld [vmem:[#allocation11 + $0x34c] ss:$16 sps:$4 sm:$0xff]  }
 0x3c7   :  { %v7356_v60 = vpop.f32.mrb[23].mxu1  ;;  %v8348_v37 = vld [vmem:[#allocation11 + $0x348] ss:$16 sps:$4 sm:$0xff]   ;;  %v8353_v55 = vld [vmem:[#allocation11 + $0x36c] ss:$16 sps:$4 sm:$0xff]  }
 0x3c8   :  { %v9362_v61 = vadd.f32 %v7354_v50, %v9356_v9  ;;  %v8329_v9 = vld [vmem:[#allocation11 + $0x26c] ss:$16 sps:$4 sm:$0xff]   ;;  %v8354_v50 = vld [vmem:[#allocation11 + $0x388] ss:$16 sps:$4 sm:$0xff]  }
 0x3c9   :  { %5579 = vmatpush1.bf16.msra.mxu0 %v8312_v56  ;;  %5483 = vmatpush1.bf16.msra.mxu1 %v8408_v49  ;;  %v8351_v56 = vld [vmem:[#allocation11 + $0x368] ss:$16 sps:$4 sm:$0xff]   ;;  %v8356_v49 = vld [vmem:[#allocation11 + $0x38c] ss:$16 sps:$4 sm:$0xff]  }
 0x3ca   :  { %5580 = vmatprep.subr.bf16.mxu0 %v8317_v53  ;;  %5484 = vmatprep.subr.bf16.mxu1 %v8416_v59  ;;  %v8359_v5 = vld [vmem:[#allocation11 + $0x3ac] ss:$16 sps:$4 sm:$0xff]   ;;  %v8357_v53 = vld [vmem:[#allocation11 + $0x3a8] ss:$16 sps:$4 sm:$0xff]  }
 0x3cb   :  { %v8362_v59 = vld [vmem:[#allocation11 + $0x3cc] ss:$16 sps:$4 sm:$0xff]   ;;  %v8360_v60 = vld [vmem:[#allocation11 + $0x3c8] ss:$16 sps:$4 sm:$0xff]  }
 0x3cd   :  { %5581 = vmatpush1.bf16.msra.mxu0 %v8315_v62  ;;  %5485 = vmatpush1.bf16.msra.mxu1 %v8414_v1  ;;  %v8363_v62 = vld [vmem:[#allocation11 + $0x3e8] ss:$16 sps:$4 sm:$0xff]   ;;  %v8371_v1 = vld [vmem:[#allocation11 + $0x40c] ss:$16 sps:$4 sm:$0xff]  }
 0x3ce   :  { %5591 = vmatprep.subr.bf16.mxu0 %v8320_v2  ;;  %5486 = vmatprep.subr.bf16.mxu1 %v8422_v17  ;;  %v8369_v2 = vld [vmem:[#allocation11 + $0x408] ss:$16 sps:$4 sm:$0xff]   ;;  %v8377_v17 = vld [vmem:[#allocation11 + $0x42c] ss:$16 sps:$4 sm:$0xff]  }
 0x3d0   :  { %5583 = vmatmul.mubr.bf16.vlgmr.msra.gmra.mrb[16].mxu0 %v9338_v41  ;;  %v8327_v41 = vld [vmem:[#allocation11 + $0x268] ss:$16 sps:$4 sm:$0xff]  }
 0x3d1   :  { %5592 = vmatpush1.bf16.msra.mxu0 %v8318_v3  ;;  %5623 = vmatprep.mubr.bf16.mxu0 %v9341_v43  ;;  %v8438_v43 = vld [vmem:[#allocation11 + $0x580] ss:$16 sps:$4 sm:$0xff]   ;;  %v8375_v3 = vld [vmem:[#allocation11 + $0x428] ss:$16 sps:$4 sm:$0xff]  }
 0x3d2   :  { %5593 = vmatprep.subr.bf16.mxu0 %v8323_v4  ;;  %5487 = vmatpush1.bf16.msra.mxu1 %v8420_v21  ;;  %v8383_v4 = vld [vmem:[#allocation11 + $0x44c] ss:$16 sps:$4 sm:$0xff]   ;;  %v8381_v21 = vld [vmem:[#allocation11 + $0x448] ss:$16 sps:$4 sm:$0xff]  }
 0x3d3   :  { %5488 = vmatprep.subr.bf16.mxu1 %v8428_v6  ;;  %v8389_v6 = vld [vmem:[#allocation11 + $0x46c] ss:$16 sps:$4 sm:$0xff]  }
 0x3d5   :  { %5594 = vmatpush1.bf16.msra.mxu0 %v8321_v7  ;;  %v8387_v7 = vld [vmem:[#allocation11 + $0x468] ss:$16 sps:$4 sm:$0xff]  }
 0x3d6   :  { %5595 = vmatprep.subr.bf16.mxu0 %v8326_v8  ;;  %5489 = vmatpush1.bf16.msra.mxu1 %v8426_v15  ;;  %v8395_v8 = vld [vmem:[#allocation11 + $0x48c] ss:$16 sps:$4 sm:$0xff]   ;;  %v8393_v15 = vld [vmem:[#allocation11 + $0x488] ss:$16 sps:$4 sm:$0xff]  }
 0x3d7   :  { %5490 = vmatprep.subr.bf16.mxu1 %v8434_v23  ;;  %v8401_v23 = vld [vmem:[#allocation11 + $0x4ac] ss:$16 sps:$4 sm:$0xff]  }
 0x3d9   :  { %5596 = vmatpush1.bf16.msra.mxu0 %v8324_v46  ;;  %v8399_v46 = vld [vmem:[#allocation11 + $0x4a8] ss:$16 sps:$4 sm:$0xff]  }
 0x3da   :  { %5597 = vmatprep.subr.bf16.mxu0 %v8329_v9  ;;  %5491 = vmatpush1.bf16.msra.mxu1 %v8432_v10  ;;  %v8405_v9 = vld [vmem:[#allocation11 + $0x4c8] ss:$16 sps:$4 sm:$0xff]   ;;  %v8413_v10 = vld [vmem:[#allocation11 + $0x4ec] ss:$16 sps:$4 sm:$0xff]  }
 0x3db   :  { %5492 = vmatprep.subr.bf16.mxu1 %v8440_v48  ;;  %v8411_v48 = vld [vmem:[#allocation11 + $0x4e8] ss:$16 sps:$4 sm:$0xff]  }
 0x3dd   :  { %5598 = vmatpush1.bf16.msra.mxu0 %v8327_v41  ;;  %v8419_v41 = vld [vmem:[#allocation11 + $0x50c] ss:$16 sps:$4 sm:$0xff]  }
 0x3de   :  { %5599 = vmatprep.subr.bf16.mxu0 %v8332_v29  ;;  %5493 = vmatpush1.bf16.msra.mxu1 %v8438_v43  ;;  %v8417_v29 = vld [vmem:[#allocation11 + $0x508] ss:$16 sps:$4 sm:$0xff]   ;;  %v8425_v43 = vld [vmem:[#allocation11 + $0x52c] ss:$16 sps:$4 sm:$0xff]  }
 0x3df   :  { %5494 = vmatprep.subr.bf16.mxu1 %v8446_v12  ;;  %v8423_v12 = vld [vmem:[#allocation11 + $0x528] ss:$16 sps:$4 sm:$0xff]  }
 0x3e1   :  { %5600 = vmatpush1.bf16.msra.mxu0 %v8330_v38  ;;  %v8431_v38 = vld [vmem:[#allocation11 + $0x54c] ss:$16 sps:$4 sm:$0xff]  }
 0x3e2   :  { %5601 = vmatprep.subr.bf16.mxu0 %v8335_v13  ;;  %5495 = vmatpush1.bf16.msra.mxu1 %v8444_v14  ;;  %v8429_v13 = vld [vmem:[#allocation11 + $0x548] ss:$16 sps:$4 sm:$0xff]   ;;  %v8437_v14 = vld [vmem:[#allocation11 + $0x56c] ss:$16 sps:$4 sm:$0xff]  }
 0x3e3   :  { %5496 = vmatprep.subr.bf16.mxu1 %v8452_v19  ;;  %v8441_v19 = vld [vmem:[#allocation11 + $0x588] ss:$16 sps:$4 sm:$0xff]  }
 0x3e4   :  { %v7374_v20 = vpop.f32.mrb[24].mxu1 }
 0x3e5   :  { %v7375_v24 = vpop.f32.mrb[25].mxu1  ;;  %5602 = vmatpush1.bf16.msra.mxu0 %v8333_v57  ;;  %v8435_v57 = vld [vmem:[#allocation11 + $0x568] ss:$16 sps:$4 sm:$0xff]  }
 0x3e6   :  { %v7376_v26 = vadd.f32 %v7375_v24, %v7374_v20  ;;  %v7377_v32 = vpop.f32.mrb[26].mxu1  ;;  %5603 = vmatprep.subr.bf16.mxu0 %v8338_v18  ;;  %5497 = vmatpush1.bf16.msra.mxu1 %v8450_v22  ;;  %v8443_v18 = vld [vmem:[#allocation11 + $0x58c] ss:$16 sps:$4 sm:$0xff]   ;;  %v8447_v22 = vld [vmem:[#allocation11 + $0x5a8] ss:$16 sps:$4 sm:$0xff]  }
 0x3e7   :  { %v7378_v33 = vpop.f32.mrb[27].mxu1  ;;  %5498 = vmatprep.subr.bf16.mxu1 %v8458_v34  ;;  %v8449_v20 = vld [vmem:[#allocation11 + $0x5ac] ss:$16 sps:$4 sm:$0xff]   ;;  %v8459_v32 = vld [vmem:[#allocation11 + $0x5e8] ss:$16 sps:$4 sm:$0xff]   ;;  %v1038_v34 = vrot.slane %v9326_v11, %v242_v54 }
 0x3e8   :  { %v9367_v35 = vadd.f32 %v7376_v26, %v9362_v61  ;;  %v8365_v61 = vld [vmem:[#allocation11 + $0x3ec] ss:$16 sps:$4 sm:$0xff]   ;;  %v1034_v33 = vrot.slane %v9326_v11, %v238_v16  ;;  %v8471_v54 = vld [vmem:[#allocation11 + $0x628] ss:$16 sps:$4 sm:$0xff]   ;;  %v8476_v16 = vld [vmem:[#allocation11 + $0x644] ss:$16 sps:$4 sm:$0xff]  }
 0x3e9   :  { %5604 = vmatpush1.bf16.msra.mxu0 %v8336_v25  ;;  %v8455_v24 = vld [vmem:[#allocation11 + $0x5cc] ss:$16 sps:$4 sm:$0xff]   ;;  %v8453_v25 = vld [vmem:[#allocation11 + $0x5c8] ss:$16 sps:$4 sm:$0xff]  }
 0x3ea   :  { %5605 = vmatprep.subr.bf16.mxu0 %v8341_v51  ;;  %5499 = vmatpush1.bf16.msra.mxu1 %v8456_v36  ;;  %v8461_v26 = vld [vmem:[#allocation11 + $0x5ec] ss:$16 sps:$4 sm:$0xff]  }
 0x3eb   :  { %5509 = vmatprep.subr.bf16.mxu1 %v8464_v42  ;;  %v8467_v51 = vld [vmem:[#allocation11 + $0x60c] ss:$16 sps:$4 sm:$0xff]  }
 0x3ec   :  { %v8479_v11 = vld [vmem:[#allocation11 + $0x64c] ss:$16 sps:$4 sm:$0xff]  }
 0x3ed   :  { %5606 = vmatpush1.bf16.msra.mxu0 %v8339_v39 }
 0x3ee   :  { %5607 = vmatprep.subr.bf16.mxu0 %v8344_v40 }
 0x3f1   :  { %5608 = vmatpush1.bf16.msra.mxu0 %v8342_v52 }
 0x3f2   :  { %5609 = vmatprep.subr.bf16.mxu0 %v8347_v63 }
 0x3f5   :  { %5610 = vmatpush1.bf16.msra.mxu0 %v8345_v44 }
 0x3f6   :  { %5611 = vmatprep.subr.bf16.mxu0 %v8350_v45 }
 0x3f9   :  { %5612 = vmatpush1.bf16.msra.mxu0 %v8348_v37 }
 0x3fa   :  { %5613 = vmatprep.subr.bf16.mxu0 %v8353_v55  ;;  %v8462_v55 = vld [vmem:[#allocation11 + $0x600] ss:$16 sps:$4 sm:$0xff]  }
 0x3fd   :  { %5614 = vmatpush1.bf16.msra.mxu0 %v8351_v56  ;;  %v8465_v56 = vld [vmem:[#allocation11 + $0x608] ss:$16 sps:$4 sm:$0xff]  }
 0x3fe   :  { %5615 = vmatprep.subr.bf16.mxu0 %v8356_v49 }
 0x401   :  { %5616 = vmatpush1.bf16.msra.mxu0 %v8354_v50  ;;  %v8470_v50 = vld [vmem:[#allocation11 + $0x624] ss:$16 sps:$4 sm:$0xff]  }
 0x402   :  { %5617 = vmatprep.subr.bf16.mxu0 %v8359_v5  ;;  %v8473_v5 = vld [vmem:[#allocation11 + $0x62c] ss:$16 sps:$4 sm:$0xff]  }
 0x405   :  { %5618 = vmatpush1.bf16.msra.mxu0 %v8357_v53  ;;  %v8474_v53 = vld [vmem:[#allocation11 + $0x640] ss:$16 sps:$4 sm:$0xff]  }
 0x406   :  { %5619 = vmatprep.subr.bf16.mxu0 %v8362_v59  ;;  %v8477_v59 = vld [vmem:[#allocation11 + $0x648] ss:$16 sps:$4 sm:$0xff]  }
 0x409   :  { %5620 = vmatpush1.bf16.msra.mxu0 %v8360_v60  ;;  %v8482_v60 = vld [vmem:[#allocation11 + $0x664] ss:$16 sps:$4 sm:$0xff]  }
 0x40a   :  { %5621 = vmatprep.subr.bf16.mxu0 %v8365_v61  ;;  %v8485_v61 = vld [vmem:[#allocation11 + $0x66c] ss:$16 sps:$4 sm:$0xff]  }
 0x40d   :  { %5622 = vmatpush1.bf16.msra.mxu0 %v8363_v62  ;;  %v8480_v62 = vld [vmem:[#allocation11 + $0x660] ss:$16 sps:$4 sm:$0xff]  }
 0x40e   :  { %5632 = vmatprep.subr.bf16.mxu0 %v8371_v1  ;;  %v8483_v1 = vld [vmem:[#allocation11 + $0x668] ss:$16 sps:$4 sm:$0xff]  }
 0x410   :  { %5624 = vmatmul.mubr.bf16.vlgmr.msra.gmra.mrb[16].mxu0 %v9358_v58  ;;  %v8407_v58 = vld [vmem:[#allocation11 + $0x4cc] ss:$16 sps:$4 sm:$0xff]  }
 0x411   :  { %5633 = vmatpush1.bf16.msra.mxu0 %v8369_v2  ;;  %v8488_v2 = vld [vmem:[#allocation11 + $0x684] ss:$16 sps:$4 sm:$0xff]  }
 0x412   :  { %5634 = vmatprep.subr.bf16.mxu0 %v8377_v17  ;;  %v8491_v17 = vld [vmem:[#allocation11 + $0x68c] ss:$16 sps:$4 sm:$0xff]  }
 0x415   :  { %5635 = vmatpush1.bf16.msra.mxu0 %v8375_v3  ;;  %v8486_v3 = vld [vmem:[#allocation11 + $0x680] ss:$16 sps:$4 sm:$0xff]  }
 0x416   :  { %5636 = vmatprep.subr.bf16.mxu0 %v8383_v4  ;;  %v8494_v4 = vld [vmem:[#allocation11 + $0x6a4] ss:$16 sps:$4 sm:$0xff]  }
 0x419   :  { %5637 = vmatpush1.bf16.msra.mxu0 %v8381_v21  ;;  %v8497_v21 = vld [vmem:[#allocation11 + $0x6ac] ss:$16 sps:$4 sm:$0xff]  }
 0x41a   :  { %5638 = vmatprep.subr.bf16.mxu0 %v8389_v6  ;;  %v8492_v6 = vld [vmem:[#allocation11 + $0x6a0] ss:$16 sps:$4 sm:$0xff]  }
 0x41d   :  { %5639 = vmatpush1.bf16.msra.mxu0 %v8387_v7  ;;  %v8495_v7 = vld [vmem:[#allocation11 + $0x6a8] ss:$16 sps:$4 sm:$0xff]  }
 0x41e   :  { %5640 = vmatprep.subr.bf16.mxu0 %v8395_v8  ;;  %v8500_v8 = vld [vmem:[#allocation11 + $0x6c4] ss:$16 sps:$4 sm:$0xff]  }
 0x421   :  { %5641 = vmatpush1.bf16.msra.mxu0 %v8393_v15  ;;  %v8503_v15 = vld [vmem:[#allocation11 + $0x6cc] ss:$16 sps:$4 sm:$0xff]  }
 0x422   :  { %5642 = vmatprep.subr.bf16.mxu0 %v8401_v23  ;;  %v8498_v23 = vld [vmem:[#allocation11 + $0x6c0] ss:$16 sps:$4 sm:$0xff]  }
 0x425   :  { %5643 = vmatpush1.bf16.msra.mxu0 %v8399_v46  ;;  %v8501_v46 = vld [vmem:[#allocation11 + $0x6c8] ss:$16 sps:$4 sm:$0xff]  }
 0x426   :  { %5644 = vmatprep.subr.bf16.mxu0 %v8407_v58  ;;  %v8506_v58 = vld [vmem:[#allocation11 + $0x6e4] ss:$16 sps:$4 sm:$0xff]  }
 0x429   :  { %5645 = vmatpush1.bf16.msra.mxu0 %v8405_v9  ;;  %v8509_v9 = vld [vmem:[#allocation11 + $0x6ec] ss:$16 sps:$4 sm:$0xff]  }
 0x42a   :  { %5646 = vmatprep.subr.bf16.mxu0 %v8413_v10  ;;  %v8504_v10 = vld [vmem:[#allocation11 + $0x6e0] ss:$16 sps:$4 sm:$0xff]  }
 0x42d   :  { %5647 = vmatpush1.bf16.msra.mxu0 %v8411_v48  ;;  %v8507_v48 = vld [vmem:[#allocation11 + $0x6e8] ss:$16 sps:$4 sm:$0xff]  }
 0x42e   :  { %5648 = vmatprep.subr.bf16.mxu0 %v8419_v41  ;;  %v4012_v41 = vmax.f32 %v9367_v35, 0.0  ;;  %v8519_v35 = vld [vmem:[#allocation14 + $0x30] ss:$8 sps:$4 sm:$0xff]  }
 0x431   :  { %5649 = vmatpush1.bf16.msra.mxu0 %v8417_v29  ;;  %v8512_v29 = vld [vmem:[#allocation14 + $0x4] ss:$8 sps:$4 sm:$0xff]  }
 0x432   :  { %5650 = vmatprep.subr.bf16.mxu0 %v8425_v43  ;;  %v8510_v43 = vld [vmem:[#allocation14] ss:$8 sps:$4 sm:$0xff]  }
 0x435   :  { %5651 = vmatpush1.bf16.msra.mxu0 %v8423_v12  ;;  %v4019_v12 = vpack.c.bf16 %v4012_v41, %v4012_v41 }
 0x436   :  { %5652 = vmatprep.subr.bf16.mxu0 %v8431_v38  ;;  %v8515_v38 = vld [vmem:[#allocation14 + $0x14] ss:$8 sps:$4 sm:$0xff]  }
 0x439   :  { %5653 = vmatpush1.bf16.msra.mxu0 %v8429_v13  ;;  %v8513_v13 = vld [vmem:[#allocation14 + $0x10] ss:$8 sps:$4 sm:$0xff]  }
 0x43a   :  { %5654 = vmatprep.subr.bf16.mxu0 %v8437_v14  ;;  %v8518_v14 = vld [vmem:[#allocation14 + $0x24] ss:$8 sps:$4 sm:$0xff]  }
 0x43d   :  { %5655 = vmatpush1.bf16.msra.mxu0 %v8435_v57  ;;  %v8516_v57 = vld [vmem:[#allocation14 + $0x20] ss:$8 sps:$4 sm:$0xff]  }
 0x43e   :  { %5656 = vmatprep.subr.bf16.mxu0 %v8443_v18  ;;  %v8521_v18 = vld [vmem:[#allocation14 + $0x34] ss:$8 sps:$4 sm:$0xff]  }
 0x441   :  { %5657 = vmatpush1.bf16.msra.mxu0 %v8441_v19  ;;  %v8524_v19 = vld [vmem:[#allocation14 + $0x44] ss:$8 sps:$4 sm:$0xff]  }
 0x442   :  { %5658 = vmatprep.subr.bf16.mxu0 %v8449_v20  ;;  %v8522_v20 = vld [vmem:[#allocation14 + $0x40] ss:$8 sps:$4 sm:$0xff]  }
 0x445   :  { %5659 = vmatpush1.bf16.msra.mxu0 %v8447_v22  ;;  %v8527_v22 = vld [vmem:[#allocation14 + $0x54] ss:$8 sps:$4 sm:$0xff]  }
 0x446   :  { %5660 = vmatprep.subr.bf16.mxu0 %v8455_v24  ;;  %v8525_v24 = vld [vmem:[#allocation14 + $0x50] ss:$8 sps:$4 sm:$0xff]  }
 0x449   :  { %5661 = vmatpush1.bf16.msra.mxu0 %v8453_v25  ;;  %v8530_v25 = vld [vmem:[#allocation14 + $0x64] ss:$8 sps:$4 sm:$0xff]  }
 0x44a   :  { %5662 = vmatprep.subr.bf16.mxu0 %v8461_v26  ;;  %v8528_v26 = vld [vmem:[#allocation14 + $0x60] ss:$8 sps:$4 sm:$0xff]  }
 0x44d   :  { %5663 = vmatpush1.bf16.msra.mxu0 %v8459_v32  ;;  %v8533_v32 = vld [vmem:[#allocation14 + $0x74] ss:$8 sps:$4 sm:$0xff]  }
 0x44e   :  { %5673 = vmatprep.subr.bf16.mxu0 %v8467_v51  ;;  %v8531_v51 = vld [vmem:[#allocation14 + $0x70] ss:$8 sps:$4 sm:$0xff]  }
 0x463   :  { %v3839_v36 = vpop.f32.mrb[12].mxu0 }
 0x464   :  { %v7435_v39 = vadd.f32 %v3839_v36, %v1034_v33  ;;  %v3841_v40 = vpop.f32.mrb[13].mxu0  ;;  %v8536_v33 = vld [vmem:[#allocation14 + $0x84] ss:$8 sps:$4 sm:$0xff]   ;;  %v8539_v36 = vld [vmem:[#allocation14 + $0x94] ss:$8 sps:$4 sm:$0xff]  }
 0x465   :  { %v7436_v42 = vadd.f32 %v3841_v40, %v1038_v34  ;;  %v3843_v52 = vpop.f32.mrb[14].mxu0  ;;  %v8534_v34 = vld [vmem:[#allocation14 + $0x80] ss:$8 sps:$4 sm:$0xff]   ;;  %v8542_v40 = vld [vmem:[#allocation14 + $0xa4] ss:$8 sps:$4 sm:$0xff]  }
 0x466   :  { %v4010_v63 = vmax.f32 %v7435_v39, 0.0  ;;  %v3844_v44 = vpop.f32.mrb[15].mxu0  ;;  %v8537_v39 = vld [vmem:[#allocation14 + $0x90] ss:$8 sps:$4 sm:$0xff]   ;;  %v8545_v52 = vld [vmem:[#allocation14 + $0xb4] ss:$8 sps:$4 sm:$0xff]  }
 0x467   :  { %v4011_v45 = vmax.f32 %v7436_v42, 0.0  ;;  %v8540_v42 = vld [vmem:[#allocation14 + $0xa0] ss:$8 sps:$4 sm:$0xff]   ;;  %v8548_v44 = vld [vmem:[#allocation14 + $0xc4] ss:$8 sps:$4 sm:$0xff]  }
 0x468   :  { %v4017_v49 = vpack.c.bf16 %v4010_v63, %v4010_v63  ;;  %v8543_v63 = vld [vmem:[#allocation14 + $0xb0] ss:$8 sps:$4 sm:$0xff]  }
 0x469   :  { %v4018_v37 = vpack.c.bf16 %v4011_v45, %v4011_v45  ;;  %v8546_v45 = vld [vmem:[#allocation14 + $0xc0] ss:$8 sps:$4 sm:$0xff]  }
 0x46b   :  { %5500 = vmatprep.mubr.bf16.mxu1 %v4018_v37  ;;  %5664 = vmatprep.mubr.bf16.mxu0 %v4018_v37  ;;  %v8551_v37 = vld [vmem:[#allocation14 + $0xd4] ss:$8 sps:$4 sm:$0xff]  }
 0x46c   :  { %5501 = vmatmul.mubr.bf16.vlgmr.msra.gmra.mrb[28].mxu1 %v4017_v49  ;;  %5665 = vmatmul.mubr.bf16.vlgmr.msra.gmra.mrb[16].mxu0 %v4017_v49  ;;  %v8552_v49 = vld [vmem:[#allocation14 + $0xe0] ss:$8 sps:$4 sm:$0xff]  }
 0x46d   :  { %5510 = vmatpush1.bf16.msra.mxu1 %v8462_v55  ;;  %5674 = vmatpush1.bf16.msra.mxu0 %v8465_v56  ;;  %v8549_v55 = vld [vmem:[#allocation14 + $0xd0] ss:$8 sps:$4 sm:$0xff]   ;;  %v8554_v56 = vld [vmem:[#allocation14 + $0xe4] ss:$8 sps:$4 sm:$0xff]  }
 0x46e   :  { %5511 = vmatprep.subr.bf16.mxu1 %v8470_v50  ;;  %5675 = vmatprep.subr.bf16.mxu0 %v8473_v5  ;;  %v8557_v50 = vld [vmem:[#allocation14 + $0xf4] ss:$8 sps:$4 sm:$0xff]   ;;  %v8555_v5 = vld [vmem:[#allocation14 + $0xf0] ss:$8 sps:$4 sm:$0xff]  }
 0x46f   :  { %5541 = vmatprep.mubr.bf16.mxu1 %v8978_v0  ;;  %5705 = vmatprep.mubr.bf16.mxu0 %v8978_v0  ;;  %v8489_v0 = vld [vmem:[#allocation11 + $0x688] ss:$16 sps:$4 sm:$0xff]  }
 0x471   :  { %5512 = vmatpush1.bf16.msra.mxu1 %v8468_v27  ;;  %5676 = vmatpush1.bf16.msra.mxu0 %v8471_v54  ;;  %v8560_v27 = vld [vmem:[#allocation14 + $0x104] ss:$8 sps:$4 sm:$0xff]  }
 0x472   :  { %5513 = vmatprep.subr.bf16.mxu1 %v8476_v16  ;;  %5677 = vmatprep.subr.bf16.mxu0 %v8479_v11  ;;  %v8606_v54 = vld [vmem:[#allocation17 + $0x40] sm:$0xff]   ;;  %v8608_v11 = vld [vmem:[#allocation17 + $0x48] sm:$0xff]  }
 0x473   :  { %v8607_v16 = vld [vmem:[#allocation17] sm:$0xff]  }
 0x475   :  { %5514 = vmatpush1.bf16.msra.mxu1 %v8474_v53  ;;  %5678 = vmatpush1.bf16.msra.mxu0 %v8477_v59  ;;  %v8609_v53 = vld [vmem:[#allocation17 + $0x8] sm:$0xff]   ;;  %v8610_v59 = vld [vmem:[#allocation17 + $0x50] sm:$0xff]  }
 0x476   :  { %5515 = vmatprep.subr.bf16.mxu1 %v8482_v60  ;;  %5679 = vmatprep.subr.bf16.mxu0 %v8485_v61  ;;  %v8611_v60 = vld [vmem:[#allocation17 + $0x10] sm:$0xff]   ;;  %v8612_v61 = vld [vmem:[#allocation17 + $0x58] sm:$0xff]  }
 0x479   :  { %5516 = vmatpush1.bf16.msra.mxu1 %v8480_v62  ;;  %5680 = vmatpush1.bf16.msra.mxu0 %v8483_v1  ;;  %v8613_v62 = vld [vmem:[#allocation17 + $0x18] sm:$0xff]   ;;  %v8614_v1 = vld [vmem:[#allocation17 + $0x60] sm:$0xff]  }
 0x47a   :  { %5517 = vmatprep.subr.bf16.mxu1 %v8488_v2  ;;  %5681 = vmatprep.subr.bf16.mxu0 %v8491_v17  ;;  %v8615_v2 = vld [vmem:[#allocation17 + $0x20] sm:$0xff]   ;;  %v8616_v17 = vld [vmem:[#allocation17 + $0x68] sm:$0xff]  }
 0x47d   :  { %5518 = vmatpush1.bf16.msra.mxu1 %v8486_v3  ;;  %5682 = vmatpush1.bf16.msra.mxu0 %v8489_v0  ;;  %v8617_v3 = vld [vmem:[#allocation17 + $0x28] sm:$0xff]   ;;  %v9379_v0 = vld [vmem:[#allocation13] sm:$0xf] }
 0x47e   :  { %5519 = vmatprep.subr.bf16.mxu1 %v8494_v4  ;;  %5683 = vmatprep.subr.bf16.mxu0 %v8497_v21  ;;  %v4249_v4 = vrot.slane %v9379_v0, %v9227_v28  ;;  %v4253_v21 = vrot.slane %v9379_v0, %v9232_v30 }
 0x481   :  { %5520 = vmatpush1.bf16.msra.mxu1 %v8492_v6  ;;  %5684 = vmatpush1.bf16.msra.mxu0 %v8495_v7  ;;  %v4261_v6 = vrot.slane %v9379_v0, %v9235_v31 }
 0x482   :  { %5521 = vmatprep.subr.bf16.mxu1 %v8500_v8  ;;  %5685 = vmatprep.subr.bf16.mxu0 %v8503_v15 }
 0x485   :  { %5522 = vmatpush1.bf16.msra.mxu1 %v8498_v23  ;;  %5686 = vmatpush1.bf16.msra.mxu0 %v8501_v46 }
 0x486   :  { %5523 = vmatprep.subr.bf16.mxu1 %v8506_v58  ;;  %5687 = vmatprep.subr.bf16.mxu0 %v8509_v9 }
 0x489   :  { %5524 = vmatpush1.bf16.msra.mxu1 %v8504_v10  ;;  %5688 = vmatpush1.bf16.msra.mxu0 %v8507_v48 }
 0x48a   :  { %6118 = vmatprep.subr.bf16.mxu1 %v8512_v29  ;;  %7380 = vmatprep.subr.bf16.mxu0 %v8606_v54  ;;  %v8602_v54 = vld [vmem:[#allocation14 + $0x1e4] ss:$8 sps:$4 sm:$0xff]  }
 0x48c   :  { %5542 = vmatmul.mubr.bf16.vlgmr.msra.gmra.mrb[28].mxu1 %v4019_v12  ;;  %5706 = vmatmul.mubr.bf16.vlgmr.msra.gmra.mrb[16].mxu0 %v4019_v12 }
 0x48d   :  { %6119 = vmatpush1.bf16.msra.mxu1 %v8510_v43  ;;  %7381 = vmatpush3.bf16.msra.mxu0 %v8607_v16  ;;  %v8600_v16 = vld [vmem:[#allocation14 + $0x1e0] ss:$8 sps:$4 sm:$0xff]  }
 0x48e   :  { %6120 = vmatprep.subr.bf16.mxu1 %v8515_v38  ;;  %7382 = vmatprep.subr.bf16.mxu0 %v8608_v11 }
 0x491   :  { %6121 = vmatpush1.bf16.msra.mxu1 %v8513_v13  ;;  %7383 = vmatpush3.bf16.msra.mxu0 %v8609_v53  ;;  %v8605_v53 = vld [vmem:[#allocation14 + $0x1f4] ss:$8 sps:$4 sm:$0xff]  }
 0x492   :  { %6122 = vmatprep.subr.bf16.mxu1 %v8518_v14  ;;  %7384 = vmatprep.subr.bf16.mxu0 %v8610_v59  ;;  %v8558_v14 = vld [vmem:[#allocation14 + $0x100] ss:$8 sps:$4 sm:$0xff]   ;;  %v8603_v59 = vld [vmem:[#allocation14 + $0x1f0] ss:$8 sps:$4 sm:$0xff]  }
 0x495   :  { %6123 = vmatpush1.bf16.msra.mxu1 %v8516_v57  ;;  %7385 = vmatpush3.bf16.msra.mxu0 %v8611_v60 }
 0x496   :  { %6124 = vmatprep.subr.bf16.mxu1 %v8521_v18  ;;  %7386 = vmatprep.subr.bf16.mxu0 %v8612_v61  ;;  %v8563_v18 = vld [vmem:[#allocation14 + $0x114] ss:$8 sps:$4 sm:$0xff]  }
 0x499   :  { %6125 = vmatpush1.bf16.msra.mxu1 %v8519_v35  ;;  %7387 = vmatpush3.bf16.msra.mxu0 %v8613_v62  ;;  %v8561_v35 = vld [vmem:[#allocation14 + $0x110] ss:$8 sps:$4 sm:$0xff]  }
 0x49a   :  { %6126 = vmatprep.subr.bf16.mxu1 %v8524_v19  ;;  %7388 = vmatprep.subr.bf16.mxu0 %v8614_v1  ;;  %v8566_v19 = vld [vmem:[#allocation14 + $0x124] ss:$8 sps:$4 sm:$0xff]   ;;  %v8618_v62 = vld [vmem:[#allocation17 + $0x70] sm:$0xff]  }
 0x49b   :  { %v8619_v1 = vld [vmem:[#allocation17 + $0x30] sm:$0xff]  }
 0x49d   :  { %6127 = vmatpush1.bf16.msra.mxu1 %v8522_v20  ;;  %7389 = vmatpush3.bf16.msra.mxu0 %v8615_v2  ;;  %v8564_v20 = vld [vmem:[#allocation14 + $0x120] ss:$8 sps:$4 sm:$0xff]  }
 0x49e   :  { %6128 = vmatprep.subr.bf16.mxu1 %v8527_v22  ;;  %7390 = vmatprep.subr.bf16.mxu0 %v8616_v17  ;;  %v8569_v22 = vld [vmem:[#allocation14 + $0x134] ss:$8 sps:$4 sm:$0xff]   ;;  %v8622_v17 = vld [vmem:[#allocation20] sm:$0xff]  }
 0x49f   :  { %v8621_v2 = vld [vmem:[#allocation17 + $0x38] sm:$0xff]  }
 0x4a1   :  { %6129 = vmatpush1.bf16.msra.mxu1 %v8525_v24  ;;  %7391 = vmatpush3.bf16.msra.mxu0 %v8617_v3  ;;  %v8567_v24 = vld [vmem:[#allocation14 + $0x130] ss:$8 sps:$4 sm:$0xff]   ;;  %v8979_v3 = vmov 0.0  }
 0x4a2   :  { %6130 = vmatprep.subr.bf16.mxu1 %v8530_v25  ;;  %v8572_v25 = vld [vmem:[#allocation14 + $0x144] ss:$8 sps:$4 sm:$0xff]   ;;  %7392 = vmatprep.subr.bf16.mxu0 %v8618_v62 }
 0x4a5   :  { %6131 = vmatpush1.bf16.msra.mxu1 %v8528_v26  ;;  %v8570_v26 = vld [vmem:[#allocation14 + $0x140] ss:$8 sps:$4 sm:$0xff]   ;;  %7393 = vmatpush3.bf16.msra.mxu0 %v8619_v1 }
 0x4a6   :  { %6132 = vmatprep.subr.bf16.mxu1 %v8533_v32  ;;  %v8575_v32 = vld [vmem:[#allocation14 + $0x154] ss:$8 sps:$4 sm:$0xff]  }
 0x4a9   :  { %6133 = vmatpush1.bf16.msra.mxu1 %v8531_v51  ;;  %v8573_v51 = vld [vmem:[#allocation14 + $0x150] ss:$8 sps:$4 sm:$0xff]  }
 0x4aa   :  { %6134 = vmatprep.subr.bf16.mxu1 %v8536_v33  ;;  %v8578_v33 = vld [vmem:[#allocation14 + $0x164] ss:$8 sps:$4 sm:$0xff]  }
 0x4ad   :  { %6135 = vmatpush1.bf16.msra.mxu1 %v8534_v34  ;;  %v8576_v34 = vld [vmem:[#allocation14 + $0x160] ss:$8 sps:$4 sm:$0xff]  }
 0x4ae   :  { %6136 = vmatprep.subr.bf16.mxu1 %v8539_v36  ;;  %v8581_v36 = vld [vmem:[#allocation14 + $0x174] ss:$8 sps:$4 sm:$0xff]  }
 0x4b1   :  { %6137 = vmatpush1.bf16.msra.mxu1 %v8537_v39  ;;  %v8579_v39 = vld [vmem:[#allocation14 + $0x170] ss:$8 sps:$4 sm:$0xff]  }
 0x4b2   :  { %6138 = vmatprep.subr.bf16.mxu1 %v8542_v40  ;;  %v8584_v40 = vld [vmem:[#allocation14 + $0x184] ss:$8 sps:$4 sm:$0xff]  }
 0x4b5   :  { %6139 = vmatpush1.bf16.msra.mxu1 %v8540_v42  ;;  %v8582_v42 = vld [vmem:[#allocation14 + $0x180] ss:$8 sps:$4 sm:$0xff]  }
 0x4b6   :  { %6140 = vmatprep.subr.bf16.mxu1 %v8545_v52  ;;  %v8587_v52 = vld [vmem:[#allocation14 + $0x194] ss:$8 sps:$4 sm:$0xff]  }
 0x4b9   :  { %6141 = vmatpush1.bf16.msra.mxu1 %v8543_v63  ;;  %v8585_v63 = vld [vmem:[#allocation14 + $0x190] ss:$8 sps:$4 sm:$0xff]  }
 0x4ba   :  { %6142 = vmatprep.subr.bf16.mxu1 %v8548_v44  ;;  %v8590_v44 = vld [vmem:[#allocation14 + $0x1a4] ss:$8 sps:$4 sm:$0xff]  }
 0x4bd   :  { %6143 = vmatpush1.bf16.msra.mxu1 %v8546_v45  ;;  %v8588_v45 = vld [vmem:[#allocation14 + $0x1a0] ss:$8 sps:$4 sm:$0xff]  }
 0x4be   :  { %6144 = vmatprep.subr.bf16.mxu1 %v8551_v37  ;;  %v8593_v37 = vld [vmem:[#allocation14 + $0x1b4] ss:$8 sps:$4 sm:$0xff]  }
 0x4c1   :  { %6145 = vmatpush1.bf16.msra.mxu1 %v8549_v55  ;;  %v8591_v55 = vld [vmem:[#allocation14 + $0x1b0] ss:$8 sps:$4 sm:$0xff]  }
 0x4c2   :  { %6146 = vmatprep.subr.bf16.mxu1 %v8554_v56  ;;  %v8596_v56 = vld [vmem:[#allocation14 + $0x1c4] ss:$8 sps:$4 sm:$0xff]  }
 0x4c5   :  { %6147 = vmatpush1.bf16.msra.mxu1 %v8552_v49  ;;  %v8594_v49 = vld [vmem:[#allocation14 + $0x1c0] ss:$8 sps:$4 sm:$0xff]  }
 0x4c6   :  { %6148 = vmatprep.subr.bf16.mxu1 %v8557_v50  ;;  %v8599_v50 = vld [vmem:[#allocation14 + $0x1d4] ss:$8 sps:$4 sm:$0xff]  }
 0x4c9   :  { %6149 = vmatpush1.bf16.msra.mxu1 %v8555_v5  ;;  %v8597_v5 = vld [vmem:[#allocation14 + $0x1d0] ss:$8 sps:$4 sm:$0xff]  }
 0x4ca   :  { %6159 = vmatprep.subr.bf16.mxu1 %v8560_v27  ;;  %v4257_v27 = vrot.slane %v9379_v0, %v9262_v47  ;;  %v8620_v47 = vld [vmem:[#allocation17 + $0x78] sm:$0xff]   ;;  %v8623_v0 = vld [vmem:[#allocation20 + $0x8] sm:$0xff]  }
 0x4cb   :  { %7394 = vmatprep.subr.bf16.mxu0 %v8620_v47 }
 0x4cc   :  { %7395 = vmatpush3.bf16.msra.mxu0 %v8621_v2 }
 0x55f   :  { %v5543_v7 = vpop.f32.mrb[28].mxu1  ;;  %v9387_v8 = vpop.f32.mrb[16].mxu0 }
 0x560   :  { %v7437_v15 = vadd.f32 %v5543_v7, %v4249_v4  ;;  %v5545_v23 = vpop.f32.mrb[29].mxu1  ;;  %v5709_v46 = vpop.f32.mrb[17].mxu0  ;;  %v7439_v11 = vadd.f32 %v9387_v8, %v4257_v27  ;;  %v8624_v4 = vld [vmem:[#allocation20 + $0x10] sm:$0xff]   ;;  %v8627_v7 = vld [vmem:[#allocation20 + $0x28] sm:$0xff]   ;;  %v5786_v8 = vld [vmem:[#allocation16] sm:$0x3] }
 0x561   :  { %v7438_v58 = vadd.f32 %v5545_v23, %v4253_v21  ;;  %v7440_v9 = vadd.f32 %v5709_v46, %v4261_v6  ;;  %v5547_v10 = vpop.f32.mrb[30].mxu1  ;;  %v5711_v48 = vpop.f32.mrb[18].mxu0  ;;  %v8625_v21 = vld [vmem:[#allocation20 + $0x18] sm:$0xff]   ;;  %v8626_v6 = vld [vmem:[#allocation20 + $0x20] sm:$0xff]   ;;  %v5795_v23 = vrot.slane %v5786_v8, %v9232_v30 }
 0x562   :  { %v5714_v41 = vmax.f32 %v7437_v15, 0.0  ;;  %v5548_v29 = vpop.f32.mrb[31].mxu1  ;;  %v5712_v43 = vpop.f32.mrb[19].mxu0  ;;  %v5716_v60 = vmax.f32 %v7439_v11, 0.0  ;;  %v5791_v15 = vrot.slane %v5786_v8, %v9227_v28  ;;  %v7266_v30 = vld [vmem:[#allocation19] ss:$0 sm:$0xff] }
 0x563   :  { %v5715_v12 = vmax.f32 %v7438_v58, 0.0  ;;  %v5717_v38 = vmax.f32 %v7440_v9, 0.0 }
 0x564   :  { %v5718_v57 = vpack.c.bf16 %v5714_v41, %v5714_v41  ;;  %v5720_v61 = vpack.c.bf16 %v5716_v60, %v5716_v60 }
 0x565   :  { %v5719_v13 = vpack.c.bf16 %v5715_v12, %v5715_v12  ;;  %v5721_v31 = vpack.c.bf16 %v5717_v38, %v5717_v38 }
 0x567   :  { %6150 = vmatprep.mubr.bf16.mxu1 %v5719_v13  ;;  %v8628_v13 = vld [vmem:[#allocation20 + $0x30] sm:$0xff]  }
 0x568   :  { %6151 = vmatmul.mubr.bf16.vlgmr.msra.gmra.mrb[32].mxu1 %v5718_v57 }
 0x569   :  { %6160 = vmatpush1.bf16.msra.mxu1 %v8558_v14  ;;  %6191 = vmatprep.mubr.bf16.mxu1 %v5721_v31  ;;  %v8629_v14 = vld [vmem:[#allocation20 + $0x38] sm:$0xff]  }
 0x56a   :  { %6161 = vmatprep.subr.bf16.mxu1 %v8563_v18 }
 0x56d   :  { %6162 = vmatpush1.bf16.msra.mxu1 %v8561_v35 }
 0x56e   :  { %6163 = vmatprep.subr.bf16.mxu1 %v8566_v19 }
 0x571   :  { %6164 = vmatpush1.bf16.msra.mxu1 %v8564_v20 }
 0x572   :  { %6165 = vmatprep.subr.bf16.mxu1 %v8569_v22 }
 0x575   :  { %6166 = vmatpush1.bf16.msra.mxu1 %v8567_v24  ;;  %v7283_v24 = vld [vmem:[#allocation22] ss:$0 sm:$0xff] }
 0x576   :  { %6167 = vmatprep.subr.bf16.mxu1 %v8572_v25 }
 0x579   :  { %6168 = vmatpush1.bf16.msra.mxu1 %v8570_v26 }
 0x57a   :  { %6169 = vmatprep.subr.bf16.mxu1 %v8575_v32 }
 0x57d   :  { %6170 = vmatpush1.bf16.msra.mxu1 %v8573_v51 }
 0x57e   :  { %6171 = vmatprep.subr.bf16.mxu1 %v8578_v33 }
 0x581   :  { %6172 = vmatpush1.bf16.msra.mxu1 %v8576_v34 }
 0x582   :  { %6173 = vmatprep.subr.bf16.mxu1 %v8581_v36 }
 0x585   :  { %6174 = vmatpush1.bf16.msra.mxu1 %v8579_v39 }
 0x586   :  { %6175 = vmatprep.subr.bf16.mxu1 %v8584_v40 }
 0x589   :  { %6176 = vmatpush1.bf16.msra.mxu1 %v8582_v42 }
 0x58a   :  { %6177 = vmatprep.subr.bf16.mxu1 %v8587_v52 }
 0x58d   :  { %6178 = vmatpush1.bf16.msra.mxu1 %v8585_v63 }
 0x58e   :  { %6179 = vmatprep.subr.bf16.mxu1 %v8590_v44 }
 0x591   :  { %6180 = vmatpush1.bf16.msra.mxu1 %v8588_v45 }
 0x592   :  { %6181 = vmatprep.subr.bf16.mxu1 %v8593_v37 }
 0x595   :  { %6182 = vmatpush1.bf16.msra.mxu1 %v8591_v55 }
 0x596   :  { %6183 = vmatprep.subr.bf16.mxu1 %v8596_v56 }
 0x599   :  { %6184 = vmatpush1.bf16.msra.mxu1 %v8594_v49 }
 0x59a   :  { %6185 = vmatprep.subr.bf16.mxu1 %v8599_v50 }
 0x59d   :  { %6186 = vmatpush1.bf16.msra.mxu1 %v8597_v5 }
 0x59e   :  { %6187 = vmatprep.subr.bf16.mxu1 %v8602_v54 }
 0x5a1   :  { %6188 = vmatpush1.bf16.msra.mxu1 %v8600_v16 }
 0x5a2   :  { %6189 = vmatprep.subr.bf16.mxu1 %v8605_v53 }
 0x5a5   :  { %6190 = vmatpush1.bf16.msra.mxu1 %v8603_v59 }
 0x5a6   :  { %7411 = vmatprep.subr.bf16.mxu1 %v8979_v3 }
 0x5a8   :  { %6192 = vmatmul.mubr.bf16.vlgmr.msra.gmra.mrb[32].mxu1 %v5720_v61 }
 0x5a9   :  { %7412 = vmatpush3.bf16.msra.mxu1 %v8622_v17  ;;  %7427 = vmatprep.mubr.msk.bf16.mxu1 %vm8980_vm2, %v8979_v3 }
 0x5aa   :  { %7413 = vmatprep.subr.bf16.mxu1 %v8979_v3 }
 0x5ad   :  { %7414 = vmatpush3.bf16.msra.mxu1 %v8623_v0 }
 0x5ae   :  { %7415 = vmatprep.subr.bf16.mxu1 %v8979_v3 }
 0x5b1   :  { %7416 = vmatpush3.bf16.msra.mxu1 %v8624_v4 }
 0x5b2   :  { %7417 = vmatprep.subr.bf16.mxu1 %v8979_v3 }
 0x5b5   :  { %7418 = vmatpush3.bf16.msra.mxu1 %v8625_v21 }
 0x5b6   :  { %7419 = vmatprep.subr.bf16.mxu1 %v8979_v3 }
 0x5b9   :  { %7420 = vmatpush3.bf16.msra.mxu1 %v8626_v6 }
 0x5ba   :  { %7421 = vmatprep.subr.bf16.mxu1 %v8979_v3 }
 0x5bd   :  { %7422 = vmatpush3.bf16.msra.mxu1 %v8627_v7 }
 0x5be   :  { %7423 = vmatprep.subr.bf16.mxu1 %v8979_v3 }
 0x5c1   :  { %7424 = vmatpush3.bf16.msra.mxu1 %v8628_v13 }
 0x5c2   :  { %7425 = vmatprep.subr.bf16.mxu1 %v8979_v3 }
 0x5c5   :  { %7426 = vmatpush3.bf16.msra.mxu1 %v8629_v14 }
 0x67b   :  { %v6193_v46 = vpop.f32.mrb[32].mxu1 }
 0x67c   :  { %v7441_v58 = vadd.f32 %v6193_v46, %v5791_v15  ;;  %v6195_v9 = vpop.f32.mrb[33].mxu1 }
 0x67d   :  { %v7442_v10 = vadd.f32 %v6195_v9, %v5795_v23  ;;  %v6197_v48 = vpop.f32.mrb[34].mxu1 }
 0x67e   :  { %v6200_v41 = vmax.f32 %v7441_v58, 0.0  ;;  %v6198_v29 = vpop.f32.mrb[35].mxu1 }
 0x67f   :  { %v6201_v43 = vmax.f32 %v7442_v10, 0.0 }
 0x680   :  { %v6202_v38 = vpack.c.bf16 %v6200_v41, %v6200_v41 }
 0x681   :  { %v6203_v12 = vpack.c.bf16 %v6201_v43, %v6201_v43 }
 0x683   :  { %6371 = vmatprep.mubr.bf16.mxu0 %v6203_v12 }
 0x684   :  { %6372 = vmatmul.mubr.bf16.vlgmr.msra.gmra.mrb[20].mxu0 %v6202_v38 }
 0x757   :  { %v7396_v28 = vpop.f32.mrb[20].mxu0 }
 0x758   :  { %v7397_v57 = vpop.f32.mrb[21].mxu0 }
 0x759   :  { %v7398_v18 = vadd.f32 %v7397_v57, %v7396_v28  ;;  %v7399_v31 = vpop.f32.mrb[22].mxu0 }
 0x75a   :  { %v7400_v35 = vpop.f32.mrb[23].mxu0 }
 0x75b   :  { %v6374_v19 = vadd.f32 %v7398_v18, %v7266_v30 }
 0x75d   :  { %v6379_v20 = vmax.f32 %v6374_v19, 0.0 }
 0x75f   :  { %v6380_v22 = vpack.c.bf16 %v6379_v20, %v6379_v20 }
 0x761   :  { %7428 = vmatmul.mubr.bf16.vlgmr.msra.gmra.mrb[36].mxu1 %v6380_v22 }
 0x834   :  { %v6486_v25 = vpop.f32.mrb[36].mxu1 }
 0x835   :  { %v6487_v26 = vadd.f32 %v7283_v24, %v6486_v25  ;;  %v7429_v32 = vpop.f32.mrb[37].mxu1 }
 0x836   :  { %v6489_v51 = vpop.f32.mrb[38].mxu1 }
 0x837   :  { %6492 = vst [vmem:[#allocation23] sm:$0xff] %v6487_v26  ;;  %v7430_v33 = vpop.f32.mrb[39].mxu1 }
 0x838   :  { %8928 = shalt.err (!%p8925_p10)
}
 0x839   :  { %s8929_s2 = scalar_lea.hbm %s9419_s13, 128 }
 0x83a   :  { %p8930_p11 = scmp.ne.s32.totalorder %s9419_s13, %s8929_s2  ;;  %p8933_p12 = scmp.lt.u32.totalorder %s8929_s2, %s9419_s13 }
 0x83c   :  { %p8935_p13 = pnand %p8933_p12, %p8930_p11 }
 0x83e   :  { %8938 = shalt.err (!%p8935_p13)
}
 0x83f   :  { %6502 = dma.vmem_to_hbm [thread:$0]  %s6500_s21, 128, %s9419_s13, [#allocation4]  }
 0x840   :  { %8953 = dma.done.wait [#allocation4], 128  }
 0x841   :  { %8954 = vsyncadd [#allocation4], 4294967168 }
 0x842   :  { %6506 = vsyncpa [#allocation3], 1 }
 0x843   :  { %6507 = vsyncpa [#allocation6], 1 }
 0x844   :  { %6508 = vsyncpa [#allocation9], 1 }
 0x845   :  { %6509 = vsyncpa [#allocation12], 1 }
 0x846   :  { %6510 = vsyncpa [#allocation15], 1 }
 0x847   :  { %6511 = vsyncpa [#allocation18], 1 }
 0x848   :  { %6512 = vsyncpa [#allocation21], 1 }
 0x849   :  { %6513 = vsyncpa [#allocation4], 1 }

</bundles_post_ra>
